<compile_context>
chip_gen: v7x
topology: tpu7x:2x2x1
jax: 0.10.0
libtpu: 0.0.40
codegen_flags: <defaults>
</compile_context>

<pallas_src>
import functools
import math

import jax
import jax.numpy as jnp
from jax import lax
from jax.experimental import pallas as pl
from jax.experimental.pallas import tpu as pltpu

# ---- scaled-down RoBERTa config (roberta-base is 768/12/12/3072; synthetic here) ----
VOCAB = 100
HIDDEN = 64
N_LAYERS = 2
N_HEADS = 4
HEAD_DIM = HIDDEN // N_HEADS
INTERMEDIATE = 128
MAX_POS = 64
PAD_ID = 1
N_CLASSES = 6
NPAD = 128          # lane-dense padded width for the classifier head output
LN_EPS = 1e-5


# ---------------------------------------------------------------------------
# Single fused forward kernel: embeddings-LN -> N encoder layers -> mean pool -> fc
# ---------------------------------------------------------------------------
def _webattack_fwd_kernel(
    x_ref,                       # (B*S, H)  embedding sum (pre-LayerNorm)
    bias_ref,                    # (B, S)    additive attention-mask bias (0 / -1e9)
    emb_g_ref, emb_b_ref,        # (1, H)
    qkv_w_ref, qkv_b_ref,        # (L, H, 3H), (L, 1, 3H)
    wo_ref, bo_ref,              # (L, H, H), (L, 1, H)
    ln1_g_ref, ln1_b_ref,        # (L, 1, H)
    wi_ref, bi_ref,              # (L, H, I), (L, 1, I)
    wf_ref, bf_ref,              # (L, I, H), (L, 1, H)
    ln2_g_ref, ln2_b_ref,        # (L, 1, H)
    fc_w_ref, fc_b_ref,          # (H, NPAD), (1, NPAD)
    out_ref,                     # (B, NPAD)
    *, batch, seq,
):
    H = HIDDEN
    Dh = HEAD_DIM
    scale = 1.0 / math.sqrt(Dh)
    inv_sqrt2 = 1.0 / math.sqrt(2.0)

    def _ln(v, g, b):
        mu = jnp.mean(v, axis=-1, keepdims=True)
        var = jnp.mean(jnp.square(v - mu), axis=-1, keepdims=True)
        return (v - mu) * lax.rsqrt(var + LN_EPS) * g + b

    bias = bias_ref[...]                                   # (B, S)

    # --- embedding LayerNorm ---
    x = _ln(x_ref[...], emb_g_ref[...], emb_b_ref[...])    # (B*S, H)

    # --- transformer encoder layers (statically unrolled) ---
    for l in range(N_LAYERS):
        # fused QKV projection: one (B*S, H) x (H, 3H) matmul
        qkv = jnp.dot(x, qkv_w_ref[l], preferred_element_type=jnp.float32) + qkv_b_ref[l]
        q = qkv[:, 0 * H:1 * H]
        k = qkv[:, 1 * H:2 * H]
        v = qkv[:, 2 * H:3 * H]

        # multi-head attention: static batch / head loops, lane-sliced heads
        ctx_rows = []
        for b in range(batch):
            r0, r1 = b * seq, (b + 1) * seq
            qb, kb, vb = q[r0:r1, :], k[r0:r1, :], v[r0:r1, :]
            bias_b = bias[b:b + 1, :]                       # (1, S)
            heads = []
            for hh in range(N_HEADS):
                c0, c1 = hh * Dh, (hh + 1) * Dh
                qh, kh, vh = qb[:, c0:c1], kb[:, c0:c1], vb[:, c0:c1]
                # q @ k^T without an explicit transpose
                s = lax.dot_general(
                    qh, kh, (((1,), (1,)), ((), ())),
                    preferred_element_type=jnp.float32) * scale + bias_b
                s = s - jnp.max(s, axis=-1, keepdims=True)
                p = jnp.exp(s)
                p = p * pl.reciprocal(jnp.sum(p, axis=-1, keepdims=True), approx=True)
                heads.append(jnp.dot(p, vh, preferred_element_type=jnp.float32))
            ctx_rows.append(jnp.concatenate(heads, axis=-1))     # (S, H)
        ctx = jnp.concatenate(ctx_rows, axis=0)                  # (B*S, H)

        # output projection + residual folded into LayerNorm
        attn_out = jnp.dot(ctx, wo_ref[l], preferred_element_type=jnp.float32) + bo_ref[l]
        x = _ln(attn_out + x, ln1_g_ref[l], ln1_b_ref[l])

        # fused FFN: intermediate never leaves VMEM
        inter = jnp.dot(x, wi_ref[l], preferred_element_type=jnp.float32) + bi_ref[l]
        inter = 0.5 * inter * (1.0 + lax.erf(inter * inv_sqrt2))   # exact GELU
        ffn = jnp.dot(inter, wf_ref[l], preferred_element_type=jnp.float32) + bf_ref[l]
        x = _ln(ffn + x, ln2_g_ref[l], ln2_b_ref[l])

    # --- mean pool over sequence (includes pads, matching output.mean(1)) + fc ---
    pooled = jnp.concatenate(
        [jnp.mean(x[b * seq:(b + 1) * seq, :], axis=0, keepdims=True)
         for b in range(batch)], axis=0)                         # (B, H)
    out_ref[...] = (jnp.dot(pooled, fc_w_ref[...],
                            preferred_element_type=jnp.float32) + fc_b_ref[...])


def _vspec(shape):
    zeros = (0,) * len(shape)
    return pl.BlockSpec(shape, lambda i, z=zeros: z)


# ---------------------------------------------------------------------------
# Parameters (deterministic synthetic init); per-layer weights pre-stacked/fused
# ---------------------------------------------------------------------------
def init_params(key):
    keys = iter(jax.random.split(key, 8))

    def w(shape):
        return 0.02 * jax.random.normal(next(keys), shape, jnp.float32)

    fc_core = w((HIDDEN, N_CLASSES))
    fc_w = jnp.zeros((HIDDEN, NPAD), jnp.float32).at[:, :N_CLASSES].set(fc_core)

    return {
        "word_emb": w((VOCAB, HIDDEN)),
        "pos_emb": w((MAX_POS, HIDDEN)),
        "type_emb": w((1, HIDDEN)),
        "emb_ln_g": jnp.ones((1, HIDDEN), jnp.float32),
        "emb_ln_b": jnp.zeros((1, HIDDEN), jnp.float32),
        # fused QKV: columns [0:H]=Q, [H:2H]=K, [2H:3H]=V
        "qkv_w": w((N_LAYERS, HIDDEN, 3 * HIDDEN)),
        "qkv_b": jnp.zeros((N_LAYERS, 1, 3 * HIDDEN), jnp.float32),
        "wo": w((N_LAYERS, HIDDEN, HIDDEN)),
        "bo": jnp.zeros((N_LAYERS, 1, HIDDEN), jnp.float32),
        "ln1_g": jnp.ones((N_LAYERS, 1, HIDDEN), jnp.float32),
        "ln1_b": jnp.zeros((N_LAYERS, 1, HIDDEN), jnp.float32),
        "wi": w((N_LAYERS, HIDDEN, INTERMEDIATE)),
        "bi": jnp.zeros((N_LAYERS, 1, INTERMEDIATE), jnp.float32),
        "wf": w((N_LAYERS, INTERMEDIATE, HIDDEN)),
        "bf": jnp.zeros((N_LAYERS, 1, HIDDEN), jnp.float32),
        "ln2_g": jnp.ones((N_LAYERS, 1, HIDDEN), jnp.float32),
        "ln2_b": jnp.zeros((N_LAYERS, 1, HIDDEN), jnp.float32),
        "fc_w": fc_w,
        "fc_b": jnp.zeros((1, NPAD), jnp.float32),
    }


# ---------------------------------------------------------------------------
# Forward pass (== WebAttack_Classfier.forward; returns logits of shape (B, 6))
# ---------------------------------------------------------------------------
def web_attack_classifier(params, input_ids, attention_mask):
    B, S = input_ids.shape

    # RoBERTa embedding gathers stay as XLA glue (data-dependent gather).
    not_pad = (input_ids != PAD_ID).astype(jnp.int32)
    position_ids = jnp.cumsum(not_pad, axis=1) * not_pad + PAD_ID
    h = (jnp.take(params["word_emb"], input_ids, axis=0)
         + jnp.take(params["pos_emb"], position_ids, axis=0)
         + params["type_emb"][0][None, None, :])
    x2d = h.reshape(B * S, HIDDEN).astype(jnp.float32)

    # additive attention-mask bias: 0 for real tokens, -1e9 for padding
    mask_bias = (1.0 - attention_mask.astype(jnp.float32)) * -1e9   # (B, S)

    inputs = [
        x2d, mask_bias,
        params["emb_ln_g"], params["emb_ln_b"],
        params["qkv_w"], params["qkv_b"],
        params["wo"], params["bo"],
        params["ln1_g"], params["ln1_b"],
        params["wi"], params["bi"],
        params["wf"], params["bf"],
        params["ln2_g"], params["ln2_b"],
        params["fc_w"], params["fc_b"],
    ]

    logits_padded = pl.pallas_call(
        functools.partial(_webattack_fwd_kernel, batch=B, seq=S),
        out_shape=jax.ShapeDtypeStruct((B, NPAD), jnp.float32),
        grid=(1,),
        in_specs=[_vspec(a.shape) for a in inputs],
        out_specs=_vspec((B, NPAD)),
        compiler_params=pltpu.CompilerParams(
            dimension_semantics=("arbitrary",)),
    )(*inputs)

    return logits_padded[:, :N_CLASSES]


# ---------------------------------------------------------------------------
if __name__ == "__main__":
    key = jax.random.PRNGKey(0)
    pkey, ikey = jax.random.split(key)
    params = init_params(pkey)

    B, S = 2, 16
    input_ids = jax.random.randint(ikey, (B, S), 3, VOCAB, dtype=jnp.int32)
    attention_mask = jnp.ones((B, S), dtype=jnp.int32)
    # pad the tail of the second example (RoBERTa-style padding)
    input_ids = input_ids.at[1, S - 4:].set(PAD_ID)
    attention_mask = attention_mask.at[1, S - 4:].set(0)

    fwd = jax.jit(web_attack_classifier)
    logits = fwd(params, input_ids, attention_mask)
    jax.block_until_ready(logits)

    assert logits.shape == (B, N_CLASSES) and logits.dtype == jnp.float32
    assert bool(jnp.all(jnp.isfinite(logits)))
    print("KERNEL_OK")
</pallas_src>

<mosaic_0001>
module attributes {stable_mosaic.version = 11 : i64} {
  func.func @_webattack_fwd_kernel(%arg0: i32, %arg1: memref<32x64xf32, #tpu.memory_space<vmem>>, %arg2: memref<2x16xf32, #tpu.memory_space<vmem>>, %arg3: memref<1x64xf32, #tpu.memory_space<vmem>>, %arg4: memref<1x64xf32, #tpu.memory_space<vmem>>, %arg5: memref<2x64x192xf32, #tpu.memory_space<vmem>>, %arg6: memref<2x1x192xf32, #tpu.memory_space<vmem>>, %arg7: memref<2x64x64xf32, #tpu.memory_space<vmem>>, %arg8: memref<2x1x64xf32, #tpu.memory_space<vmem>>, %arg9: memref<2x1x64xf32, #tpu.memory_space<vmem>>, %arg10: memref<2x1x64xf32, #tpu.memory_space<vmem>>, %arg11: memref<2x64x128xf32, #tpu.memory_space<vmem>>, %arg12: memref<2x1x128xf32, #tpu.memory_space<vmem>>, %arg13: memref<2x128x64xf32, #tpu.memory_space<vmem>>, %arg14: memref<2x1x64xf32, #tpu.memory_space<vmem>>, %arg15: memref<2x1x64xf32, #tpu.memory_space<vmem>>, %arg16: memref<2x1x64xf32, #tpu.memory_space<vmem>>, %arg17: memref<64x128xf32, #tpu.memory_space<vmem>>, %arg18: memref<1x128xf32, #tpu.memory_space<vmem>>, %arg19: memref<2x128xf32, #tpu.memory_space<vmem>>) attributes {dimension_semantics = [#tpu.dimension_semantics<arbitrary>], iteration_bounds = array<i64: 1>, scalar_prefetch = 0 : i64, scratch_operands = 0 : i64, tpu.core_type = #tpu.core_type<tc>, window_params = [{pipeline_mode = #tpu.pipeline_mode<synchronous>, transform_indices = @transform_0, window_bounds = array<i64: 32, 64>}, {pipeline_mode = #tpu.pipeline_mode<synchronous>, transform_indices = @transform_1, window_bounds = array<i64: 2, 16>}, {pipeline_mode = #tpu.pipeline_mode<synchronous>, transform_indices = @transform_2, window_bounds = array<i64: 1, 64>}, {pipeline_mode = #tpu.pipeline_mode<synchronous>, transform_indices = @transform_3, window_bounds = array<i64: 1, 64>}, {pipeline_mode = #tpu.pipeline_mode<synchronous>, transform_indices = @transform_4, window_bounds = array<i64: 2, 64, 192>}, {pipeline_mode = #tpu.pipeline_mode<synchronous>, transform_indices = @transform_5, window_bounds = array<i64: 2, 1, 192>}, {pipeline_mode = #tpu.pipeline_mode<synchronous>, transform_indices = @transform_6, window_bounds = array<i64: 2, 64, 64>}, {pipeline_mode = #tpu.pipeline_mode<synchronous>, transform_indices = @transform_7, window_bounds = array<i64: 2, 1, 64>}, {pipeline_mode = #tpu.pipeline_mode<synchronous>, transform_indices = @transform_8, window_bounds = array<i64: 2, 1, 64>}, {pipeline_mode = #tpu.pipeline_mode<synchronous>, transform_indices = @transform_9, window_bounds = array<i64: 2, 1, 64>}, {pipeline_mode = #tpu.pipeline_mode<synchronous>, transform_indices = @transform_10, window_bounds = array<i64: 2, 64, 128>}, {pipeline_mode = #tpu.pipeline_mode<synchronous>, transform_indices = @transform_11, window_bounds = array<i64: 2, 1, 128>}, {pipeline_mode = #tpu.pipeline_mode<synchronous>, transform_indices = @transform_12, window_bounds = array<i64: 2, 128, 64>}, {pipeline_mode = #tpu.pipeline_mode<synchronous>, transform_indices = @transform_13, window_bounds = array<i64: 2, 1, 64>}, {pipeline_mode = #tpu.pipeline_mode<synchronous>, transform_indices = @transform_14, window_bounds = array<i64: 2, 1, 64>}, {pipeline_mode = #tpu.pipeline_mode<synchronous>, transform_indices = @transform_15, window_bounds = array<i64: 2, 1, 64>}, {pipeline_mode = #tpu.pipeline_mode<synchronous>, transform_indices = @transform_16, window_bounds = array<i64: 64, 128>}, {pipeline_mode = #tpu.pipeline_mode<synchronous>, transform_indices = @transform_17, window_bounds = array<i64: 1, 128>}, {pipeline_mode = #tpu.pipeline_mode<synchronous>, transform_indices = @transform_18, window_bounds = array<i64: 2, 128>}]} {
    %c0 = arith.constant 0 : index
    %c0_0 = arith.constant 0 : index
    %0 = vector.load %arg2[%c0, %c0_0] : memref<2x16xf32, #tpu.memory_space<vmem>>, vector<2x16xf32>
    %c0_1 = arith.constant 0 : index
    %c0_2 = arith.constant 0 : index
    %1 = vector.load %arg1[%c0_1, %c0_2] : memref<32x64xf32, #tpu.memory_space<vmem>>, vector<32x64xf32>
    %c0_3 = arith.constant 0 : index
    %c0_4 = arith.constant 0 : index
    %2 = vector.load %arg3[%c0_3, %c0_4] : memref<1x64xf32, #tpu.memory_space<vmem>>, vector<1x64xf32>
    %c0_5 = arith.constant 0 : index
    %c0_6 = arith.constant 0 : index
    %3 = vector.load %arg4[%c0_5, %c0_6] : memref<1x64xf32, #tpu.memory_space<vmem>>, vector<1x64xf32>
    %cst = arith.constant dense<0.000000e+00> : vector<32xf32>
    %4 = vector.multi_reduction <add>, %1, %cst [1] : vector<32x64xf32> to vector<32xf32>
    %5 = vector.shape_cast %4 : vector<32xf32> to vector<32x1xf32>
    %cst_7 = arith.constant 6.400000e+01 : f32
    %6 = vector.broadcast %cst_7 : f32 to vector<32x1xf32>
    %7 = arith.divf %5, %6 : vector<32x1xf32>
    %8 = vector.broadcast %7 : vector<32x1xf32> to vector<32x64xf32>
    %9 = arith.subf %1, %8 : vector<32x64xf32>
    %10 = arith.mulf %9, %9 : vector<32x64xf32>
    %cst_8 = arith.constant dense<0.000000e+00> : vector<32xf32>
    %11 = vector.multi_reduction <add>, %10, %cst_8 [1] : vector<32x64xf32> to vector<32xf32>
    %12 = vector.shape_cast %11 : vector<32xf32> to vector<32x1xf32>
    %cst_9 = arith.constant 6.400000e+01 : f32
    %13 = vector.broadcast %cst_9 : f32 to vector<32x1xf32>
    %14 = arith.divf %12, %13 : vector<32x1xf32>
    %15 = vector.broadcast %7 : vector<32x1xf32> to vector<32x64xf32>
    %16 = arith.subf %1, %15 : vector<32x64xf32>
    %cst_10 = arith.constant 9.99999974E-6 : f32
    %17 = vector.broadcast %cst_10 : f32 to vector<32x1xf32>
    %18 = arith.addf %14, %17 : vector<32x1xf32>
    %19 = math.rsqrt %18 : vector<32x1xf32>
    %20 = vector.broadcast %19 : vector<32x1xf32> to vector<32x64xf32>
    %21 = arith.mulf %16, %20 : vector<32x64xf32>
    %22 = vector.broadcast %2 : vector<1x64xf32> to vector<32x64xf32>
    %23 = arith.mulf %21, %22 : vector<32x64xf32>
    %24 = vector.broadcast %3 : vector<1x64xf32> to vector<32x64xf32>
    %25 = arith.addf %23, %24 : vector<32x64xf32>
    %c0_11 = arith.constant 0 : index
    %c0_12 = arith.constant 0 : index
    %c0_13 = arith.constant 0 : index
    %26 = vector.load %arg5[%c0_11, %c0_12, %c0_13] : memref<2x64x192xf32, #tpu.memory_space<vmem>>, vector<1x64x192xf32>
    %27 = vector.shape_cast %26 : vector<1x64x192xf32> to vector<64x192xf32>
    %cst_14 = arith.constant dense<0.000000e+00> : vector<32x192xf32>
    %28 = tpu.matmul %25, %27, %cst_14 {dimension_numbers = #tpu.dot_dimension_numbers<[1], [0], [0], [1], [0, 0, 1, 1], [], []>} : vector<32x64xf32>, vector<64x192xf32>, vector<32x192xf32> -> vector<32x192xf32>
    %c0_15 = arith.constant 0 : index
    %c0_16 = arith.constant 0 : index
    %c0_17 = arith.constant 0 : index
    %29 = vector.load %arg6[%c0_15, %c0_16, %c0_17] : memref<2x1x192xf32, #tpu.memory_space<vmem>>, vector<1x1x192xf32>
    %30 = vector.shape_cast %29 : vector<1x1x192xf32> to vector<1x192xf32>
    %31 = vector.broadcast %30 : vector<1x192xf32> to vector<32x192xf32>
    %32 = arith.addf %28, %31 : vector<32x192xf32>
    %33 = vector.extract_strided_slice %32 {offsets = [0, 0], sizes = [32, 64], strides = [1, 1]} : vector<32x192xf32> to vector<32x64xf32>
    %34 = vector.extract_strided_slice %32 {offsets = [0, 64], sizes = [32, 64], strides = [1, 1]} : vector<32x192xf32> to vector<32x64xf32>
    %35 = vector.extract_strided_slice %32 {offsets = [0, 128], sizes = [32, 64], strides = [1, 1]} : vector<32x192xf32> to vector<32x64xf32>
    %36 = vector.extract_strided_slice %33 {offsets = [0, 0], sizes = [16, 64], strides = [1, 1]} : vector<32x64xf32> to vector<16x64xf32>
    %37 = vector.extract_strided_slice %34 {offsets = [0, 0], sizes = [16, 64], strides = [1, 1]} : vector<32x64xf32> to vector<16x64xf32>
    %38 = vector.extract_strided_slice %35 {offsets = [0, 0], sizes = [16, 64], strides = [1, 1]} : vector<32x64xf32> to vector<16x64xf32>
    %39 = vector.extract_strided_slice %0 {offsets = [0, 0], sizes = [1, 16], strides = [1, 1]} : vector<2x16xf32> to vector<1x16xf32>
    %40 = vector.extract_strided_slice %36 {offsets = [0, 0], sizes = [16, 16], strides = [1, 1]} : vector<16x64xf32> to vector<16x16xf32>
    %41 = vector.extract_strided_slice %37 {offsets = [0, 0], sizes = [16, 16], strides = [1, 1]} : vector<16x64xf32> to vector<16x16xf32>
    %42 = vector.extract_strided_slice %38 {offsets = [0, 0], sizes = [16, 16], strides = [1, 1]} : vector<16x64xf32> to vector<16x16xf32>
    %cst_18 = arith.constant dense<0.000000e+00> : vector<16x16xf32>
    %43 = tpu.matmul %40, %41, %cst_18 {dimension_numbers = #tpu.dot_dimension_numbers<[1], [1], [0], [0], [0, 0, 1, 0], [], []>} : vector<16x16xf32>, vector<16x16xf32>, vector<16x16xf32> -> vector<16x16xf32>
    %cst_19 = arith.constant 2.500000e-01 : f32
    %44 = vector.broadcast %cst_19 : f32 to vector<16x16xf32>
    %45 = arith.mulf %43, %44 : vector<16x16xf32>
    %46 = vector.broadcast %39 : vector<1x16xf32> to vector<16x16xf32>
    %47 = arith.addf %45, %46 : vector<16x16xf32>
    %cst_20 = arith.constant dense<0xFF800000> : vector<16xf32>
    %48 = vector.multi_reduction <maximumf>, %47, %cst_20 [1] : vector<16x16xf32> to vector<16xf32>
    %49 = vector.shape_cast %48 : vector<16xf32> to vector<16x1xf32>
    %50 = vector.broadcast %49 : vector<16x1xf32> to vector<16x16xf32>
    %51 = arith.subf %47, %50 : vector<16x16xf32>
    %52 = math.exp %51 : vector<16x16xf32>
    %cst_21 = arith.constant dense<0.000000e+00> : vector<16xf32>
    %53 = vector.multi_reduction <add>, %52, %cst_21 [1] : vector<16x16xf32> to vector<16xf32>
    %54 = vector.shape_cast %53 : vector<16xf32> to vector<16x1xf32>
    %55 = tpu.reciprocal %54 {approx = true} : vector<16x1xf32> -> vector<16x1xf32>
    %56 = vector.broadcast %55 : vector<16x1xf32> to vector<16x16xf32>
    %57 = arith.mulf %52, %56 : vector<16x16xf32>
    %cst_22 = arith.constant dense<0.000000e+00> : vector<16x16xf32>
    %58 = tpu.matmul %57, %42, %cst_22 {dimension_numbers = #tpu.dot_dimension_numbers<[1], [0], [0], [1], [0, 0, 1, 1], [], []>} : vector<16x16xf32>, vector<16x16xf32>, vector<16x16xf32> -> vector<16x16xf32>
    %59 = vector.extract_strided_slice %36 {offsets = [0, 16], sizes = [16, 16], strides = [1, 1]} : vector<16x64xf32> to vector<16x16xf32>
    %60 = vector.extract_strided_slice %37 {offsets = [0, 16], sizes = [16, 16], strides = [1, 1]} : vector<16x64xf32> to vector<16x16xf32>
    %61 = vector.extract_strided_slice %38 {offsets = [0, 16], sizes = [16, 16], strides = [1, 1]} : vector<16x64xf32> to vector<16x16xf32>
    %cst_23 = arith.constant dense<0.000000e+00> : vector<16x16xf32>
    %62 = tpu.matmul %59, %60, %cst_23 {dimension_numbers = #tpu.dot_dimension_numbers<[1], [1], [0], [0], [0, 0, 1, 0], [], []>} : vector<16x16xf32>, vector<16x16xf32>, vector<16x16xf32> -> vector<16x16xf32>
    %cst_24 = arith.constant 2.500000e-01 : f32
    %63 = vector.broadcast %cst_24 : f32 to vector<16x16xf32>
    %64 = arith.mulf %62, %63 : vector<16x16xf32>
    %65 = vector.broadcast %39 : vector<1x16xf32> to vector<16x16xf32>
    %66 = arith.addf %64, %65 : vector<16x16xf32>
    %cst_25 = arith.constant dense<0xFF800000> : vector<16xf32>
    %67 = vector.multi_reduction <maximumf>, %66, %cst_25 [1] : vector<16x16xf32> to vector<16xf32>
    %68 = vector.shape_cast %67 : vector<16xf32> to vector<16x1xf32>
    %69 = vector.broadcast %68 : vector<16x1xf32> to vector<16x16xf32>
    %70 = arith.subf %66, %69 : vector<16x16xf32>
    %71 = math.exp %70 : vector<16x16xf32>
    %cst_26 = arith.constant dense<0.000000e+00> : vector<16xf32>
    %72 = vector.multi_reduction <add>, %71, %cst_26 [1] : vector<16x16xf32> to vector<16xf32>
    %73 = vector.shape_cast %72 : vector<16xf32> to vector<16x1xf32>
    %74 = tpu.reciprocal %73 {approx = true} : vector<16x1xf32> -> vector<16x1xf32>
    %75 = vector.broadcast %74 : vector<16x1xf32> to vector<16x16xf32>
    %76 = arith.mulf %71, %75 : vector<16x16xf32>
    %cst_27 = arith.constant dense<0.000000e+00> : vector<16x16xf32>
    %77 = tpu.matmul %76, %61, %cst_27 {dimension_numbers = #tpu.dot_dimension_numbers<[1], [0], [0], [1], [0, 0, 1, 1], [], []>} : vector<16x16xf32>, vector<16x16xf32>, vector<16x16xf32> -> vector<16x16xf32>
    %78 = vector.extract_strided_slice %36 {offsets = [0, 32], sizes = [16, 16], strides = [1, 1]} : vector<16x64xf32> to vector<16x16xf32>
    %79 = vector.extract_strided_slice %37 {offsets = [0, 32], sizes = [16, 16], strides = [1, 1]} : vector<16x64xf32> to vector<16x16xf32>
    %80 = vector.extract_strided_slice %38 {offsets = [0, 32], sizes = [16, 16], strides = [1, 1]} : vector<16x64xf32> to vector<16x16xf32>
    %cst_28 = arith.constant dense<0.000000e+00> : vector<16x16xf32>
    %81 = tpu.matmul %78, %79, %cst_28 {dimension_numbers = #tpu.dot_dimension_numbers<[1], [1], [0], [0], [0, 0, 1, 0], [], []>} : vector<16x16xf32>, vector<16x16xf32>, vector<16x16xf32> -> vector<16x16xf32>
    %cst_29 = arith.constant 2.500000e-01 : f32
    %82 = vector.broadcast %cst_29 : f32 to vector<16x16xf32>
    %83 = arith.mulf %81, %82 : vector<16x16xf32>
    %84 = vector.broadcast %39 : vector<1x16xf32> to vector<16x16xf32>
    %85 = arith.addf %83, %84 : vector<16x16xf32>
    %cst_30 = arith.constant dense<0xFF800000> : vector<16xf32>
    %86 = vector.multi_reduction <maximumf>, %85, %cst_30 [1] : vector<16x16xf32> to vector<16xf32>
    %87 = vector.shape_cast %86 : vector<16xf32> to vector<16x1xf32>
    %88 = vector.broadcast %87 : vector<16x1xf32> to vector<16x16xf32>
    %89 = arith.subf %85, %88 : vector<16x16xf32>
    %90 = math.exp %89 : vector<16x16xf32>
    %cst_31 = arith.constant dense<0.000000e+00> : vector<16xf32>
    %91 = vector.multi_reduction <add>, %90, %cst_31 [1] : vector<16x16xf32> to vector<16xf32>
    %92 = vector.shape_cast %91 : vector<16xf32> to vector<16x1xf32>
    %93 = tpu.reciprocal %92 {approx = true} : vector<16x1xf32> -> vector<16x1xf32>
    %94 = vector.broadcast %93 : vector<16x1xf32> to vector<16x16xf32>
    %95 = arith.mulf %90, %94 : vector<16x16xf32>
    %cst_32 = arith.constant dense<0.000000e+00> : vector<16x16xf32>
    %96 = tpu.matmul %95, %80, %cst_32 {dimension_numbers = #tpu.dot_dimension_numbers<[1], [0], [0], [1], [0, 0, 1, 1], [], []>} : vector<16x16xf32>, vector<16x16xf32>, vector<16x16xf32> -> vector<16x16xf32>
    %97 = vector.extract_strided_slice %36 {offsets = [0, 48], sizes = [16, 16], strides = [1, 1]} : vector<16x64xf32> to vector<16x16xf32>
    %98 = vector.extract_strided_slice %37 {offsets = [0, 48], sizes = [16, 16], strides = [1, 1]} : vector<16x64xf32> to vector<16x16xf32>
    %99 = vector.extract_strided_slice %38 {offsets = [0, 48], sizes = [16, 16], strides = [1, 1]} : vector<16x64xf32> to vector<16x16xf32>
    %cst_33 = arith.constant dense<0.000000e+00> : vector<16x16xf32>
    %100 = tpu.matmul %97, %98, %cst_33 {dimension_numbers = #tpu.dot_dimension_numbers<[1], [1], [0], [0], [0, 0, 1, 0], [], []>} : vector<16x16xf32>, vector<16x16xf32>, vector<16x16xf32> -> vector<16x16xf32>
    %cst_34 = arith.constant 2.500000e-01 : f32
    %101 = vector.broadcast %cst_34 : f32 to vector<16x16xf32>
    %102 = arith.mulf %100, %101 : vector<16x16xf32>
    %103 = vector.broadcast %39 : vector<1x16xf32> to vector<16x16xf32>
    %104 = arith.addf %102, %103 : vector<16x16xf32>
    %cst_35 = arith.constant dense<0xFF800000> : vector<16xf32>
    %105 = vector.multi_reduction <maximumf>, %104, %cst_35 [1] : vector<16x16xf32> to vector<16xf32>
    %106 = vector.shape_cast %105 : vector<16xf32> to vector<16x1xf32>
    %107 = vector.broadcast %106 : vector<16x1xf32> to vector<16x16xf32>
    %108 = arith.subf %104, %107 : vector<16x16xf32>
    %109 = math.exp %108 : vector<16x16xf32>
    %cst_36 = arith.constant dense<0.000000e+00> : vector<16xf32>
    %110 = vector.multi_reduction <add>, %109, %cst_36 [1] : vector<16x16xf32> to vector<16xf32>
    %111 = vector.shape_cast %110 : vector<16xf32> to vector<16x1xf32>
    %112 = tpu.reciprocal %111 {approx = true} : vector<16x1xf32> -> vector<16x1xf32>
    %113 = vector.broadcast %112 : vector<16x1xf32> to vector<16x16xf32>
    %114 = arith.mulf %109, %113 : vector<16x16xf32>
    %cst_37 = arith.constant dense<0.000000e+00> : vector<16x16xf32>
    %115 = tpu.matmul %114, %99, %cst_37 {dimension_numbers = #tpu.dot_dimension_numbers<[1], [0], [0], [1], [0, 0, 1, 1], [], []>} : vector<16x16xf32>, vector<16x16xf32>, vector<16x16xf32> -> vector<16x16xf32>
    %116 = tpu.concatenate %58, %77, %96, %115 in 1 : vector<16x16xf32>, vector<16x16xf32>, vector<16x16xf32>, vector<16x16xf32> -> vector<16x64xf32>
    %117 = vector.extract_strided_slice %33 {offsets = [16, 0], sizes = [16, 64], strides = [1, 1]} : vector<32x64xf32> to vector<16x64xf32>
    %118 = vector.extract_strided_slice %34 {offsets = [16, 0], sizes = [16, 64], strides = [1, 1]} : vector<32x64xf32> to vector<16x64xf32>
    %119 = vector.extract_strided_slice %35 {offsets = [16, 0], sizes = [16, 64], strides = [1, 1]} : vector<32x64xf32> to vector<16x64xf32>
    %120 = vector.extract_strided_slice %0 {offsets = [1, 0], sizes = [1, 16], strides = [1, 1]} : vector<2x16xf32> to vector<1x16xf32>
    %121 = vector.extract_strided_slice %117 {offsets = [0, 0], sizes = [16, 16], strides = [1, 1]} : vector<16x64xf32> to vector<16x16xf32>
    %122 = vector.extract_strided_slice %118 {offsets = [0, 0], sizes = [16, 16], strides = [1, 1]} : vector<16x64xf32> to vector<16x16xf32>
    %123 = vector.extract_strided_slice %119 {offsets = [0, 0], sizes = [16, 16], strides = [1, 1]} : vector<16x64xf32> to vector<16x16xf32>
    %cst_38 = arith.constant dense<0.000000e+00> : vector<16x16xf32>
    %124 = tpu.matmul %121, %122, %cst_38 {dimension_numbers = #tpu.dot_dimension_numbers<[1], [1], [0], [0], [0, 0, 1, 0], [], []>} : vector<16x16xf32>, vector<16x16xf32>, vector<16x16xf32> -> vector<16x16xf32>
    %cst_39 = arith.constant 2.500000e-01 : f32
    %125 = vector.broadcast %cst_39 : f32 to vector<16x16xf32>
    %126 = arith.mulf %124, %125 : vector<16x16xf32>
    %127 = vector.broadcast %120 : vector<1x16xf32> to vector<16x16xf32>
    %128 = arith.addf %126, %127 : vector<16x16xf32>
    %cst_40 = arith.constant dense<0xFF800000> : vector<16xf32>
    %129 = vector.multi_reduction <maximumf>, %128, %cst_40 [1] : vector<16x16xf32> to vector<16xf32>
    %130 = vector.shape_cast %129 : vector<16xf32> to vector<16x1xf32>
    %131 = vector.broadcast %130 : vector<16x1xf32> to vector<16x16xf32>
    %132 = arith.subf %128, %131 : vector<16x16xf32>
    %133 = math.exp %132 : vector<16x16xf32>
    %cst_41 = arith.constant dense<0.000000e+00> : vector<16xf32>
    %134 = vector.multi_reduction <add>, %133, %cst_41 [1] : vector<16x16xf32> to vector<16xf32>
    %135 = vector.shape_cast %134 : vector<16xf32> to vector<16x1xf32>
    %136 = tpu.reciprocal %135 {approx = true} : vector<16x1xf32> -> vector<16x1xf32>
    %137 = vector.broadcast %136 : vector<16x1xf32> to vector<16x16xf32>
    %138 = arith.mulf %133, %137 : vector<16x16xf32>
    %cst_42 = arith.constant dense<0.000000e+00> : vector<16x16xf32>
    %139 = tpu.matmul %138, %123, %cst_42 {dimension_numbers = #tpu.dot_dimension_numbers<[1], [0], [0], [1], [0, 0, 1, 1], [], []>} : vector<16x16xf32>, vector<16x16xf32>, vector<16x16xf32> -> vector<16x16xf32>
    %140 = vector.extract_strided_slice %117 {offsets = [0, 16], sizes = [16, 16], strides = [1, 1]} : vector<16x64xf32> to vector<16x16xf32>
    %141 = vector.extract_strided_slice %118 {offsets = [0, 16], sizes = [16, 16], strides = [1, 1]} : vector<16x64xf32> to vector<16x16xf32>
    %142 = vector.extract_strided_slice %119 {offsets = [0, 16], sizes = [16, 16], strides = [1, 1]} : vector<16x64xf32> to vector<16x16xf32>
    %cst_43 = arith.constant dense<0.000000e+00> : vector<16x16xf32>
    %143 = tpu.matmul %140, %141, %cst_43 {dimension_numbers = #tpu.dot_dimension_numbers<[1], [1], [0], [0], [0, 0, 1, 0], [], []>} : vector<16x16xf32>, vector<16x16xf32>, vector<16x16xf32> -> vector<16x16xf32>
    %cst_44 = arith.constant 2.500000e-01 : f32
    %144 = vector.broadcast %cst_44 : f32 to vector<16x16xf32>
    %145 = arith.mulf %143, %144 : vector<16x16xf32>
    %146 = vector.broadcast %120 : vector<1x16xf32> to vector<16x16xf32>
    %147 = arith.addf %145, %146 : vector<16x16xf32>
    %cst_45 = arith.constant dense<0xFF800000> : vector<16xf32>
    %148 = vector.multi_reduction <maximumf>, %147, %cst_45 [1] : vector<16x16xf32> to vector<16xf32>
    %149 = vector.shape_cast %148 : vector<16xf32> to vector<16x1xf32>
    %150 = vector.broadcast %149 : vector<16x1xf32> to vector<16x16xf32>
    %151 = arith.subf %147, %150 : vector<16x16xf32>
    %152 = math.exp %151 : vector<16x16xf32>
    %cst_46 = arith.constant dense<0.000000e+00> : vector<16xf32>
    %153 = vector.multi_reduction <add>, %152, %cst_46 [1] : vector<16x16xf32> to vector<16xf32>
    %154 = vector.shape_cast %153 : vector<16xf32> to vector<16x1xf32>
    %155 = tpu.reciprocal %154 {approx = true} : vector<16x1xf32> -> vector<16x1xf32>
    %156 = vector.broadcast %155 : vector<16x1xf32> to vector<16x16xf32>
    %157 = arith.mulf %152, %156 : vector<16x16xf32>
    %cst_47 = arith.constant dense<0.000000e+00> : vector<16x16xf32>
    %158 = tpu.matmul %157, %142, %cst_47 {dimension_numbers = #tpu.dot_dimension_numbers<[1], [0], [0], [1], [0, 0, 1, 1], [], []>} : vector<16x16xf32>, vector<16x16xf32>, vector<16x16xf32> -> vector<16x16xf32>
    %159 = vector.extract_strided_slice %117 {offsets = [0, 32], sizes = [16, 16], strides = [1, 1]} : vector<16x64xf32> to vector<16x16xf32>
    %160 = vector.extract_strided_slice %118 {offsets = [0, 32], sizes = [16, 16], strides = [1, 1]} : vector<16x64xf32> to vector<16x16xf32>
    %161 = vector.extract_strided_slice %119 {offsets = [0, 32], sizes = [16, 16], strides = [1, 1]} : vector<16x64xf32> to vector<16x16xf32>
    %cst_48 = arith.constant dense<0.000000e+00> : vector<16x16xf32>
    %162 = tpu.matmul %159, %160, %cst_48 {dimension_numbers = #tpu.dot_dimension_numbers<[1], [1], [0], [0], [0, 0, 1, 0], [], []>} : vector<16x16xf32>, vector<16x16xf32>, vector<16x16xf32> -> vector<16x16xf32>
    %cst_49 = arith.constant 2.500000e-01 : f32
    %163 = vector.broadcast %cst_49 : f32 to vector<16x16xf32>
    %164 = arith.mulf %162, %163 : vector<16x16xf32>
    %165 = vector.broadcast %120 : vector<1x16xf32> to vector<16x16xf32>
    %166 = arith.addf %164, %165 : vector<16x16xf32>
    %cst_50 = arith.constant dense<0xFF800000> : vector<16xf32>
    %167 = vector.multi_reduction <maximumf>, %166, %cst_50 [1] : vector<16x16xf32> to vector<16xf32>
    %168 = vector.shape_cast %167 : vector<16xf32> to vector<16x1xf32>
    %169 = vector.broadcast %168 : vector<16x1xf32> to vector<16x16xf32>
    %170 = arith.subf %166, %169 : vector<16x16xf32>
    %171 = math.exp %170 : vector<16x16xf32>
    %cst_51 = arith.constant dense<0.000000e+00> : vector<16xf32>
    %172 = vector.multi_reduction <add>, %171, %cst_51 [1] : vector<16x16xf32> to vector<16xf32>
    %173 = vector.shape_cast %172 : vector<16xf32> to vector<16x1xf32>
    %174 = tpu.reciprocal %173 {approx = true} : vector<16x1xf32> -> vector<16x1xf32>
    %175 = vector.broadcast %174 : vector<16x1xf32> to vector<16x16xf32>
    %176 = arith.mulf %171, %175 : vector<16x16xf32>
    %cst_52 = arith.constant dense<0.000000e+00> : vector<16x16xf32>
    %177 = tpu.matmul %176, %161, %cst_52 {dimension_numbers = #tpu.dot_dimension_numbers<[1], [0], [0], [1], [0, 0, 1, 1], [], []>} : vector<16x16xf32>, vector<16x16xf32>, vector<16x16xf32> -> vector<16x16xf32>
    %178 = vector.extract_strided_slice %117 {offsets = [0, 48], sizes = [16, 16], strides = [1, 1]} : vector<16x64xf32> to vector<16x16xf32>
    %179 = vector.extract_strided_slice %118 {offsets = [0, 48], sizes = [16, 16], strides = [1, 1]} : vector<16x64xf32> to vector<16x16xf32>
    %180 = vector.extract_strided_slice %119 {offsets = [0, 48], sizes = [16, 16], strides = [1, 1]} : vector<16x64xf32> to vector<16x16xf32>
    %cst_53 = arith.constant dense<0.000000e+00> : vector<16x16xf32>
    %181 = tpu.matmul %178, %179, %cst_53 {dimension_numbers = #tpu.dot_dimension_numbers<[1], [1], [0], [0], [0, 0, 1, 0], [], []>} : vector<16x16xf32>, vector<16x16xf32>, vector<16x16xf32> -> vector<16x16xf32>
    %cst_54 = arith.constant 2.500000e-01 : f32
    %182 = vector.broadcast %cst_54 : f32 to vector<16x16xf32>
    %183 = arith.mulf %181, %182 : vector<16x16xf32>
    %184 = vector.broadcast %120 : vector<1x16xf32> to vector<16x16xf32>
    %185 = arith.addf %183, %184 : vector<16x16xf32>
    %cst_55 = arith.constant dense<0xFF800000> : vector<16xf32>
    %186 = vector.multi_reduction <maximumf>, %185, %cst_55 [1] : vector<16x16xf32> to vector<16xf32>
    %187 = vector.shape_cast %186 : vector<16xf32> to vector<16x1xf32>
    %188 = vector.broadcast %187 : vector<16x1xf32> to vector<16x16xf32>
    %189 = arith.subf %185, %188 : vector<16x16xf32>
    %190 = math.exp %189 : vector<16x16xf32>
    %cst_56 = arith.constant dense<0.000000e+00> : vector<16xf32>
    %191 = vector.multi_reduction <add>, %190, %cst_56 [1] : vector<16x16xf32> to vector<16xf32>
    %192 = vector.shape_cast %191 : vector<16xf32> to vector<16x1xf32>
    %193 = tpu.reciprocal %192 {approx = true} : vector<16x1xf32> -> vector<16x1xf32>
    %194 = vector.broadcast %193 : vector<16x1xf32> to vector<16x16xf32>
    %195 = arith.mulf %190, %194 : vector<16x16xf32>
    %cst_57 = arith.constant dense<0.000000e+00> : vector<16x16xf32>
    %196 = tpu.matmul %195, %180, %cst_57 {dimension_numbers = #tpu.dot_dimension_numbers<[1], [0], [0], [1], [0, 0, 1, 1], [], []>} : vector<16x16xf32>, vector<16x16xf32>, vector<16x16xf32> -> vector<16x16xf32>
    %197 = tpu.concatenate %139, %158, %177, %196 in 1 : vector<16x16xf32>, vector<16x16xf32>, vector<16x16xf32>, vector<16x16xf32> -> vector<16x64xf32>
    %198 = tpu.concatenate %116, %197 in 0 : vector<16x64xf32>, vector<16x64xf32> -> vector<32x64xf32>
    %c0_58 = arith.constant 0 : index
    %c0_59 = arith.constant 0 : index
    %c0_60 = arith.constant 0 : index
    %199 = vector.load %arg7[%c0_58, %c0_59, %c0_60] : memref<2x64x64xf32, #tpu.memory_space<vmem>>, vector<1x64x64xf32>
    %200 = vector.shape_cast %199 : vector<1x64x64xf32> to vector<64x64xf32>
    %cst_61 = arith.constant dense<0.000000e+00> : vector<32x64xf32>
    %201 = tpu.matmul %198, %200, %cst_61 {dimension_numbers = #tpu.dot_dimension_numbers<[1], [0], [0], [1], [0, 0, 1, 1], [], []>} : vector<32x64xf32>, vector<64x64xf32>, vector<32x64xf32> -> vector<32x64xf32>
    %c0_62 = arith.constant 0 : index
    %c0_63 = arith.constant 0 : index
    %c0_64 = arith.constant 0 : index
    %202 = vector.load %arg8[%c0_62, %c0_63, %c0_64] : memref<2x1x64xf32, #tpu.memory_space<vmem>>, vector<1x1x64xf32>
    %203 = vector.shape_cast %202 : vector<1x1x64xf32> to vector<1x64xf32>
    %204 = vector.broadcast %203 : vector<1x64xf32> to vector<32x64xf32>
    %205 = arith.addf %201, %204 : vector<32x64xf32>
    %206 = arith.addf %205, %25 : vector<32x64xf32>
    %c0_65 = arith.constant 0 : index
    %c0_66 = arith.constant 0 : index
    %c0_67 = arith.constant 0 : index
    %207 = vector.load %arg9[%c0_65, %c0_66, %c0_67] : memref<2x1x64xf32, #tpu.memory_space<vmem>>, vector<1x1x64xf32>
    %208 = vector.shape_cast %207 : vector<1x1x64xf32> to vector<1x64xf32>
    %c0_68 = arith.constant 0 : index
    %c0_69 = arith.constant 0 : index
    %c0_70 = arith.constant 0 : index
    %209 = vector.load %arg10[%c0_68, %c0_69, %c0_70] : memref<2x1x64xf32, #tpu.memory_space<vmem>>, vector<1x1x64xf32>
    %210 = vector.shape_cast %209 : vector<1x1x64xf32> to vector<1x64xf32>
    %cst_71 = arith.constant dense<0.000000e+00> : vector<32xf32>
    %211 = vector.multi_reduction <add>, %206, %cst_71 [1] : vector<32x64xf32> to vector<32xf32>
    %212 = vector.shape_cast %211 : vector<32xf32> to vector<32x1xf32>
    %cst_72 = arith.constant 6.400000e+01 : f32
    %213 = vector.broadcast %cst_72 : f32 to vector<32x1xf32>
    %214 = arith.divf %212, %213 : vector<32x1xf32>
    %215 = vector.broadcast %214 : vector<32x1xf32> to vector<32x64xf32>
    %216 = arith.subf %206, %215 : vector<32x64xf32>
    %217 = arith.mulf %216, %216 : vector<32x64xf32>
    %cst_73 = arith.constant dense<0.000000e+00> : vector<32xf32>
    %218 = vector.multi_reduction <add>, %217, %cst_73 [1] : vector<32x64xf32> to vector<32xf32>
    %219 = vector.shape_cast %218 : vector<32xf32> to vector<32x1xf32>
    %cst_74 = arith.constant 6.400000e+01 : f32
    %220 = vector.broadcast %cst_74 : f32 to vector<32x1xf32>
    %221 = arith.divf %219, %220 : vector<32x1xf32>
    %222 = vector.broadcast %214 : vector<32x1xf32> to vector<32x64xf32>
    %223 = arith.subf %206, %222 : vector<32x64xf32>
    %cst_75 = arith.constant 9.99999974E-6 : f32
    %224 = vector.broadcast %cst_75 : f32 to vector<32x1xf32>
    %225 = arith.addf %221, %224 : vector<32x1xf32>
    %226 = math.rsqrt %225 : vector<32x1xf32>
    %227 = vector.broadcast %226 : vector<32x1xf32> to vector<32x64xf32>
    %228 = arith.mulf %223, %227 : vector<32x64xf32>
    %229 = vector.broadcast %208 : vector<1x64xf32> to vector<32x64xf32>
    %230 = arith.mulf %228, %229 : vector<32x64xf32>
    %231 = vector.broadcast %210 : vector<1x64xf32> to vector<32x64xf32>
    %232 = arith.addf %230, %231 : vector<32x64xf32>
    %c0_76 = arith.constant 0 : index
    %c0_77 = arith.constant 0 : index
    %c0_78 = arith.constant 0 : index
    %233 = vector.load %arg11[%c0_76, %c0_77, %c0_78] : memref<2x64x128xf32, #tpu.memory_space<vmem>>, vector<1x64x128xf32>
    %234 = vector.shape_cast %233 : vector<1x64x128xf32> to vector<64x128xf32>
    %cst_79 = arith.constant dense<0.000000e+00> : vector<32x128xf32>
    %235 = tpu.matmul %232, %234, %cst_79 {dimension_numbers = #tpu.dot_dimension_numbers<[1], [0], [0], [1], [0, 0, 1, 1], [], []>} : vector<32x64xf32>, vector<64x128xf32>, vector<32x128xf32> -> vector<32x128xf32>
    %c0_80 = arith.constant 0 : index
    %c0_81 = arith.constant 0 : index
    %c0_82 = arith.constant 0 : index
    %236 = vector.load %arg12[%c0_80, %c0_81, %c0_82] : memref<2x1x128xf32, #tpu.memory_space<vmem>>, vector<1x1x128xf32>
    %237 = vector.shape_cast %236 : vector<1x1x128xf32> to vector<1x128xf32>
    %238 = vector.broadcast %237 : vector<1x128xf32> to vector<32x128xf32>
    %239 = arith.addf %235, %238 : vector<32x128xf32>
    %cst_83 = arith.constant 5.000000e-01 : f32
    %240 = vector.broadcast %cst_83 : f32 to vector<32x128xf32>
    %241 = arith.mulf %240, %239 : vector<32x128xf32>
    %cst_84 = arith.constant 0.707106769 : f32
    %242 = vector.broadcast %cst_84 : f32 to vector<32x128xf32>
    %243 = arith.mulf %239, %242 : vector<32x128xf32>
    %244 = math.erf %243 : vector<32x128xf32>
    %cst_85 = arith.constant 1.000000e+00 : f32
    %245 = vector.broadcast %cst_85 : f32 to vector<32x128xf32>
    %246 = arith.addf %245, %244 : vector<32x128xf32>
    %247 = arith.mulf %241, %246 : vector<32x128xf32>
    %c0_86 = arith.constant 0 : index
    %c0_87 = arith.constant 0 : index
    %c0_88 = arith.constant 0 : index
    %248 = vector.load %arg13[%c0_86, %c0_87, %c0_88] : memref<2x128x64xf32, #tpu.memory_space<vmem>>, vector<1x128x64xf32>
    %249 = vector.shape_cast %248 : vector<1x128x64xf32> to vector<128x64xf32>
    %cst_89 = arith.constant dense<0.000000e+00> : vector<32x64xf32>
    %250 = tpu.matmul %247, %249, %cst_89 {dimension_numbers = #tpu.dot_dimension_numbers<[1], [0], [0], [1], [0, 0, 1, 1], [], []>} : vector<32x128xf32>, vector<128x64xf32>, vector<32x64xf32> -> vector<32x64xf32>
    %c0_90 = arith.constant 0 : index
    %c0_91 = arith.constant 0 : index
    %c0_92 = arith.constant 0 : index
    %251 = vector.load %arg14[%c0_90, %c0_91, %c0_92] : memref<2x1x64xf32, #tpu.memory_space<vmem>>, vector<1x1x64xf32>
    %252 = vector.shape_cast %251 : vector<1x1x64xf32> to vector<1x64xf32>
    %253 = vector.broadcast %252 : vector<1x64xf32> to vector<32x64xf32>
    %254 = arith.addf %250, %253 : vector<32x64xf32>
    %255 = arith.addf %254, %232 : vector<32x64xf32>
    %c0_93 = arith.constant 0 : index
    %c0_94 = arith.constant 0 : index
    %c0_95 = arith.constant 0 : index
    %256 = vector.load %arg15[%c0_93, %c0_94, %c0_95] : memref<2x1x64xf32, #tpu.memory_space<vmem>>, vector<1x1x64xf32>
    %257 = vector.shape_cast %256 : vector<1x1x64xf32> to vector<1x64xf32>
    %c0_96 = arith.constant 0 : index
    %c0_97 = arith.constant 0 : index
    %c0_98 = arith.constant 0 : index
    %258 = vector.load %arg16[%c0_96, %c0_97, %c0_98] : memref<2x1x64xf32, #tpu.memory_space<vmem>>, vector<1x1x64xf32>
    %259 = vector.shape_cast %258 : vector<1x1x64xf32> to vector<1x64xf32>
    %cst_99 = arith.constant dense<0.000000e+00> : vector<32xf32>
    %260 = vector.multi_reduction <add>, %255, %cst_99 [1] : vector<32x64xf32> to vector<32xf32>
    %261 = vector.shape_cast %260 : vector<32xf32> to vector<32x1xf32>
    %cst_100 = arith.constant 6.400000e+01 : f32
    %262 = vector.broadcast %cst_100 : f32 to vector<32x1xf32>
    %263 = arith.divf %261, %262 : vector<32x1xf32>
    %264 = vector.broadcast %263 : vector<32x1xf32> to vector<32x64xf32>
    %265 = arith.subf %255, %264 : vector<32x64xf32>
    %266 = arith.mulf %265, %265 : vector<32x64xf32>
    %cst_101 = arith.constant dense<0.000000e+00> : vector<32xf32>
    %267 = vector.multi_reduction <add>, %266, %cst_101 [1] : vector<32x64xf32> to vector<32xf32>
    %268 = vector.shape_cast %267 : vector<32xf32> to vector<32x1xf32>
    %cst_102 = arith.constant 6.400000e+01 : f32
    %269 = vector.broadcast %cst_102 : f32 to vector<32x1xf32>
    %270 = arith.divf %268, %269 : vector<32x1xf32>
    %271 = vector.broadcast %263 : vector<32x1xf32> to vector<32x64xf32>
    %272 = arith.subf %255, %271 : vector<32x64xf32>
    %cst_103 = arith.constant 9.99999974E-6 : f32
    %273 = vector.broadcast %cst_103 : f32 to vector<32x1xf32>
    %274 = arith.addf %270, %273 : vector<32x1xf32>
    %275 = math.rsqrt %274 : vector<32x1xf32>
    %276 = vector.broadcast %275 : vector<32x1xf32> to vector<32x64xf32>
    %277 = arith.mulf %272, %276 : vector<32x64xf32>
    %278 = vector.broadcast %257 : vector<1x64xf32> to vector<32x64xf32>
    %279 = arith.mulf %277, %278 : vector<32x64xf32>
    %280 = vector.broadcast %259 : vector<1x64xf32> to vector<32x64xf32>
    %281 = arith.addf %279, %280 : vector<32x64xf32>
    %c1 = arith.constant 1 : index
    %c0_104 = arith.constant 0 : index
    %c0_105 = arith.constant 0 : index
    %282 = vector.load %arg5[%c1, %c0_104, %c0_105] : memref<2x64x192xf32, #tpu.memory_space<vmem>>, vector<1x64x192xf32>
    %283 = vector.shape_cast %282 : vector<1x64x192xf32> to vector<64x192xf32>
    %cst_106 = arith.constant dense<0.000000e+00> : vector<32x192xf32>
    %284 = tpu.matmul %281, %283, %cst_106 {dimension_numbers = #tpu.dot_dimension_numbers<[1], [0], [0], [1], [0, 0, 1, 1], [], []>} : vector<32x64xf32>, vector<64x192xf32>, vector<32x192xf32> -> vector<32x192xf32>
    %c1_107 = arith.constant 1 : index
    %c0_108 = arith.constant 0 : index
    %c0_109 = arith.constant 0 : index
    %285 = vector.load %arg6[%c1_107, %c0_108, %c0_109] : memref<2x1x192xf32, #tpu.memory_space<vmem>>, vector<1x1x192xf32>
    %286 = vector.shape_cast %285 : vector<1x1x192xf32> to vector<1x192xf32>
    %287 = vector.broadcast %286 : vector<1x192xf32> to vector<32x192xf32>
    %288 = arith.addf %284, %287 : vector<32x192xf32>
    %289 = vector.extract_strided_slice %288 {offsets = [0, 0], sizes = [32, 64], strides = [1, 1]} : vector<32x192xf32> to vector<32x64xf32>
    %290 = vector.extract_strided_slice %288 {offsets = [0, 64], sizes = [32, 64], strides = [1, 1]} : vector<32x192xf32> to vector<32x64xf32>
    %291 = vector.extract_strided_slice %288 {offsets = [0, 128], sizes = [32, 64], strides = [1, 1]} : vector<32x192xf32> to vector<32x64xf32>
    %292 = vector.extract_strided_slice %289 {offsets = [0, 0], sizes = [16, 64], strides = [1, 1]} : vector<32x64xf32> to vector<16x64xf32>
    %293 = vector.extract_strided_slice %290 {offsets = [0, 0], sizes = [16, 64], strides = [1, 1]} : vector<32x64xf32> to vector<16x64xf32>
    %294 = vector.extract_strided_slice %291 {offsets = [0, 0], sizes = [16, 64], strides = [1, 1]} : vector<32x64xf32> to vector<16x64xf32>
    %295 = vector.extract_strided_slice %0 {offsets = [0, 0], sizes = [1, 16], strides = [1, 1]} : vector<2x16xf32> to vector<1x16xf32>
    %296 = vector.extract_strided_slice %292 {offsets = [0, 0], sizes = [16, 16], strides = [1, 1]} : vector<16x64xf32> to vector<16x16xf32>
    %297 = vector.extract_strided_slice %293 {offsets = [0, 0], sizes = [16, 16], strides = [1, 1]} : vector<16x64xf32> to vector<16x16xf32>
    %298 = vector.extract_strided_slice %294 {offsets = [0, 0], sizes = [16, 16], strides = [1, 1]} : vector<16x64xf32> to vector<16x16xf32>
    %cst_110 = arith.constant dense<0.000000e+00> : vector<16x16xf32>
    %299 = tpu.matmul %296, %297, %cst_110 {dimension_numbers = #tpu.dot_dimension_numbers<[1], [1], [0], [0], [0, 0, 1, 0], [], []>} : vector<16x16xf32>, vector<16x16xf32>, vector<16x16xf32> -> vector<16x16xf32>
    %cst_111 = arith.constant 2.500000e-01 : f32
    %300 = vector.broadcast %cst_111 : f32 to vector<16x16xf32>
    %301 = arith.mulf %299, %300 : vector<16x16xf32>
    %302 = vector.broadcast %295 : vector<1x16xf32> to vector<16x16xf32>
    %303 = arith.addf %301, %302 : vector<16x16xf32>
    %cst_112 = arith.constant dense<0xFF800000> : vector<16xf32>
    %304 = vector.multi_reduction <maximumf>, %303, %cst_112 [1] : vector<16x16xf32> to vector<16xf32>
    %305 = vector.shape_cast %304 : vector<16xf32> to vector<16x1xf32>
    %306 = vector.broadcast %305 : vector<16x1xf32> to vector<16x16xf32>
    %307 = arith.subf %303, %306 : vector<16x16xf32>
    %308 = math.exp %307 : vector<16x16xf32>
    %cst_113 = arith.constant dense<0.000000e+00> : vector<16xf32>
    %309 = vector.multi_reduction <add>, %308, %cst_113 [1] : vector<16x16xf32> to vector<16xf32>
    %310 = vector.shape_cast %309 : vector<16xf32> to vector<16x1xf32>
    %311 = tpu.reciprocal %310 {approx = true} : vector<16x1xf32> -> vector<16x1xf32>
    %312 = vector.broadcast %311 : vector<16x1xf32> to vector<16x16xf32>
    %313 = arith.mulf %308, %312 : vector<16x16xf32>
    %cst_114 = arith.constant dense<0.000000e+00> : vector<16x16xf32>
    %314 = tpu.matmul %313, %298, %cst_114 {dimension_numbers = #tpu.dot_dimension_numbers<[1], [0], [0], [1], [0, 0, 1, 1], [], []>} : vector<16x16xf32>, vector<16x16xf32>, vector<16x16xf32> -> vector<16x16xf32>
    %315 = vector.extract_strided_slice %292 {offsets = [0, 16], sizes = [16, 16], strides = [1, 1]} : vector<16x64xf32> to vector<16x16xf32>
    %316 = vector.extract_strided_slice %293 {offsets = [0, 16], sizes = [16, 16], strides = [1, 1]} : vector<16x64xf32> to vector<16x16xf32>
    %317 = vector.extract_strided_slice %294 {offsets = [0, 16], sizes = [16, 16], strides = [1, 1]} : vector<16x64xf32> to vector<16x16xf32>
    %cst_115 = arith.constant dense<0.000000e+00> : vector<16x16xf32>
    %318 = tpu.matmul %315, %316, %cst_115 {dimension_numbers = #tpu.dot_dimension_numbers<[1], [1], [0], [0], [0, 0, 1, 0], [], []>} : vector<16x16xf32>, vector<16x16xf32>, vector<16x16xf32> -> vector<16x16xf32>
    %cst_116 = arith.constant 2.500000e-01 : f32
    %319 = vector.broadcast %cst_116 : f32 to vector<16x16xf32>
    %320 = arith.mulf %318, %319 : vector<16x16xf32>
    %321 = vector.broadcast %295 : vector<1x16xf32> to vector<16x16xf32>
    %322 = arith.addf %320, %321 : vector<16x16xf32>
    %cst_117 = arith.constant dense<0xFF800000> : vector<16xf32>
    %323 = vector.multi_reduction <maximumf>, %322, %cst_117 [1] : vector<16x16xf32> to vector<16xf32>
    %324 = vector.shape_cast %323 : vector<16xf32> to vector<16x1xf32>
    %325 = vector.broadcast %324 : vector<16x1xf32> to vector<16x16xf32>
    %326 = arith.subf %322, %325 : vector<16x16xf32>
    %327 = math.exp %326 : vector<16x16xf32>
    %cst_118 = arith.constant dense<0.000000e+00> : vector<16xf32>
    %328 = vector.multi_reduction <add>, %327, %cst_118 [1] : vector<16x16xf32> to vector<16xf32>
    %329 = vector.shape_cast %328 : vector<16xf32> to vector<16x1xf32>
    %330 = tpu.reciprocal %329 {approx = true} : vector<16x1xf32> -> vector<16x1xf32>
    %331 = vector.broadcast %330 : vector<16x1xf32> to vector<16x16xf32>
    %332 = arith.mulf %327, %331 : vector<16x16xf32>
    %cst_119 = arith.constant dense<0.000000e+00> : vector<16x16xf32>
    %333 = tpu.matmul %332, %317, %cst_119 {dimension_numbers = #tpu.dot_dimension_numbers<[1], [0], [0], [1], [0, 0, 1, 1], [], []>} : vector<16x16xf32>, vector<16x16xf32>, vector<16x16xf32> -> vector<16x16xf32>
    %334 = vector.extract_strided_slice %292 {offsets = [0, 32], sizes = [16, 16], strides = [1, 1]} : vector<16x64xf32> to vector<16x16xf32>
    %335 = vector.extract_strided_slice %293 {offsets = [0, 32], sizes = [16, 16], strides = [1, 1]} : vector<16x64xf32> to vector<16x16xf32>
    %336 = vector.extract_strided_slice %294 {offsets = [0, 32], sizes = [16, 16], strides = [1, 1]} : vector<16x64xf32> to vector<16x16xf32>
    %cst_120 = arith.constant dense<0.000000e+00> : vector<16x16xf32>
    %337 = tpu.matmul %334, %335, %cst_120 {dimension_numbers = #tpu.dot_dimension_numbers<[1], [1], [0], [0], [0, 0, 1, 0], [], []>} : vector<16x16xf32>, vector<16x16xf32>, vector<16x16xf32> -> vector<16x16xf32>
    %cst_121 = arith.constant 2.500000e-01 : f32
    %338 = vector.broadcast %cst_121 : f32 to vector<16x16xf32>
    %339 = arith.mulf %337, %338 : vector<16x16xf32>
    %340 = vector.broadcast %295 : vector<1x16xf32> to vector<16x16xf32>
    %341 = arith.addf %339, %340 : vector<16x16xf32>
    %cst_122 = arith.constant dense<0xFF800000> : vector<16xf32>
    %342 = vector.multi_reduction <maximumf>, %341, %cst_122 [1] : vector<16x16xf32> to vector<16xf32>
    %343 = vector.shape_cast %342 : vector<16xf32> to vector<16x1xf32>
    %344 = vector.broadcast %343 : vector<16x1xf32> to vector<16x16xf32>
    %345 = arith.subf %341, %344 : vector<16x16xf32>
    %346 = math.exp %345 : vector<16x16xf32>
    %cst_123 = arith.constant dense<0.000000e+00> : vector<16xf32>
    %347 = vector.multi_reduction <add>, %346, %cst_123 [1] : vector<16x16xf32> to vector<16xf32>
    %348 = vector.shape_cast %347 : vector<16xf32> to vector<16x1xf32>
    %349 = tpu.reciprocal %348 {approx = true} : vector<16x1xf32> -> vector<16x1xf32>
    %350 = vector.broadcast %349 : vector<16x1xf32> to vector<16x16xf32>
    %351 = arith.mulf %346, %350 : vector<16x16xf32>
    %cst_124 = arith.constant dense<0.000000e+00> : vector<16x16xf32>
    %352 = tpu.matmul %351, %336, %cst_124 {dimension_numbers = #tpu.dot_dimension_numbers<[1], [0], [0], [1], [0, 0, 1, 1], [], []>} : vector<16x16xf32>, vector<16x16xf32>, vector<16x16xf32> -> vector<16x16xf32>
    %353 = vector.extract_strided_slice %292 {offsets = [0, 48], sizes = [16, 16], strides = [1, 1]} : vector<16x64xf32> to vector<16x16xf32>
    %354 = vector.extract_strided_slice %293 {offsets = [0, 48], sizes = [16, 16], strides = [1, 1]} : vector<16x64xf32> to vector<16x16xf32>
    %355 = vector.extract_strided_slice %294 {offsets = [0, 48], sizes = [16, 16], strides = [1, 1]} : vector<16x64xf32> to vector<16x16xf32>
    %cst_125 = arith.constant dense<0.000000e+00> : vector<16x16xf32>
    %356 = tpu.matmul %353, %354, %cst_125 {dimension_numbers = #tpu.dot_dimension_numbers<[1], [1], [0], [0], [0, 0, 1, 0], [], []>} : vector<16x16xf32>, vector<16x16xf32>, vector<16x16xf32> -> vector<16x16xf32>
    %cst_126 = arith.constant 2.500000e-01 : f32
    %357 = vector.broadcast %cst_126 : f32 to vector<16x16xf32>
    %358 = arith.mulf %356, %357 : vector<16x16xf32>
    %359 = vector.broadcast %295 : vector<1x16xf32> to vector<16x16xf32>
    %360 = arith.addf %358, %359 : vector<16x16xf32>
    %cst_127 = arith.constant dense<0xFF800000> : vector<16xf32>
    %361 = vector.multi_reduction <maximumf>, %360, %cst_127 [1] : vector<16x16xf32> to vector<16xf32>
    %362 = vector.shape_cast %361 : vector<16xf32> to vector<16x1xf32>
    %363 = vector.broadcast %362 : vector<16x1xf32> to vector<16x16xf32>
    %364 = arith.subf %360, %363 : vector<16x16xf32>
    %365 = math.exp %364 : vector<16x16xf32>
    %cst_128 = arith.constant dense<0.000000e+00> : vector<16xf32>
    %366 = vector.multi_reduction <add>, %365, %cst_128 [1] : vector<16x16xf32> to vector<16xf32>
    %367 = vector.shape_cast %366 : vector<16xf32> to vector<16x1xf32>
    %368 = tpu.reciprocal %367 {approx = true} : vector<16x1xf32> -> vector<16x1xf32>
    %369 = vector.broadcast %368 : vector<16x1xf32> to vector<16x16xf32>
    %370 = arith.mulf %365, %369 : vector<16x16xf32>
    %cst_129 = arith.constant dense<0.000000e+00> : vector<16x16xf32>
    %371 = tpu.matmul %370, %355, %cst_129 {dimension_numbers = #tpu.dot_dimension_numbers<[1], [0], [0], [1], [0, 0, 1, 1], [], []>} : vector<16x16xf32>, vector<16x16xf32>, vector<16x16xf32> -> vector<16x16xf32>
    %372 = tpu.concatenate %314, %333, %352, %371 in 1 : vector<16x16xf32>, vector<16x16xf32>, vector<16x16xf32>, vector<16x16xf32> -> vector<16x64xf32>
    %373 = vector.extract_strided_slice %289 {offsets = [16, 0], sizes = [16, 64], strides = [1, 1]} : vector<32x64xf32> to vector<16x64xf32>
    %374 = vector.extract_strided_slice %290 {offsets = [16, 0], sizes = [16, 64], strides = [1, 1]} : vector<32x64xf32> to vector<16x64xf32>
    %375 = vector.extract_strided_slice %291 {offsets = [16, 0], sizes = [16, 64], strides = [1, 1]} : vector<32x64xf32> to vector<16x64xf32>
    %376 = vector.extract_strided_slice %0 {offsets = [1, 0], sizes = [1, 16], strides = [1, 1]} : vector<2x16xf32> to vector<1x16xf32>
    %377 = vector.extract_strided_slice %373 {offsets = [0, 0], sizes = [16, 16], strides = [1, 1]} : vector<16x64xf32> to vector<16x16xf32>
    %378 = vector.extract_strided_slice %374 {offsets = [0, 0], sizes = [16, 16], strides = [1, 1]} : vector<16x64xf32> to vector<16x16xf32>
    %379 = vector.extract_strided_slice %375 {offsets = [0, 0], sizes = [16, 16], strides = [1, 1]} : vector<16x64xf32> to vector<16x16xf32>
    %cst_130 = arith.constant dense<0.000000e+00> : vector<16x16xf32>
    %380 = tpu.matmul %377, %378, %cst_130 {dimension_numbers = #tpu.dot_dimension_numbers<[1], [1], [0], [0], [0, 0, 1, 0], [], []>} : vector<16x16xf32>, vector<16x16xf32>, vector<16x16xf32> -> vector<16x16xf32>
    %cst_131 = arith.constant 2.500000e-01 : f32
    %381 = vector.broadcast %cst_131 : f32 to vector<16x16xf32>
    %382 = arith.mulf %380, %381 : vector<16x16xf32>
    %383 = vector.broadcast %376 : vector<1x16xf32> to vector<16x16xf32>
    %384 = arith.addf %382, %383 : vector<16x16xf32>
    %cst_132 = arith.constant dense<0xFF800000> : vector<16xf32>
    %385 = vector.multi_reduction <maximumf>, %384, %cst_132 [1] : vector<16x16xf32> to vector<16xf32>
    %386 = vector.shape_cast %385 : vector<16xf32> to vector<16x1xf32>
    %387 = vector.broadcast %386 : vector<16x1xf32> to vector<16x16xf32>
    %388 = arith.subf %384, %387 : vector<16x16xf32>
    %389 = math.exp %388 : vector<16x16xf32>
    %cst_133 = arith.constant dense<0.000000e+00> : vector<16xf32>
    %390 = vector.multi_reduction <add>, %389, %cst_133 [1] : vector<16x16xf32> to vector<16xf32>
    %391 = vector.shape_cast %390 : vector<16xf32> to vector<16x1xf32>
    %392 = tpu.reciprocal %391 {approx = true} : vector<16x1xf32> -> vector<16x1xf32>
    %393 = vector.broadcast %392 : vector<16x1xf32> to vector<16x16xf32>
    %394 = arith.mulf %389, %393 : vector<16x16xf32>
    %cst_134 = arith.constant dense<0.000000e+00> : vector<16x16xf32>
    %395 = tpu.matmul %394, %379, %cst_134 {dimension_numbers = #tpu.dot_dimension_numbers<[1], [0], [0], [1], [0, 0, 1, 1], [], []>} : vector<16x16xf32>, vector<16x16xf32>, vector<16x16xf32> -> vector<16x16xf32>
    %396 = vector.extract_strided_slice %373 {offsets = [0, 16], sizes = [16, 16], strides = [1, 1]} : vector<16x64xf32> to vector<16x16xf32>
    %397 = vector.extract_strided_slice %374 {offsets = [0, 16], sizes = [16, 16], strides = [1, 1]} : vector<16x64xf32> to vector<16x16xf32>
    %398 = vector.extract_strided_slice %375 {offsets = [0, 16], sizes = [16, 16], strides = [1, 1]} : vector<16x64xf32> to vector<16x16xf32>
    %cst_135 = arith.constant dense<0.000000e+00> : vector<16x16xf32>
    %399 = tpu.matmul %396, %397, %cst_135 {dimension_numbers = #tpu.dot_dimension_numbers<[1], [1], [0], [0], [0, 0, 1, 0], [], []>} : vector<16x16xf32>, vector<16x16xf32>, vector<16x16xf32> -> vector<16x16xf32>
    %cst_136 = arith.constant 2.500000e-01 : f32
    %400 = vector.broadcast %cst_136 : f32 to vector<16x16xf32>
    %401 = arith.mulf %399, %400 : vector<16x16xf32>
    %402 = vector.broadcast %376 : vector<1x16xf32> to vector<16x16xf32>
    %403 = arith.addf %401, %402 : vector<16x16xf32>
    %cst_137 = arith.constant dense<0xFF800000> : vector<16xf32>
    %404 = vector.multi_reduction <maximumf>, %403, %cst_137 [1] : vector<16x16xf32> to vector<16xf32>
    %405 = vector.shape_cast %404 : vector<16xf32> to vector<16x1xf32>
    %406 = vector.broadcast %405 : vector<16x1xf32> to vector<16x16xf32>
    %407 = arith.subf %403, %406 : vector<16x16xf32>
    %408 = math.exp %407 : vector<16x16xf32>
    %cst_138 = arith.constant dense<0.000000e+00> : vector<16xf32>
    %409 = vector.multi_reduction <add>, %408, %cst_138 [1] : vector<16x16xf32> to vector<16xf32>
    %410 = vector.shape_cast %409 : vector<16xf32> to vector<16x1xf32>
    %411 = tpu.reciprocal %410 {approx = true} : vector<16x1xf32> -> vector<16x1xf32>
    %412 = vector.broadcast %411 : vector<16x1xf32> to vector<16x16xf32>
    %413 = arith.mulf %408, %412 : vector<16x16xf32>
    %cst_139 = arith.constant dense<0.000000e+00> : vector<16x16xf32>
    %414 = tpu.matmul %413, %398, %cst_139 {dimension_numbers = #tpu.dot_dimension_numbers<[1], [0], [0], [1], [0, 0, 1, 1], [], []>} : vector<16x16xf32>, vector<16x16xf32>, vector<16x16xf32> -> vector<16x16xf32>
    %415 = vector.extract_strided_slice %373 {offsets = [0, 32], sizes = [16, 16], strides = [1, 1]} : vector<16x64xf32> to vector<16x16xf32>
    %416 = vector.extract_strided_slice %374 {offsets = [0, 32], sizes = [16, 16], strides = [1, 1]} : vector<16x64xf32> to vector<16x16xf32>
    %417 = vector.extract_strided_slice %375 {offsets = [0, 32], sizes = [16, 16], strides = [1, 1]} : vector<16x64xf32> to vector<16x16xf32>
    %cst_140 = arith.constant dense<0.000000e+00> : vector<16x16xf32>
    %418 = tpu.matmul %415, %416, %cst_140 {dimension_numbers = #tpu.dot_dimension_numbers<[1], [1], [0], [0], [0, 0, 1, 0], [], []>} : vector<16x16xf32>, vector<16x16xf32>, vector<16x16xf32> -> vector<16x16xf32>
    %cst_141 = arith.constant 2.500000e-01 : f32
    %419 = vector.broadcast %cst_141 : f32 to vector<16x16xf32>
    %420 = arith.mulf %418, %419 : vector<16x16xf32>
    %421 = vector.broadcast %376 : vector<1x16xf32> to vector<16x16xf32>
    %422 = arith.addf %420, %421 : vector<16x16xf32>
    %cst_142 = arith.constant dense<0xFF800000> : vector<16xf32>
    %423 = vector.multi_reduction <maximumf>, %422, %cst_142 [1] : vector<16x16xf32> to vector<16xf32>
    %424 = vector.shape_cast %423 : vector<16xf32> to vector<16x1xf32>
    %425 = vector.broadcast %424 : vector<16x1xf32> to vector<16x16xf32>
    %426 = arith.subf %422, %425 : vector<16x16xf32>
    %427 = math.exp %426 : vector<16x16xf32>
    %cst_143 = arith.constant dense<0.000000e+00> : vector<16xf32>
    %428 = vector.multi_reduction <add>, %427, %cst_143 [1] : vector<16x16xf32> to vector<16xf32>
    %429 = vector.shape_cast %428 : vector<16xf32> to vector<16x1xf32>
    %430 = tpu.reciprocal %429 {approx = true} : vector<16x1xf32> -> vector<16x1xf32>
    %431 = vector.broadcast %430 : vector<16x1xf32> to vector<16x16xf32>
    %432 = arith.mulf %427, %431 : vector<16x16xf32>
    %cst_144 = arith.constant dense<0.000000e+00> : vector<16x16xf32>
    %433 = tpu.matmul %432, %417, %cst_144 {dimension_numbers = #tpu.dot_dimension_numbers<[1], [0], [0], [1], [0, 0, 1, 1], [], []>} : vector<16x16xf32>, vector<16x16xf32>, vector<16x16xf32> -> vector<16x16xf32>
    %434 = vector.extract_strided_slice %373 {offsets = [0, 48], sizes = [16, 16], strides = [1, 1]} : vector<16x64xf32> to vector<16x16xf32>
    %435 = vector.extract_strided_slice %374 {offsets = [0, 48], sizes = [16, 16], strides = [1, 1]} : vector<16x64xf32> to vector<16x16xf32>
    %436 = vector.extract_strided_slice %375 {offsets = [0, 48], sizes = [16, 16], strides = [1, 1]} : vector<16x64xf32> to vector<16x16xf32>
    %cst_145 = arith.constant dense<0.000000e+00> : vector<16x16xf32>
    %437 = tpu.matmul %434, %435, %cst_145 {dimension_numbers = #tpu.dot_dimension_numbers<[1], [1], [0], [0], [0, 0, 1, 0], [], []>} : vector<16x16xf32>, vector<16x16xf32>, vector<16x16xf32> -> vector<16x16xf32>
    %cst_146 = arith.constant 2.500000e-01 : f32
    %438 = vector.broadcast %cst_146 : f32 to vector<16x16xf32>
    %439 = arith.mulf %437, %438 : vector<16x16xf32>
    %440 = vector.broadcast %376 : vector<1x16xf32> to vector<16x16xf32>
    %441 = arith.addf %439, %440 : vector<16x16xf32>
    %cst_147 = arith.constant dense<0xFF800000> : vector<16xf32>
    %442 = vector.multi_reduction <maximumf>, %441, %cst_147 [1] : vector<16x16xf32> to vector<16xf32>
    %443 = vector.shape_cast %442 : vector<16xf32> to vector<16x1xf32>
    %444 = vector.broadcast %443 : vector<16x1xf32> to vector<16x16xf32>
    %445 = arith.subf %441, %444 : vector<16x16xf32>
    %446 = math.exp %445 : vector<16x16xf32>
    %cst_148 = arith.constant dense<0.000000e+00> : vector<16xf32>
    %447 = vector.multi_reduction <add>, %446, %cst_148 [1] : vector<16x16xf32> to vector<16xf32>
    %448 = vector.shape_cast %447 : vector<16xf32> to vector<16x1xf32>
    %449 = tpu.reciprocal %448 {approx = true} : vector<16x1xf32> -> vector<16x1xf32>
    %450 = vector.broadcast %449 : vector<16x1xf32> to vector<16x16xf32>
    %451 = arith.mulf %446, %450 : vector<16x16xf32>
    %cst_149 = arith.constant dense<0.000000e+00> : vector<16x16xf32>
    %452 = tpu.matmul %451, %436, %cst_149 {dimension_numbers = #tpu.dot_dimension_numbers<[1], [0], [0], [1], [0, 0, 1, 1], [], []>} : vector<16x16xf32>, vector<16x16xf32>, vector<16x16xf32> -> vector<16x16xf32>
    %453 = tpu.concatenate %395, %414, %433, %452 in 1 : vector<16x16xf32>, vector<16x16xf32>, vector<16x16xf32>, vector<16x16xf32> -> vector<16x64xf32>
    %454 = tpu.concatenate %372, %453 in 0 : vector<16x64xf32>, vector<16x64xf32> -> vector<32x64xf32>
    %c1_150 = arith.constant 1 : index
    %c0_151 = arith.constant 0 : index
    %c0_152 = arith.constant 0 : index
    %455 = vector.load %arg7[%c1_150, %c0_151, %c0_152] : memref<2x64x64xf32, #tpu.memory_space<vmem>>, vector<1x64x64xf32>
    %456 = vector.shape_cast %455 : vector<1x64x64xf32> to vector<64x64xf32>
    %cst_153 = arith.constant dense<0.000000e+00> : vector<32x64xf32>
    %457 = tpu.matmul %454, %456, %cst_153 {dimension_numbers = #tpu.dot_dimension_numbers<[1], [0], [0], [1], [0, 0, 1, 1], [], []>} : vector<32x64xf32>, vector<64x64xf32>, vector<32x64xf32> -> vector<32x64xf32>
    %c1_154 = arith.constant 1 : index
    %c0_155 = arith.constant 0 : index
    %c0_156 = arith.constant 0 : index
    %458 = vector.load %arg8[%c1_154, %c0_155, %c0_156] : memref<2x1x64xf32, #tpu.memory_space<vmem>>, vector<1x1x64xf32>
    %459 = vector.shape_cast %458 : vector<1x1x64xf32> to vector<1x64xf32>
    %460 = vector.broadcast %459 : vector<1x64xf32> to vector<32x64xf32>
    %461 = arith.addf %457, %460 : vector<32x64xf32>
    %462 = arith.addf %461, %281 : vector<32x64xf32>
    %c1_157 = arith.constant 1 : index
    %c0_158 = arith.constant 0 : index
    %c0_159 = arith.constant 0 : index
    %463 = vector.load %arg9[%c1_157, %c0_158, %c0_159] : memref<2x1x64xf32, #tpu.memory_space<vmem>>, vector<1x1x64xf32>
    %464 = vector.shape_cast %463 : vector<1x1x64xf32> to vector<1x64xf32>
    %c1_160 = arith.constant 1 : index
    %c0_161 = arith.constant 0 : index
    %c0_162 = arith.constant 0 : index
    %465 = vector.load %arg10[%c1_160, %c0_161, %c0_162] : memref<2x1x64xf32, #tpu.memory_space<vmem>>, vector<1x1x64xf32>
    %466 = vector.shape_cast %465 : vector<1x1x64xf32> to vector<1x64xf32>
    %cst_163 = arith.constant dense<0.000000e+00> : vector<32xf32>
    %467 = vector.multi_reduction <add>, %462, %cst_163 [1] : vector<32x64xf32> to vector<32xf32>
    %468 = vector.shape_cast %467 : vector<32xf32> to vector<32x1xf32>
    %cst_164 = arith.constant 6.400000e+01 : f32
    %469 = vector.broadcast %cst_164 : f32 to vector<32x1xf32>
    %470 = arith.divf %468, %469 : vector<32x1xf32>
    %471 = vector.broadcast %470 : vector<32x1xf32> to vector<32x64xf32>
    %472 = arith.subf %462, %471 : vector<32x64xf32>
    %473 = arith.mulf %472, %472 : vector<32x64xf32>
    %cst_165 = arith.constant dense<0.000000e+00> : vector<32xf32>
    %474 = vector.multi_reduction <add>, %473, %cst_165 [1] : vector<32x64xf32> to vector<32xf32>
    %475 = vector.shape_cast %474 : vector<32xf32> to vector<32x1xf32>
    %cst_166 = arith.constant 6.400000e+01 : f32
    %476 = vector.broadcast %cst_166 : f32 to vector<32x1xf32>
    %477 = arith.divf %475, %476 : vector<32x1xf32>
    %478 = vector.broadcast %470 : vector<32x1xf32> to vector<32x64xf32>
    %479 = arith.subf %462, %478 : vector<32x64xf32>
    %cst_167 = arith.constant 9.99999974E-6 : f32
    %480 = vector.broadcast %cst_167 : f32 to vector<32x1xf32>
    %481 = arith.addf %477, %480 : vector<32x1xf32>
    %482 = math.rsqrt %481 : vector<32x1xf32>
    %483 = vector.broadcast %482 : vector<32x1xf32> to vector<32x64xf32>
    %484 = arith.mulf %479, %483 : vector<32x64xf32>
    %485 = vector.broadcast %464 : vector<1x64xf32> to vector<32x64xf32>
    %486 = arith.mulf %484, %485 : vector<32x64xf32>
    %487 = vector.broadcast %466 : vector<1x64xf32> to vector<32x64xf32>
    %488 = arith.addf %486, %487 : vector<32x64xf32>
    %c1_168 = arith.constant 1 : index
    %c0_169 = arith.constant 0 : index
    %c0_170 = arith.constant 0 : index
    %489 = vector.load %arg11[%c1_168, %c0_169, %c0_170] : memref<2x64x128xf32, #tpu.memory_space<vmem>>, vector<1x64x128xf32>
    %490 = vector.shape_cast %489 : vector<1x64x128xf32> to vector<64x128xf32>
    %cst_171 = arith.constant dense<0.000000e+00> : vector<32x128xf32>
    %491 = tpu.matmul %488, %490, %cst_171 {dimension_numbers = #tpu.dot_dimension_numbers<[1], [0], [0], [1], [0, 0, 1, 1], [], []>} : vector<32x64xf32>, vector<64x128xf32>, vector<32x128xf32> -> vector<32x128xf32>
    %c1_172 = arith.constant 1 : index
    %c0_173 = arith.constant 0 : index
    %c0_174 = arith.constant 0 : index
    %492 = vector.load %arg12[%c1_172, %c0_173, %c0_174] : memref<2x1x128xf32, #tpu.memory_space<vmem>>, vector<1x1x128xf32>
    %493 = vector.shape_cast %492 : vector<1x1x128xf32> to vector<1x128xf32>
    %494 = vector.broadcast %493 : vector<1x128xf32> to vector<32x128xf32>
    %495 = arith.addf %491, %494 : vector<32x128xf32>
    %cst_175 = arith.constant 5.000000e-01 : f32
    %496 = vector.broadcast %cst_175 : f32 to vector<32x128xf32>
    %497 = arith.mulf %496, %495 : vector<32x128xf32>
    %cst_176 = arith.constant 0.707106769 : f32
    %498 = vector.broadcast %cst_176 : f32 to vector<32x128xf32>
    %499 = arith.mulf %495, %498 : vector<32x128xf32>
    %500 = math.erf %499 : vector<32x128xf32>
    %cst_177 = arith.constant 1.000000e+00 : f32
    %501 = vector.broadcast %cst_177 : f32 to vector<32x128xf32>
    %502 = arith.addf %501, %500 : vector<32x128xf32>
    %503 = arith.mulf %497, %502 : vector<32x128xf32>
    %c1_178 = arith.constant 1 : index
    %c0_179 = arith.constant 0 : index
    %c0_180 = arith.constant 0 : index
    %504 = vector.load %arg13[%c1_178, %c0_179, %c0_180] : memref<2x128x64xf32, #tpu.memory_space<vmem>>, vector<1x128x64xf32>
    %505 = vector.shape_cast %504 : vector<1x128x64xf32> to vector<128x64xf32>
    %cst_181 = arith.constant dense<0.000000e+00> : vector<32x64xf32>
    %506 = tpu.matmul %503, %505, %cst_181 {dimension_numbers = #tpu.dot_dimension_numbers<[1], [0], [0], [1], [0, 0, 1, 1], [], []>} : vector<32x128xf32>, vector<128x64xf32>, vector<32x64xf32> -> vector<32x64xf32>
    %c1_182 = arith.constant 1 : index
    %c0_183 = arith.constant 0 : index
    %c0_184 = arith.constant 0 : index
    %507 = vector.load %arg14[%c1_182, %c0_183, %c0_184] : memref<2x1x64xf32, #tpu.memory_space<vmem>>, vector<1x1x64xf32>
    %508 = vector.shape_cast %507 : vector<1x1x64xf32> to vector<1x64xf32>
    %509 = vector.broadcast %508 : vector<1x64xf32> to vector<32x64xf32>
    %510 = arith.addf %506, %509 : vector<32x64xf32>
    %511 = arith.addf %510, %488 : vector<32x64xf32>
    %c1_185 = arith.constant 1 : index
    %c0_186 = arith.constant 0 : index
    %c0_187 = arith.constant 0 : index
    %512 = vector.load %arg15[%c1_185, %c0_186, %c0_187] : memref<2x1x64xf32, #tpu.memory_space<vmem>>, vector<1x1x64xf32>
    %513 = vector.shape_cast %512 : vector<1x1x64xf32> to vector<1x64xf32>
    %c1_188 = arith.constant 1 : index
    %c0_189 = arith.constant 0 : index
    %c0_190 = arith.constant 0 : index
    %514 = vector.load %arg16[%c1_188, %c0_189, %c0_190] : memref<2x1x64xf32, #tpu.memory_space<vmem>>, vector<1x1x64xf32>
    %515 = vector.shape_cast %514 : vector<1x1x64xf32> to vector<1x64xf32>
    %cst_191 = arith.constant dense<0.000000e+00> : vector<32xf32>
    %516 = vector.multi_reduction <add>, %511, %cst_191 [1] : vector<32x64xf32> to vector<32xf32>
    %517 = vector.shape_cast %516 : vector<32xf32> to vector<32x1xf32>
    %cst_192 = arith.constant 6.400000e+01 : f32
    %518 = vector.broadcast %cst_192 : f32 to vector<32x1xf32>
    %519 = arith.divf %517, %518 : vector<32x1xf32>
    %520 = vector.broadcast %519 : vector<32x1xf32> to vector<32x64xf32>
    %521 = arith.subf %511, %520 : vector<32x64xf32>
    %522 = arith.mulf %521, %521 : vector<32x64xf32>
    %cst_193 = arith.constant dense<0.000000e+00> : vector<32xf32>
    %523 = vector.multi_reduction <add>, %522, %cst_193 [1] : vector<32x64xf32> to vector<32xf32>
    %524 = vector.shape_cast %523 : vector<32xf32> to vector<32x1xf32>
    %cst_194 = arith.constant 6.400000e+01 : f32
    %525 = vector.broadcast %cst_194 : f32 to vector<32x1xf32>
    %526 = arith.divf %524, %525 : vector<32x1xf32>
    %527 = vector.broadcast %519 : vector<32x1xf32> to vector<32x64xf32>
    %528 = arith.subf %511, %527 : vector<32x64xf32>
    %cst_195 = arith.constant 9.99999974E-6 : f32
    %529 = vector.broadcast %cst_195 : f32 to vector<32x1xf32>
    %530 = arith.addf %526, %529 : vector<32x1xf32>
    %531 = math.rsqrt %530 : vector<32x1xf32>
    %532 = vector.broadcast %531 : vector<32x1xf32> to vector<32x64xf32>
    %533 = arith.mulf %528, %532 : vector<32x64xf32>
    %534 = vector.broadcast %513 : vector<1x64xf32> to vector<32x64xf32>
    %535 = arith.mulf %533, %534 : vector<32x64xf32>
    %536 = vector.broadcast %515 : vector<1x64xf32> to vector<32x64xf32>
    %537 = arith.addf %535, %536 : vector<32x64xf32>
    %538 = vector.extract_strided_slice %537 {offsets = [0, 0], sizes = [16, 64], strides = [1, 1]} : vector<32x64xf32> to vector<16x64xf32>
    %cst_196 = arith.constant dense<0.000000e+00> : vector<64xf32>
    %539 = vector.multi_reduction <add>, %538, %cst_196 [0] : vector<16x64xf32> to vector<64xf32>
    %540 = vector.shape_cast %539 : vector<64xf32> to vector<1x64xf32>
    %cst_197 = arith.constant 1.600000e+01 : f32
    %541 = vector.broadcast %cst_197 : f32 to vector<1x64xf32>
    %542 = arith.divf %540, %541 : vector<1x64xf32>
    %543 = vector.extract_strided_slice %537 {offsets = [16, 0], sizes = [16, 64], strides = [1, 1]} : vector<32x64xf32> to vector<16x64xf32>
    %cst_198 = arith.constant dense<0.000000e+00> : vector<64xf32>
    %544 = vector.multi_reduction <add>, %543, %cst_198 [0] : vector<16x64xf32> to vector<64xf32>
    %545 = vector.shape_cast %544 : vector<64xf32> to vector<1x64xf32>
    %cst_199 = arith.constant 1.600000e+01 : f32
    %546 = vector.broadcast %cst_199 : f32 to vector<1x64xf32>
    %547 = arith.divf %545, %546 : vector<1x64xf32>
    %548 = tpu.concatenate %542, %547 in 0 : vector<1x64xf32>, vector<1x64xf32> -> vector<2x64xf32>
    %c0_200 = arith.constant 0 : index
    %c0_201 = arith.constant 0 : index
    %549 = vector.load %arg17[%c0_200, %c0_201] : memref<64x128xf32, #tpu.memory_space<vmem>>, vector<64x128xf32>
    %cst_202 = arith.constant dense<0.000000e+00> : vector<2x128xf32>
    %550 = tpu.matmul %548, %549, %cst_202 {dimension_numbers = #tpu.dot_dimension_numbers<[1], [0], [0], [1], [0, 0, 1, 1], [], []>} : vector<2x64xf32>, vector<64x128xf32>, vector<2x128xf32> -> vector<2x128xf32>
    %c0_203 = arith.constant 0 : index
    %c0_204 = arith.constant 0 : index
    %551 = vector.load %arg18[%c0_203, %c0_204] : memref<1x128xf32, #tpu.memory_space<vmem>>, vector<1x128xf32>
    %552 = vector.broadcast %551 : vector<1x128xf32> to vector<2x128xf32>
    %553 = arith.addf %550, %552 : vector<2x128xf32>
    %c0_205 = arith.constant 0 : index
    %c0_206 = arith.constant 0 : index
    %554 = vector.load %arg19[%c0_205, %c0_206] : memref<2x128xf32, #tpu.memory_space<vmem>>, vector<2x128xf32>
    tpu.vector_store %arg19[%c0_205, %c0_206], %553 {strides = array<i32>} : memref<2x128xf32, #tpu.memory_space<vmem>>, vector<2x128xf32>,
    return
  }
  func.func @transform_0(%arg0: i32) -> (i32, i32) {
    %c0_i32 = arith.constant 0 : i32
    %c0_i32_0 = arith.constant 0 : i32
    %c0_i32_1 = arith.constant 0 : i32
    return %c0_i32, %c0_i32_0 : i32, i32
  }
  func.func @transform_1(%arg0: i32) -> (i32, i32) {
    %c0_i32 = arith.constant 0 : i32
    %c0_i32_0 = arith.constant 0 : i32
    %c0_i32_1 = arith.constant 0 : i32
    return %c0_i32, %c0_i32_0 : i32, i32
  }
  func.func @transform_2(%arg0: i32) -> (i32, i32) {
    %c0_i32 = arith.constant 0 : i32
    %c0_i32_0 = arith.constant 0 : i32
    %c0_i32_1 = arith.constant 0 : i32
    return %c0_i32, %c0_i32_0 : i32, i32
  }
  func.func @transform_3(%arg0: i32) -> (i32, i32) {
    %c0_i32 = arith.constant 0 : i32
    %c0_i32_0 = arith.constant 0 : i32
    %c0_i32_1 = arith.constant 0 : i32
    return %c0_i32, %c0_i32_0 : i32, i32
  }
  func.func @transform_4(%arg0: i32) -> (i32, i32, i32) {
    %c0_i32 = arith.constant 0 : i32
    %c0_i32_0 = arith.constant 0 : i32
    %c0_i32_1 = arith.constant 0 : i32
    %c0_i32_2 = arith.constant 0 : i32
    return %c0_i32, %c0_i32_0, %c0_i32_1 : i32, i32, i32
  }
  func.func @transform_5(%arg0: i32) -> (i32, i32, i32) {
    %c0_i32 = arith.constant 0 : i32
    %c0_i32_0 = arith.constant 0 : i32
    %c0_i32_1 = arith.constant 0 : i32
    %c0_i32_2 = arith.constant 0 : i32
    return %c0_i32, %c0_i32_0, %c0_i32_1 : i32, i32, i32
  }
  func.func @transform_6(%arg0: i32) -> (i32, i32, i32) {
    %c0_i32 = arith.constant 0 : i32
    %c0_i32_0 = arith.constant 0 : i32
    %c0_i32_1 = arith.constant 0 : i32
    %c0_i32_2 = arith.constant 0 : i32
    return %c0_i32, %c0_i32_0, %c0_i32_1 : i32, i32, i32
  }
  func.func @transform_7(%arg0: i32) -> (i32, i32, i32) {
    %c0_i32 = arith.constant 0 : i32
    %c0_i32_0 = arith.constant 0 : i32
    %c0_i32_1 = arith.constant 0 : i32
    %c0_i32_2 = arith.constant 0 : i32
    return %c0_i32, %c0_i32_0, %c0_i32_1 : i32, i32, i32
  }
  func.func @transform_8(%arg0: i32) -> (i32, i32, i32) {
    %c0_i32 = arith.constant 0 : i32
    %c0_i32_0 = arith.constant 0 : i32
    %c0_i32_1 = arith.constant 0 : i32
    %c0_i32_2 = arith.constant 0 : i32
    return %c0_i32, %c0_i32_0, %c0_i32_1 : i32, i32, i32
  }
  func.func @transform_9(%arg0: i32) -> (i32, i32, i32) {
    %c0_i32 = arith.constant 0 : i32
    %c0_i32_0 = arith.constant 0 : i32
    %c0_i32_1 = arith.constant 0 : i32
    %c0_i32_2 = arith.constant 0 : i32
    return %c0_i32, %c0_i32_0, %c0_i32_1 : i32, i32, i32
  }
  func.func @transform_10(%arg0: i32) -> (i32, i32, i32) {
    %c0_i32 = arith.constant 0 : i32
    %c0_i32_0 = arith.constant 0 : i32
    %c0_i32_1 = arith.constant 0 : i32
    %c0_i32_2 = arith.constant 0 : i32
    return %c0_i32, %c0_i32_0, %c0_i32_1 : i32, i32, i32
  }
  func.func @transform_11(%arg0: i32) -> (i32, i32, i32) {
    %c0_i32 = arith.constant 0 : i32
    %c0_i32_0 = arith.constant 0 : i32
    %c0_i32_1 = arith.constant 0 : i32
    %c0_i32_2 = arith.constant 0 : i32
    return %c0_i32, %c0_i32_0, %c0_i32_1 : i32, i32, i32
  }
  func.func @transform_12(%arg0: i32) -> (i32, i32, i32) {
    %c0_i32 = arith.constant 0 : i32
    %c0_i32_0 = arith.constant 0 : i32
    %c0_i32_1 = arith.constant 0 : i32
    %c0_i32_2 = arith.constant 0 : i32
    return %c0_i32, %c0_i32_0, %c0_i32_1 : i32, i32, i32
  }
  func.func @transform_13(%arg0: i32) -> (i32, i32, i32) {
    %c0_i32 = arith.constant 0 : i32
    %c0_i32_0 = arith.constant 0 : i32
    %c0_i32_1 = arith.constant 0 : i32
    %c0_i32_2 = arith.constant 0 : i32
    return %c0_i32, %c0_i32_0, %c0_i32_1 : i32, i32, i32
  }
  func.func @transform_14(%arg0: i32) -> (i32, i32, i32) {
    %c0_i32 = arith.constant 0 : i32
    %c0_i32_0 = arith.constant 0 : i32
    %c0_i32_1 = arith.constant 0 : i32
    %c0_i32_2 = arith.constant 0 : i32
    return %c0_i32, %c0_i32_0, %c0_i32_1 : i32, i32, i32
  }
  func.func @transform_15(%arg0: i32) -> (i32, i32, i32) {
    %c0_i32 = arith.constant 0 : i32
    %c0_i32_0 = arith.constant 0 : i32
    %c0_i32_1 = arith.constant 0 : i32
    %c0_i32_2 = arith.constant 0 : i32
    return %c0_i32, %c0_i32_0, %c0_i32_1 : i32, i32, i32
  }
  func.func @transform_16(%arg0: i32) -> (i32, i32) {
    %c0_i32 = arith.constant 0 : i32
    %c0_i32_0 = arith.constant 0 : i32
    %c0_i32_1 = arith.constant 0 : i32
    return %c0_i32, %c0_i32_0 : i32, i32
  }
  func.func @transform_17(%arg0: i32) -> (i32, i32) {
    %c0_i32 = arith.constant 0 : i32
    %c0_i32_0 = arith.constant 0 : i32
    %c0_i32_1 = arith.constant 0 : i32
    return %c0_i32, %c0_i32_0 : i32, i32
  }
  func.func @transform_18(%arg0: i32) -> (i32, i32) {
    %c0_i32 = arith.constant 0 : i32
    %c0_i32_0 = arith.constant 0 : i32
    %c0_i32_1 = arith.constant 0 : i32
    return %c0_i32, %c0_i32_0 : i32, i32
  }
}

</mosaic_0001>

<bundles_post_ra>
// kernel: web_attack_classifier.1
= control target key start
LH: loop header
LB: loop body
LE: loop exit
PB: predicated region body
PF: predicated region fallthrough
CT: control target
= control target key end

     0   :  { %s7700_s0 = inlined_call_operand.vmem [shape: f32[32,64], index: 0, kind: input, shape index: {}]   ;;  %s7701_s1 = inlined_call_operand.vmem [shape: f32[2,16], index: 1, kind: input, shape index: {}]   ;;  %s7702_s2 = inlined_call_operand.vmem [shape: f32[1,64], index: 2, kind: input, shape index: {}]   ;;  %s7703_s3 = inlined_call_operand.vmem [shape: f32[1,64], index: 3, kind: input, shape index: {}]   ;;  %s7704_s4 = inlined_call_operand.vmem [shape: f32[2,64,192], index: 4, kind: input, shape index: {}]   ;;  %s7705_s5 = inlined_call_operand.vmem [shape: f32[2,1,192], index: 5, kind: input, shape index: {}]   ;;  %s7706_s6 = inlined_call_operand.vmem [shape: f32[2,64,64], index: 6, kind: input, shape index: {}]   ;;  %s7707_s7 = inlined_call_operand.vmem [shape: f32[2,1,64], index: 7, kind: input, shape index: {}]   ;;  %s7708_s8 = inlined_call_operand.vmem [shape: f32[2,1,64], index: 8, kind: input, shape index: {}]   ;;  %s7709_s9 = inlined_call_operand.vmem [shape: f32[2,1,64], index: 9, kind: input, shape index: {}]   ;;  %s7710_s10 = inlined_call_operand.vmem [shape: f32[2,64,128], index: 10, kind: input, shape index: {}]   ;;  %s7711_s11 = inlined_call_operand.vmem [shape: f32[2,1,128], index: 11, kind: input, shape index: {}]   ;;  %s7712_s12 = inlined_call_operand.vmem [shape: f32[2,128,64], index: 12, kind: input, shape index: {}]   ;;  %s7713_s13 = inlined_call_operand.vmem [shape: f32[2,1,64], index: 13, kind: input, shape index: {}]   ;;  %s7714_s14 = inlined_call_operand.vmem [shape: f32[2,1,64], index: 14, kind: input, shape index: {}]   ;;  %s7715_s15 = inlined_call_operand.vmem [shape: f32[2,1,64], index: 15, kind: input, shape index: {}]   ;;  %s7716_s16 = inlined_call_operand.vmem [shape: f32[64,128], index: 16, kind: input, shape index: {}]   ;;  %s7717_s17 = inlined_call_operand.vmem [shape: f32[1,128], index: 17, kind: input, shape index: {}]   ;;  %s7718_s18 = inlined_call_operand.hbm [shape: f32[2,128], index: 18, kind: output, shape index: {}]  }
   0x1   :  { %7722 = sst [smem:[#allocation5_spill]] %s7700_s0 }
   0x2   :  { %7723 = sst [smem:[#allocation6_spill]] %s7701_s1 }
   0x3   :  { %7724 = sst [smem:[#allocation7_spill]] %s7702_s2 }
   0x4   :  { %s7725_s29 = sld [smem:[#allocation5_spill]]  ;;  %vm67_vm0 = vcmask 523264  }
   0xa   :  { %v61_v0 = vld [vmem:[%s7725_s29] sm:$0xff]  ;;  %v62_v1 = vld [vmem:[%s7725_s29 + $0x8] sm:$0xff] }
   0xb   :  { %23 = vsyncpa [#allocation3], 0  ;;  %v68_v2 = vsel %vm67_vm0, %v61_v0, 0.0  ;;  %v71_v3 = vsel %vm67_vm0, %v62_v1, 0.0  ;;  %v142_v14 = vld [vmem:[%s7704_s4 + $0x8] sm:$0xff]  ;;  %v144_v15 = vld [vmem:[%s7704_s4 + $0x18] sm:$0xff]  ;;  %v159_v55 = vlaneseq }
   0xc   :  { %69 = vadd.xlane.f32.xlu0 %v68_v2  ;;  %v5750_v16 = vpack.c.bf16 %v144_v15, %v142_v14  ;;  %v141_v17 = vld [vmem:[%s7704_s4] sm:$0xff]  ;;  %v143_v18 = vld [vmem:[%s7704_s4 + $0x10] sm:$0xff]  ;;  %v146_v20 = vld [vmem:[%s7704_s4 + $0x28] sm:$0xff]  ;;  %v6441_v33 = vmov 0.0   ;;  %s7726_s23 = sld [smem:[#allocation7_spill]]  ;;  %vm276_vm1 = vcmask 130048  }
   0xd   :  { %v5752_v19 = vpack.c.bf16 %v143_v18, %v141_v17  ;;  %v148_v21 = vld [vmem:[%s7704_s4 + $0x38] sm:$0xff]  ;;  %v145_v23 = vld [vmem:[%s7704_s4 + $0x20] sm:$0xff]  ;;  %v147_v24 = vld [vmem:[%s7704_s4 + $0x30] sm:$0xff]  ;;  %245 = vmatprep.mubr.f32.mxu0 %v6441_v33  ;;  %v160_v56 = vshrl.u32 %v159_v55, 7  ;;  %s6442_s27 = smov 64   ;;  %s7729_s0 = sld [smem:[#allocation6_spill]] }
   0xe   :  { %5751 = vmatprep.subr.bf16.mxu0 %v5750_v16  ;;  %v5754_v22 = vpack.c.bf16 %v148_v21, %v146_v20  ;;  %v5756_v25 = vpack.c.bf16 %v147_v24, %v145_v23  ;;  %v150_v26 = vld [vmem:[%s7704_s4 + $0x48] sm:$0xff]  ;;  %v152_v27 = vld [vmem:[%s7704_s4 + $0x58] sm:$0xff]  ;;  %v149_v28 = vld [vmem:[%s7704_s4 + $0x40] sm:$0xff]  ;;  %s6444_s22 = smov 112   ;;  %s6445_s2 = smov 32   ;;  %vm1111_vm3 = vcmask 261120  }
   0xf   :  { %5753 = vmatpush1.bf16.msra.mxu0 %v5752_v19  ;;  %v5758_v29 = vpack.c.bf16 %v152_v27, %v150_v26  ;;  %v151_v30 = vld [vmem:[%s7704_s4 + $0x50] sm:$0xff]  ;;  %v154_v31 = vld [vmem:[%s7704_s4 + $0x68] sm:$0xff]  ;;  %v156_v32 = vld [vmem:[%s7704_s4 + $0x78] sm:$0xff]  ;;  %v6630_v57 = vsub.s32 0, %v160_v56  ;;  %v6638_v60 = vsub.s32 1, %v160_v56  ;;  %s7720_s24 = smov 80  }
  0x10   :  { %72 = vadd.xlane.f32.xlu0 %v71_v3  ;;  %5755 = vmatprep.subr.bf16.mxu0 %v5754_v22  ;;  %v5760_v34 = vpack.c.bf16 %v151_v30, %v149_v28  ;;  %v5762_v35 = vpack.c.bf16 %v156_v32, %v154_v31  ;;  %v153_v36 = vld [vmem:[%s7704_s4 + $0x60] sm:$0xff]  ;;  %v155_v37 = vld [vmem:[%s7704_s4 + $0x70] sm:$0xff]  ;;  %vm6663_vm2 = vmpackc.low %vm276_vm1, %vm276_vm1  ;;  %s6448_s25 = smov 16   ;;  %vm1114_vm4 = vcmask 392192   ;;  %vm6450_vm5 = vmmov 0  }
  0x11   :  { %v5764_v38 = vpack.c.bf16 %v155_v37, %v153_v36  ;;  %v6614_v48 = vld [vmem:[%s7703_s3] ss:$0 sm:$0xff]  ;;  %v63_v23 = vld [vmem:[%s7725_s29 + $0x10] sm:$0xff]  ;;  %v64_v26 = vld [vmem:[%s7725_s29 + $0x18] sm:$0xff]  ;;  %s6443_s29 = smov 48   ;;  %vm4819_vm6 = vcmask 1040384  }
  0x12   :  { %v6609_v46 = vld [vmem:[%s7726_s23] ss:$0 sm:$0xff]  ;;  %v77_v27 = vsel %vm67_vm0, %v64_v26, 0.0  ;;  %s6446_s23 = smov 96  }
  0x13   :  { %5757 = vmatpush1.bf16.msra.mxu0 %v5756_v25  ;;  %v157_v58 = vld [vmem:[%s7705_s5] sm:$0x3]  ;;  %v74_v25 = vsel %vm67_vm0, %v63_v23, 0.0 }
  0x14   :  { %5759 = vmatprep.subr.bf16.mxu0 %v5758_v29  ;;  %v6636_v59 = vrot.slane %v157_v58, %v6630_v57  ;;  %v6676_v14 = vld [vmem:[%s7729_s0] sm:$0x3] }
  0x15   :  { %v6680_v15 = vrot.slane %v6676_v14, %v6630_v57 }
  0x17   :  { %5761 = vmatpush1.bf16.msra.mxu0 %v5760_v34 }
  0x18   :  { %5763 = vmatprep.subr.bf16.mxu0 %v5762_v35 }
  0x1b   :  { %5765 = vmatpush1.bf16.msra.mxu0 %v5764_v38 }
  0x99   :  { %v70_v4 = vpop.xlane.xlu0 %69 }
  0x9a   :  { %v81_v5 = vmul.f32 0.015625, %v70_v4 }
  0x9c   :  { %v85_v6 = vsub.f32 %v61_v0, %v81_v5  ;;  %v6644_v0 = vrot.slane %v157_v58, %v6638_v60 }
  0x9d   :  { %v73_v7 = vpop.xlane.xlu0 %72 }
  0x9e   :  { %v82_v8 = vmul.f32 0.015625, %v73_v7  ;;  %v89_v9 = vmul.f32 %v85_v6, %v85_v6 }
  0xa0   :  { %v86_v10 = vsub.f32 %v62_v1, %v82_v8  ;;  %v93_v11 = vsel %vm67_vm0, %v89_v9, 0.0 }
  0xa1   :  { %94 = vadd.xlane.f32.xlu1 %v93_v11 }
  0xa2   :  { %v90_v12 = vmul.f32 %v86_v10, %v86_v10 }
  0xa4   :  { %v96_v13 = vsel %vm67_vm0, %v90_v12, 0.0 }
  0xa5   :  { %97 = vadd.xlane.f32.xlu1 %v96_v13 }
 0x12e   :  { %v95_v39 = vpop.xlane.xlu1 %94 }
 0x12f   :  { %v105_v40 = vmul.f32 0.015625, %v95_v39 }
 0x131   :  { %v109_v41 = vadd.f32 1e-05, %v105_v40 }
 0x132   :  { %v98_v42 = vpop.xlane.xlu1 %97 }
 0x133   :  { %6233 = vrsqrt.f32 %v109_v41  ;;  %v106_v43 = vmul.f32 0.015625, %v98_v42 }
 0x135   :  { %v110_v44 = vadd.f32 1e-05, %v106_v43 }
 0x137   :  { %6235 = vrsqrt.f32 %v110_v44 }
 0x13d   :  { %v6234_v45 = vpop.eup %6233 }
 0x13e   :  { %v117_v47 = vmul.f32 %v6234_v45, %v85_v6 }
 0x140   :  { %v127_v49 = vmul.f32 %v6609_v46, %v117_v47 }
 0x141   :  { %v6236_v50 = vpop.eup %6235 }
 0x142   :  { %v6618_v51 = vadd.f32 %v6614_v48, %v127_v49  ;;  %v118_v52 = vmul.f32 %v6236_v50, %v86_v10 }
 0x144   :  { %4926 = vmatmul.mubr.msk.f32.vlgmr.msra.gmra.mrb[0].mxu0 %vm67_vm0, %v6618_v51  ;;  %v128_v53 = vmul.f32 %v6609_v46, %v118_v52 }
 0x145   :  { %251 = vmatprep.mubr.f32.mxu0 %v6441_v33 }
 0x146   :  { %v6625_v54 = vadd.f32 %v6614_v48, %v128_v53 }
 0x148   :  { %4927 = vmatmul.mubr.msk.f32.gmra.mrb[2].mxu0 %vm67_vm0, %v6625_v54 }
 0x149   :  { %257 = vmatprep.mubr.f32.mxu0 %v6441_v33 }
 0x217   :  { %v247_v61 = vpop.f32.mrb[0].mxu0 }
 0x218   :  { %v6641_v62 = vadd.f32 %v247_v61, %v6636_v59  ;;  %v249_v63 = vpop.f32.mrb[1].mxu0 }
 0x219   :  { %v250_v4 = vadd.f32 %v249_v63, %v6644_v0 }
 0x21a   :  { %5347 = vmatprep.mubr.msk.f32.mxu1 %vm276_vm1, %v6641_v62 }
 0x21b   :  { %v253_v1 = vpop.f32.mrb[2].mxu0 }
 0x21c   :  { %v6649_v2 = vadd.f32 %v253_v1, %v6636_v59  ;;  %v255_v3 = vpop.f32.mrb[3].mxu0 }
 0x21d   :  { %v256_v5 = vadd.f32 %v255_v3, %v6644_v0 }
 0x21e   :  { %v6655_v6 = vpack.i.bf16 %v6649_v2, %v6641_v62 }
 0x21f   :  { %v5772_v7 = vpack.c.bf16 %v256_v5, %v250_v4  ;;  %v6657_v8 = vpack.i.bf16 %v256_v5, %v250_v4 }
 0x220   :  { %6094 = vrot.lane.b32.xlu0 %v6655_v6, %s6442_s27 }
 0x292   :  { %v6095_v9 = vpop.permute.xlu0 %6094 }
 0x293   :  { %v6097_v10 = vunpack.i.h.bf16 %v6095_v9  ;;  %v6096_v11 = vunpack.i.l.bf16 %v6095_v9 }
 0x295   :  { %v5766_v13 = vpack.c.bf16 %v6097_v10, %v6096_v11 }
 0x297   :  { %5768 = vmatprep.subr.msk.bf16.mxu1 %vm6663_vm2, %v5766_v13 }
 0x298   :  { %5771 = vmatpush3.bf16.xpose.msk.msra.mxu1 %vm6663_vm2, %v5766_v13 }
 0x299   :  { %5773 = vmatprep.subr.bf16.mxu1 %v5772_v7 }
 0x29f   :  { %5348 = vmatmul.mubr.msk.f32.vlgmr.msra.gmra.mrb[0].mxu1 %vm276_vm1, %v6649_v2 }
 0x2a0   :  { %5775 = vmatpush3.bf16.msra.mxu1 %v5772_v7 }
 0x372   :  { %v5349_v16 = vpop.f32.mrb[0].mxu1 }
 0x373   :  { %v351_v17 = vpop.f32.mrb[1].mxu1  ;;  %v361_v18 = vmul.f32 0.25, %v5349_v16 }
 0x374   :  { %v360_v19 = vmul.f32 0.25, %v351_v17 }
 0x375   :  { %v367_v22 = vadd.f32 %v6680_v15, %v361_v18 }
 0x376   :  { %v366_v20 = vadd.f32 %v6680_v15, %v360_v19 }
 0x377   :  { %v371_v24 = vsel %vm276_vm1, %v367_v22, -inf }
 0x378   :  { %v368_v21 = vsel %vm276_vm1, %v366_v20, -inf }
 0x379   :  { %369 = vmax.xlane.f32.xlu1 %v368_v21 }
 0x37d   :  { %372 = vmax.xlane.f32.xlu1 %v371_v24 }
 0x381   :  { %75 = vadd.xlane.f32.xlu1 %v74_v25 }
 0x385   :  { %78 = vadd.xlane.f32.xlu1 %v77_v27 }
 0x406   :  { %v370_v28 = vpop.xlane.xlu1 %369 }
 0x407   :  { %v374_v45 = vsub.f32 %v366_v20, %v370_v28 }
 0x409   :  { %v376_v47 = vmul.f32 1.442695, %v374_v45 }
 0x40a   :  { %v373_v29 = vpop.xlane.xlu1 %372 }
 0x40b   :  { %v375_v30 = vsub.f32 %v367_v22, %v373_v29 }
 0x40d   :  { %v378_v31 = vmul.f32 1.442695, %v375_v30 }
 0x40e   :  { %v76_v32 = vpop.xlane.xlu1 %75 }
 0x40f   :  { %6237 = vpow2.f32 %v378_v31  ;;  %v83_v34 = vmul.f32 0.015625, %v76_v32 }
 0x410   :  { %6239 = vpow2.f32 %v376_v47 }
 0x411   :  { %v87_v35 = vsub.f32 %v63_v23, %v83_v34 }
 0x412   :  { %v79_v36 = vpop.xlane.xlu1 %78 }
 0x413   :  { %v84_v37 = vmul.f32 0.015625, %v79_v36  ;;  %v91_v38 = vmul.f32 %v87_v35, %v87_v35 }
 0x415   :  { %v88_v39 = vsub.f32 %v64_v26, %v84_v37  ;;  %v99_v40 = vsel %vm67_vm0, %v91_v38, 0.0 }
 0x416   :  { %100 = vadd.xlane.f32.xlu1 %v99_v40 }
 0x417   :  { %v92_v41 = vmul.f32 %v88_v39, %v88_v39 }
 0x419   :  { %v6238_v42 = vpop.eup %6237  ;;  %v102_v43 = vsel %vm67_vm0, %v92_v41, 0.0 }
 0x41a   :  { %103 = vadd.xlane.f32.xlu1 %v102_v43  ;;  %v383_v44 = vsel %vm276_vm1, %v6238_v42, 0.0  ;;  %v6240_v49 = vpop.eup %6239 }
 0x41b   :  { %384 = vadd.xlane.f32.xlu0 %v383_v44  ;;  %v380_v50 = vsel %vm276_vm1, %v6240_v49, 0.0 }
 0x42b   :  { %6099 = vrot.lane.b32.xlu1 %v6655_v6, %s6443_s29 }
 0x42f   :  { %471 = vrot.lane.b32.xlu1 %v6641_v62, %s6444_s22 }
 0x431   :  { %473 = vrot.lane.b32.xlu0 %v6649_v2, %s6444_s22 }
 0x453   :  { %381 = vadd.xlane.f32.xlu1 %v380_v50 }
 0x464   :  { %6104 = vrot.lane.b32.xlu1 %v6655_v6, %s6445_s2 }
 0x468   :  { %677 = vrot.lane.b32.xlu1 %v6641_v62, %s6446_s23 }
 0x46c   :  { %679 = vrot.lane.b32.xlu1 %v6649_v2, %s6446_s23 }
 0x4a3   :  { %v101_v52 = vpop.xlane.xlu1 %100 }
 0x4a4   :  { %v107_v53 = vmul.f32 0.015625, %v101_v52 }
 0x4a6   :  { %v111_v55 = vadd.f32 1e-05, %v107_v53 }
 0x4a7   :  { %v104_v56 = vpop.xlane.xlu1 %103 }
 0x4a8   :  { %6241 = vrsqrt.f32 %v111_v55  ;;  %v108_v58 = vmul.f32 0.015625, %v104_v56  ;;  %v385_v19 = vpop.xlane.xlu0 %384 }
 0x4aa   :  { %v112_v61 = vadd.f32 1e-05, %v108_v58 }
 0x4ab   :  { %v6100_v63 = vpop.permute.xlu1 %6099 }
 0x4ac   :  { %6243 = vrsqrt.f32 %v112_v61  ;;  %v6102_v1 = vunpack.i.h.bf16 %v6100_v63  ;;  %v6101_v3 = vunpack.i.l.bf16 %v6100_v63  ;;  %v474_v29 = vpop.permute.xlu0 %473 }
 0x4ad   :  { %6245 = vrcp.f32 %v385_v19 }
 0x4ae   :  { %v5776_v4 = vpack.c.bf16 %v6102_v1, %v6101_v3 }
 0x4af   :  { %v472_v18 = vpop.permute.xlu1 %471 }
 0x4b0   :  { %5778 = vmatprep.subr.msk.bf16.mxu1 %vm6663_vm2, %v5776_v4 }
 0x4b2   :  { %v6242_v5 = vpop.eup %6241 }
 0x4b3   :  { %v119_v7 = vmul.f32 %v6242_v5, %v87_v35 }
 0x4b5   :  { %v129_v9 = vmul.f32 %v6609_v46, %v119_v7 }
 0x4b6   :  { %v6244_v10 = vpop.eup %6243 }
 0x4b7   :  { %v6714_v11 = vadd.f32 %v6614_v48, %v129_v9  ;;  %v120_v13 = vmul.f32 %v6244_v10, %v88_v39 }
 0x4b9   :  { %4928 = vmatmul.mubr.msk.f32.gmra.mrb[4].mxu0 %vm67_vm0, %v6714_v11  ;;  %v130_v16 = vmul.f32 %v6609_v46, %v120_v13  ;;  %v6246_v46 = vpop.eup %6245 }
 0x4ba   :  { %263 = vmatprep.mubr.f32.mxu0 %v6441_v33  ;;  %v389_v27 = vmul.f32 %v6246_v46, %v6238_v42 }
 0x4bb   :  { %v6721_v17 = vadd.f32 %v6614_v48, %v130_v16 }
 0x4bd   :  { %4929 = vmatmul.mubr.msk.f32.gmra.mrb[6].mxu0 %vm67_vm0, %v6721_v17 }
 0x4e0   :  { %v382_v20 = vpop.xlane.xlu1 %381 }
 0x4e1   :  { %6247 = vrcp.f32 %v382_v20 }
 0x4e4   :  { %v6105_v21 = vpop.permute.xlu1 %6104 }
 0x4e5   :  { %v6107_v22 = vunpack.i.h.bf16 %v6105_v21  ;;  %v6106_v23 = vunpack.i.l.bf16 %v6105_v21 }
 0x4e7   :  { %v5786_v24 = vpack.c.bf16 %v6107_v22, %v6106_v23 }
 0x4e8   :  { %v678_v25 = vpop.permute.xlu1 %677 }
 0x4e9   :  { %5788 = vmatprep.subr.msk.bf16.mxu0 %vm6663_vm2, %v5786_v24  ;;  %5375 = vmatprep.mubr.msk.f32.mxu0 %vm276_vm1, %v678_v25 }
 0x4ea   :  { %5791 = vmatpush3.bf16.xpose.msk.msra.mxu0 %vm6663_vm2, %v5786_v24 }
 0x4eb   :  { %v6248_v48 = vpop.eup %6247 }
 0x4ec   :  { %v388_v26 = vmul.f32 %v6248_v48, %v6240_v49  ;;  %v680_v28 = vpop.permute.xlu1 %679 }
 0x4ee   :  { %5354 = vmatprep.mubr.msk.f32.mxu1 %vm276_vm1, %v388_v26 }
 0x4ef   :  { %5355 = vmatmul.mubr.msk.f32.vlgmr.msra.gmra.mrb[2].mxu1 %vm276_vm1, %v389_v27 }
 0x4f0   :  { %5781 = vmatpush3.bf16.xpose.msk.msra.mxu1 %vm6663_vm2, %v5776_v4  ;;  %5361 = vmatprep.mubr.msk.f32.mxu1 %vm276_vm1, %v472_v18 }
 0x4f1   :  { %5376 = vmatmul.mubr.msk.f32.vlgmr.msra.gmra.mrb[8].mxu0 %vm276_vm1, %v680_v28 }
 0x4f7   :  { %5362 = vmatmul.mubr.msk.f32.vlgmr.msra.gmra.mrb[4].mxu1 %vm276_vm1, %v474_v29 }
 0x58c   :  { %v6737_v30 = vpop.f32.mrb[4].mxu0 }
 0x58d   :  { %v261_v31 = vpop.f32.mrb[5].mxu0  ;;  %v6772_v28 = vadd.f32 %v6737_v30, %v6636_v59 }
 0x58e   :  { %v262_v35 = vadd.f32 %v261_v31, %v6644_v0 }
 0x590   :  { %v265_v32 = vpop.f32.mrb[6].mxu0 }
 0x591   :  { %v267_v34 = vpop.f32.mrb[7].mxu0  ;;  %v6768_v27 = vadd.f32 %v265_v32, %v6636_v59 }
 0x592   :  { %v268_v36 = vadd.f32 %v267_v34, %v6644_v0 }
 0x594   :  { %v6741_v37 = vpack.c.bf16 %v268_v36, %v262_v35  ;;  %v6743_v38 = vpack.i.bf16 %v268_v36, %v262_v35 }
 0x5c2   :  { %v6745_v39 = vpop.f32.mrb[2].mxu1 }
 0x5c3   :  { %v6747_v40 = vpop.f32.mrb[3].mxu1 }
 0x5c4   :  { %v5377_v41 = vpop.f32.mrb[8].mxu0 }
 0x5c5   :  { %v759_v42 = vpop.f32.mrb[9].mxu0  ;;  %v769_v53 = vmul.f32 0.25, %v5377_v41 }
 0x5c6   :  { %v768_v47 = vmul.f32 0.25, %v759_v42 }
 0x5c7   :  { %v771_v61 = vadd.f32 %v769_v53, %v6680_v15 }
 0x5c8   :  { %v770_v56 = vadd.f32 %v768_v47, %v6680_v15 }
 0x5c9   :  { %v775_v63 = vsel %vm276_vm1, %v771_v61, -inf }
 0x5ca   :  { %v5363_v43 = vpop.f32.mrb[4].mxu1  ;;  %v772_v58 = vsel %vm276_vm1, %v770_v56, -inf }
 0x5cb   :  { %v563_v44 = vmul.f32 0.25, %v5363_v43  ;;  %v553_v45 = vpop.f32.mrb[5].mxu1 }
 0x5cc   :  { %v562_v49 = vmul.f32 0.25, %v553_v45 }
 0x5cd   :  { %v565_v50 = vadd.f32 %v563_v44, %v6680_v15 }
 0x5ce   :  { %v564_v52 = vadd.f32 %v562_v49, %v6680_v15 }
 0x5cf   :  { %v569_v0 = vsel %vm276_vm1, %v565_v50, -inf }
 0x5d0   :  { %570 = vmax.xlane.f32.xlu0 %v569_v0  ;;  %v566_v55 = vsel %vm276_vm1, %v564_v52, -inf }
 0x5d1   :  { %567 = vmax.xlane.f32.xlu1 %v566_v55 }
 0x5d5   :  { %773 = vmax.xlane.f32.xlu1 %v772_v58 }
 0x5d9   :  { %776 = vmax.xlane.f32.xlu1 %v775_v63 }
 0x65d   :  { %v571_v3 = vpop.xlane.xlu0 %570 }
 0x65e   :  { %v568_v1 = vpop.xlane.xlu1 %567  ;;  %v573_v7 = vsub.f32 %v565_v50, %v571_v3 }
 0x65f   :  { %v572_v25 = vsub.f32 %v564_v52, %v568_v1 }
 0x660   :  { %v576_v16 = vmul.f32 1.442695, %v573_v7 }
 0x661   :  { %v574_v46 = vmul.f32 1.442695, %v572_v25 }
 0x662   :  { %v774_v4 = vpop.xlane.xlu1 %773 }
 0x663   :  { %v778_v5 = vsub.f32 %v770_v56, %v774_v4 }
 0x665   :  { %v780_v9 = vmul.f32 1.442695, %v778_v5 }
 0x666   :  { %v777_v10 = vpop.xlane.xlu1 %776 }
 0x667   :  { %6249 = vpow2.f32 %v780_v9  ;;  %v779_v13 = vsub.f32 %v771_v61, %v777_v10 }
 0x669   :  { %v782_v18 = vmul.f32 1.442695, %v779_v13 }
 0x66b   :  { %6251 = vpow2.f32 %v782_v18 }
 0x66c   :  { %6253 = vpow2.f32 %v576_v16 }
 0x66d   :  { %6255 = vpow2.f32 %v574_v46 }
 0x671   :  { %v6250_v19 = vpop.eup %6249 }
 0x672   :  { %v784_v20 = vsel %vm276_vm1, %v6250_v19, 0.0 }
 0x673   :  { %785 = vadd.xlane.f32.xlu1 %v784_v20 }
 0x675   :  { %v6252_v21 = vpop.eup %6251 }
 0x676   :  { %v787_v22 = vsel %vm276_vm1, %v6252_v21, 0.0  ;;  %v6254_v23 = vpop.eup %6253 }
 0x677   :  { %788 = vadd.xlane.f32.xlu0 %v787_v22  ;;  %v581_v24 = vsel %vm276_vm1, %v6254_v23, 0.0  ;;  %v6256_v48 = vpop.eup %6255 }
 0x678   :  { %v578_v26 = vsel %vm276_vm1, %v6256_v48, 0.0 }
 0x67b   :  { %582 = vadd.xlane.f32.xlu0 %v581_v24 }
 0x684   :  { %6109 = vrot.lane.b32.xlu1 %v6657_v8, %s6444_s22 }
 0x691   :  { %6114 = vrot.lane.b32.xlu0 %v6657_v8, %s6446_s23 }
 0x695   :  { %881 = vrot.lane.b32.xlu0 %v6641_v62, %s7720_s24  ;;  %v6778_v62 = vpack.i.bf16 %v6768_v27, %v6772_v28 }
 0x6a8   :  { %579 = vadd.xlane.f32.xlu1 %v578_v26 }
 0x6b9   :  { %6119 = vrot.lane.b32.xlu1 %v6655_v6, %s6448_s25 }
 0x6bd   :  { %6124 = vrot.lane.b32.xlu1 %v6778_v62, %s6442_s27 }
 0x6c1   :  { %883 = vrot.lane.b32.xlu1 %v6649_v2, %s7720_s24 }
 0x700   :  { %v786_v29 = vpop.xlane.xlu1 %785 }
 0x701   :  { %6257 = vrcp.f32 %v786_v29 }
 0x704   :  { %v789_v31 = vpop.xlane.xlu0 %788  ;;  %v6110_v32 = vpop.permute.xlu1 %6109 }
 0x705   :  { %v6112_v34 = vunpack.i.h.bf16 %v6110_v32  ;;  %v6111_v59 = vunpack.i.l.bf16 %v6110_v32 }
 0x707   :  { %v5782_v30 = vpack.c.bf16 %v6112_v34, %v6111_v59 }
 0x708   :  { %v583_v35 = vpop.xlane.xlu0 %582 }
 0x709   :  { %5783 = vmatprep.subr.bf16.mxu1 %v5782_v30  ;;  %6259 = vrcp.f32 %v583_v35 }
 0x70a   :  { %5785 = vmatpush3.bf16.msra.mxu1 %v5782_v30 }
 0x70b   :  { %v6258_v44 = vpop.eup %6257 }
 0x70c   :  { %v6115_v6 = vpop.permute.xlu0 %6114  ;;  %v792_v55 = vmul.f32 %v6258_v44, %v6250_v19  ;;  %v6814_v19 = vrot.slane %v6676_v14, %v6638_v60 }
 0x70d   :  { %v6117_v36 = vunpack.i.h.bf16 %v6115_v6  ;;  %v6116_v41 = vunpack.i.l.bf16 %v6115_v6 }
 0x70f   :  { %v5792_v42 = vpack.c.bf16 %v6117_v36, %v6116_v41 }
 0x710   :  { %v882_v63 = vpop.permute.xlu0 %881 }
 0x711   :  { %5793 = vmatprep.subr.bf16.mxu1 %v5792_v42 }
 0x713   :  { %v6260_v45 = vpop.eup %6259 }
 0x714   :  { %v587_v0 = vmul.f32 %v6260_v45, %v6254_v23 }
 0x735   :  { %v580_v43 = vpop.xlane.xlu1 %579 }
 0x736   :  { %6261 = vrcp.f32 %v580_v43 }
 0x737   :  { %6263 = vrcp.f32 %v789_v31 }
 0x739   :  { %v6120_v2 = vpop.permute.xlu1 %6119 }
 0x73a   :  { %v6122_v49 = vunpack.i.h.bf16 %v6120_v2  ;;  %v6121_v50 = vunpack.i.l.bf16 %v6120_v2 }
 0x73c   :  { %v5796_v56 = vpack.c.bf16 %v6122_v49, %v6121_v50 }
 0x73d   :  { %v6125_v58 = vpop.permute.xlu1 %6124 }
 0x73e   :  { %v6127_v1 = vunpack.i.h.bf16 %v6125_v58  ;;  %v6126_v3 = vunpack.i.l.bf16 %v6125_v58 }
 0x740   :  { %v6262_v47 = vpop.eup %6261  ;;  %v5806_v4 = vpack.c.bf16 %v6127_v1, %v6126_v3 }
 0x741   :  { %v586_v52 = vmul.f32 %v6262_v47, %v6256_v48  ;;  %v6264_v53 = vpop.eup %6263  ;;  %v884_v5 = vpop.permute.xlu1 %883 }
 0x742   :  { %v793_v61 = vmul.f32 %v6264_v53, %v6252_v21 }
 0x743   :  { %5368 = vmatprep.mubr.msk.f32.mxu1 %vm276_vm1, %v586_v52 }
 0x744   :  { %5369 = vmatmul.mubr.msk.f32.vlgmr.msra.gmra.mrb[6].mxu1 %vm276_vm1, %v587_v0 }
 0x745   :  { %5795 = vmatpush3.bf16.msra.mxu1 %v5792_v42  ;;  %5382 = vmatprep.mubr.msk.f32.mxu1 %vm276_vm1, %v792_v55 }
 0x746   :  { %5798 = vmatprep.subr.msk.bf16.mxu1 %vm6663_vm2, %v5796_v56 }
 0x748   :  { %5383 = vmatmul.mubr.msk.f32.vlgmr.msra.gmra.mrb[8].mxu1 %vm276_vm1, %v793_v61 }
 0x749   :  { %5389 = vmatprep.mubr.msk.f32.mxu1 %vm276_vm1, %v882_v63 }
 0x74e   :  { %5801 = vmatpush3.bf16.xpose.msk.msra.mxu1 %vm6663_vm2, %v5796_v56 }
 0x74f   :  { %5808 = vmatprep.subr.msk.bf16.mxu1 %vm6663_vm2, %v5806_v4 }
 0x755   :  { %5390 = vmatmul.mubr.msk.f32.vlgmr.msra.gmra.mrb[10].mxu1 %vm276_vm1, %v884_v5 }
 0x756   :  { %5811 = vmatpush3.bf16.xpose.msk.msra.mxu1 %vm6663_vm2, %v5806_v4  ;;  %5403 = vmatprep.mubr.msk.f32.mxu1 %vm276_vm1, %v6772_v28 }
 0x757   :  { %5813 = vmatprep.subr.bf16.mxu1 %v6741_v37 }
 0x75d   :  { %5404 = vmatmul.mubr.msk.f32.vlgmr.msra.gmra.mrb[12].mxu1 %vm276_vm1, %v6768_v27 }
 0x75e   :  { %5815 = vmatpush3.bf16.msra.mxu1 %v6741_v37 }
 0x817   :  { %v6804_v7 = vpop.f32.mrb[6].mxu1 }
 0x818   :  { %v6806_v9 = vpop.f32.mrb[7].mxu1 }
 0x81b   :  { %v6808_v10 = vpop.f32.mrb[8].mxu1 }
 0x81c   :  { %v6810_v13 = vpop.f32.mrb[9].mxu1 }
 0x828   :  { %v5391_v16 = vpop.f32.mrb[10].mxu1 }
 0x829   :  { %v963_v18 = vpop.f32.mrb[11].mxu1  ;;  %v973_v45 = vmul.f32 0.25, %v5391_v16 }
 0x82a   :  { %v972_v14 = vmul.f32 0.25, %v963_v18 }
 0x82b   :  { %v975_v47 = vadd.f32 %v973_v45, %v6680_v15 }
 0x82c   :  { %v974_v48 = vadd.f32 %v972_v14, %v6680_v15 }
 0x82d   :  { %v979_v49 = vsel %vm276_vm1, %v975_v47, -inf }
 0x82e   :  { %v976_v26 = vsel %vm276_vm1, %v974_v48, -inf }
 0x830   :  { %v5405_v20 = vpop.f32.mrb[12].mxu1 }
 0x831   :  { %v1207_v21 = vmul.f32 0.25, %v5405_v20  ;;  %v1197_v22 = vpop.f32.mrb[13].mxu1 }
 0x832   :  { %v1206_v23 = vmul.f32 0.25, %v1197_v22 }
 0x833   :  { %v1213_v37 = vadd.f32 %v6814_v19, %v1207_v21 }
 0x834   :  { %v1212_v24 = vadd.f32 %v6814_v19, %v1206_v23 }
 0x835   :  { %v1217_v25 = vsel %vm276_vm1, %v1213_v37, -inf }
 0x836   :  { %1218 = vmax.xlane.f32.xlu1 %v1217_v25  ;;  %v1214_v46 = vsel %vm276_vm1, %v1212_v24, -inf }
 0x837   :  { %1215 = vmax.xlane.f32.xlu0 %v1214_v46 }
 0x847   :  { %6129 = vrot.lane.b32.xlu1 %v6778_v62, %s6443_s29 }
 0x84b   :  { %1319 = vrot.lane.b32.xlu1 %v6768_v27, %s6444_s22 }
 0x86f   :  { %977 = vmax.xlane.f32.xlu1 %v976_v26 }
 0x8c3   :  { %v1219_v29 = vpop.xlane.xlu1 %1218 }
 0x8c4   :  { %v1221_v31 = vsub.f32 %v1213_v37, %v1219_v29  ;;  %v1216_v32 = vpop.xlane.xlu0 %1215 }
 0x8c5   :  { %v1220_v34 = vsub.f32 %v1212_v24, %v1216_v32 }
 0x8c6   :  { %v1224_v59 = vmul.f32 1.442695, %v1221_v31 }
 0x8c7   :  { %v1222_v30 = vmul.f32 1.442695, %v1220_v34  ;;  %v6130_v35 = vpop.permute.xlu1 %6129 }
 0x8c8   :  { %v6132_v6 = vunpack.i.h.bf16 %v6130_v35  ;;  %v6131_v36 = vunpack.i.l.bf16 %v6130_v35 }
 0x8c9   :  { %6265 = vpow2.f32 %v1222_v30 }
 0x8ca   :  { %v5816_v41 = vpack.c.bf16 %v6132_v6, %v6131_v36  ;;  %6267 = vpow2.f32 %v1224_v59 }
 0x8cb   :  { %v1320_v61 = vpop.permute.xlu1 %1319 }
 0x8cc   :  { %5818 = vmatprep.subr.msk.bf16.mxu1 %vm6663_vm2, %v5816_v41 }
 0x8d3   :  { %v6266_v42 = vpop.eup %6265 }
 0x8d4   :  { %v1226_v43 = vsel %vm276_vm1, %v6266_v42, 0.0  ;;  %v6268_v2 = vpop.eup %6267 }
 0x8d5   :  { %1227 = vadd.xlane.f32.xlu0 %v1226_v43  ;;  %v1229_v44 = vsel %vm276_vm1, %v6268_v2, 0.0 }
 0x8d9   :  { %1230 = vadd.xlane.f32.xlu0 %v1229_v44 }
 0x8ef   :  { %1317 = vrot.lane.b32.xlu0 %v6772_v28, %s6444_s22 }
 0x8fc   :  { %v978_v1 = vpop.xlane.xlu1 %977 }
 0x8fd   :  { %v982_v4 = vsub.f32 %v974_v48, %v978_v1 }
 0x8ff   :  { %v984_v18 = vmul.f32 1.442695, %v982_v4 }
 0x90e   :  { %980 = vmax.xlane.f32.xlu0 %v979_v49 }
 0x962   :  { %v1228_v50 = vpop.xlane.xlu0 %1227 }
 0x963   :  { %6269 = vrcp.f32 %v1228_v50 }
 0x966   :  { %v1231_v52 = vpop.xlane.xlu0 %1230 }
 0x967   :  { %6271 = vrcp.f32 %v1231_v52 }
 0x96a   :  { %v1318_v58 = vpop.permute.xlu0 %1317 }
 0x96d   :  { %v6270_v0 = vpop.eup %6269 }
 0x96e   :  { %v1234_v53 = vmul.f32 %v6270_v0, %v6266_v42 }
 0x970   :  { %5410 = vmatprep.mubr.msk.f32.mxu1 %vm276_vm1, %v1234_v53 }
 0x971   :  { %v6272_v55 = vpop.eup %6271 }
 0x972   :  { %v1235_v56 = vmul.f32 %v6272_v55, %v6268_v2 }
 0x974   :  { %5411 = vmatmul.mubr.msk.f32.vlgmr.msra.gmra.mrb[14].mxu1 %vm276_vm1, %v1235_v56 }
 0x975   :  { %5821 = vmatpush3.bf16.xpose.msk.msra.mxu1 %vm6663_vm2, %v5816_v41  ;;  %5417 = vmatprep.mubr.msk.f32.mxu1 %vm276_vm1, %v1318_v58 }
 0x97c   :  { %5418 = vmatmul.mubr.msk.f32.vlgmr.msra.gmra.mrb[16].mxu1 %vm276_vm1, %v1320_v61 }
 0x99b   :  { %v981_v63 = vpop.xlane.xlu0 %980 }
 0x99c   :  { %v983_v3 = vsub.f32 %v975_v47, %v981_v63 }
 0x99e   :  { %v986_v5 = vmul.f32 1.442695, %v983_v3 }
 0x9a0   :  { %6273 = vpow2.f32 %v986_v5 }
 0x9a1   :  { %6275 = vpow2.f32 %v984_v18 }
 0x9aa   :  { %v6274_v14 = vpop.eup %6273 }
 0x9ab   :  { %v6276_v26 = vpop.eup %6275  ;;  %v991_v29 = vsel %vm276_vm1, %v6274_v14, 0.0 }
 0x9ac   :  { %v988_v31 = vsel %vm276_vm1, %v6276_v26, 0.0 }
 0xa47   :  { %v6840_v16 = vpop.f32.mrb[14].mxu1 }
 0xa48   :  { %v6842_v20 = vpop.f32.mrb[15].mxu1 }
 0xa4f   :  { %v5419_v21 = vpop.f32.mrb[16].mxu1 }
 0xa50   :  { %v1409_v22 = vmul.f32 0.25, %v5419_v21  ;;  %v1399_v23 = vpop.f32.mrb[17].mxu1 }
 0xa51   :  { %v1408_v37 = vmul.f32 0.25, %v1399_v23 }
 0xa52   :  { %v1411_v24 = vadd.f32 %v1409_v22, %v6814_v19 }
 0xa53   :  { %v1410_v25 = vadd.f32 %v1408_v37, %v6814_v19 }
 0xa54   :  { %v1415_v46 = vsel %vm276_vm1, %v1411_v24, -inf }
 0xa55   :  { %1416 = vmax.xlane.f32.xlu1 %v1415_v46  ;;  %v1412_v48 = vsel %vm276_vm1, %v1410_v25, -inf }
 0xa56   :  { %1413 = vmax.xlane.f32.xlu0 %v1412_v48 }
 0xa59   :  { %992 = vadd.xlane.f32.xlu1 %v991_v29 }
 0xa5a   :  { %989 = vadd.xlane.f32.xlu0 %v988_v31 }
 0xae2   :  { %v1417_v32 = vpop.xlane.xlu1 %1416 }
 0xae3   :  { %v1419_v34 = vsub.f32 %v1411_v24, %v1417_v32  ;;  %v1414_v59 = vpop.xlane.xlu0 %1413 }
 0xae4   :  { %v1418_v30 = vsub.f32 %v1410_v25, %v1414_v59 }
 0xae5   :  { %v1422_v35 = vmul.f32 1.442695, %v1419_v34 }
 0xae6   :  { %v1420_v6 = vmul.f32 1.442695, %v1418_v30  ;;  %v993_v47 = vpop.xlane.xlu1 %992 }
 0xae7   :  { %6277 = vpow2.f32 %v1422_v35  ;;  %v990_v36 = vpop.xlane.xlu0 %989 }
 0xae8   :  { %6279 = vpow2.f32 %v1420_v6 }
 0xae9   :  { %6281 = vrcp.f32 %v990_v36 }
 0xaea   :  { %6283 = vrcp.f32 %v993_v47 }
 0xaf1   :  { %v6278_v41 = vpop.eup %6277 }
 0xaf2   :  { %v6280_v42 = vpop.eup %6279  ;;  %v1427_v43 = vsel %vm276_vm1, %v6278_v41, 0.0 }
 0xaf3   :  { %1428 = vadd.xlane.f32.xlu1 %v1427_v43  ;;  %v1424_v2 = vsel %vm276_vm1, %v6280_v42, 0.0  ;;  %v6282_v44 = vpop.eup %6281 }
 0xaf4   :  { %1425 = vadd.xlane.f32.xlu0 %v1424_v2  ;;  %v996_v45 = vmul.f32 %v6282_v44, %v6276_v26  ;;  %v6284_v63 = vpop.eup %6283 }
 0xaf5   :  { %v997_v18 = vmul.f32 %v6284_v63, %v6274_v14 }
 0xaf6   :  { %5396 = vmatprep.mubr.msk.f32.mxu0 %vm276_vm1, %v996_v45 }
 0xb04   :  { %6139 = vrot.lane.b32.xlu1 %v6743_v38, %s6444_s22 }
 0xb08   :  { %6144 = vrot.lane.b32.xlu1 %v6778_v62, %s6445_s2 }
 0xb0a   :  { %6134 = vrot.lane.b32.xlu0 %v6657_v8, %s7720_s24 }
 0xb0c   :  { %1525 = vrot.lane.b32.xlu1 %v6768_v27, %s6446_s23 }
 0xb0e   :  { %1523 = vrot.lane.b32.xlu0 %v6772_v28, %s6446_s23 }
 0xb80   :  { %v1429_v49 = vpop.xlane.xlu1 %1428 }
 0xb81   :  { %v1426_v50 = vpop.xlane.xlu0 %1425 }
 0xb82   :  { %6285 = vrcp.f32 %v1426_v50 }
 0xb83   :  { %6287 = vrcp.f32 %v1429_v49 }
 0xb84   :  { %v6140_v52 = vpop.permute.xlu1 %6139 }
 0xb85   :  { %v6135_v0 = vpop.permute.xlu0 %6134  ;;  %v6142_v53 = vunpack.i.h.bf16 %v6140_v52  ;;  %v6141_v55 = vunpack.i.l.bf16 %v6140_v52 }
 0xb86   :  { %v6137_v56 = vunpack.i.h.bf16 %v6135_v0  ;;  %v6136_v58 = vunpack.i.l.bf16 %v6135_v0 }
 0xb87   :  { %v5822_v4 = vpack.c.bf16 %v6142_v53, %v6141_v55 }
 0xb88   :  { %v6145_v61 = vpop.permute.xlu1 %6144  ;;  %v5802_v8 = vpack.c.bf16 %v6137_v56, %v6136_v58 }
 0xb89   :  { %v6147_v1 = vunpack.i.h.bf16 %v6145_v61  ;;  %v6146_v3 = vunpack.i.l.bf16 %v6145_v61  ;;  %v1524_v24 = vpop.permute.xlu0 %1523 }
 0xb8a   :  { %5803 = vmatprep.subr.bf16.mxu0 %v5802_v8 }
 0xb8b   :  { %5805 = vmatpush3.bf16.msra.mxu0 %v5802_v8  ;;  %v5826_v23 = vpack.c.bf16 %v6147_v1, %v6146_v3 }
 0xb8c   :  { %v6286_v5 = vpop.eup %6285  ;;  %5823 = vmatprep.subr.bf16.mxu0 %v5822_v4  ;;  %v1526_v25 = vpop.permute.xlu1 %1525 }
 0xb8d   :  { %v6288_v21 = vpop.eup %6287  ;;  %v1432_v22 = vmul.f32 %v6286_v5, %v6280_v42 }
 0xb8e   :  { %5397 = vmatmul.mubr.msk.f32.vlgmr.msra.gmra.mrb[10].mxu0 %vm276_vm1, %v997_v18  ;;  %v1433_v37 = vmul.f32 %v6288_v21, %v6278_v41 }
 0xb8f   :  { %5825 = vmatpush3.bf16.msra.mxu0 %v5822_v4  ;;  %5424 = vmatprep.mubr.msk.f32.mxu0 %vm276_vm1, %v1432_v22 }
 0xb90   :  { %5828 = vmatprep.subr.msk.bf16.mxu0 %vm6663_vm2, %v5826_v23 }
 0xb92   :  { %5425 = vmatmul.mubr.msk.f32.vlgmr.msra.gmra.mrb[12].mxu0 %vm276_vm1, %v1433_v37 }
 0xb93   :  { %5431 = vmatprep.mubr.msk.f32.mxu0 %vm276_vm1, %v1524_v24 }
 0xb98   :  { %5831 = vmatpush3.bf16.xpose.msk.msra.mxu0 %vm6663_vm2, %v5826_v23 }
 0xb9f   :  { %5432 = vmatmul.mubr.msk.f32.vlgmr.msra.gmra.mrb[14].mxu0 %vm276_vm1, %v1526_v25 }
 0xc61   :  { %v6872_v46 = vpop.f32.mrb[10].mxu0 }
 0xc62   :  { %v6874_v14 = vpop.f32.mrb[11].mxu0 }
 0xc65   :  { %v6876_v48 = vpop.f32.mrb[12].mxu0 }
 0xc66   :  { %v6878_v26 = vpop.f32.mrb[13].mxu0 }
 0xc72   :  { %v5433_v29 = vpop.f32.mrb[14].mxu0 }
 0xc73   :  { %v1615_v31 = vmul.f32 0.25, %v5433_v29  ;;  %v1605_v32 = vpop.f32.mrb[15].mxu0 }
 0xc74   :  { %v1614_v34 = vmul.f32 0.25, %v1605_v32 }
 0xc75   :  { %v1617_v59 = vadd.f32 %v1615_v31, %v6814_v19 }
 0xc76   :  { %v1616_v30 = vadd.f32 %v1614_v34, %v6814_v19 }
 0xc77   :  { %v1621_v35 = vsel %vm276_vm1, %v1617_v59, -inf }
 0xc78   :  { %1622 = vmax.xlane.f32.xlu1 %v1621_v35  ;;  %v1618_v6 = vsel %vm276_vm1, %v1616_v30, -inf }
 0xc79   :  { %1619 = vmax.xlane.f32.xlu0 %v1618_v6 }
 0xc89   :  { %6149 = vrot.lane.b32.xlu1 %v6743_v38, %s6446_s23 }
 0xc8d   :  { %1727 = vrot.lane.b32.xlu1 %v6772_v28, %s7720_s24 }
 0xc91   :  { %1729 = vrot.lane.b32.xlu1 %v6768_v27, %s7720_s24 }
 0xd05   :  { %v1623_v36 = vpop.xlane.xlu1 %1622 }
 0xd06   :  { %v1625_v41 = vsub.f32 %v1617_v59, %v1623_v36  ;;  %v1620_v42 = vpop.xlane.xlu0 %1619 }
 0xd07   :  { %v1624_v43 = vsub.f32 %v1616_v30, %v1620_v42 }
 0xd08   :  { %v1628_v2 = vmul.f32 1.442695, %v1625_v41 }
 0xd09   :  { %v1626_v44 = vmul.f32 1.442695, %v1624_v43  ;;  %v6150_v45 = vpop.permute.xlu1 %6149 }
 0xd0a   :  { %6289 = vpow2.f32 %v1628_v2  ;;  %v6152_v47 = vunpack.i.h.bf16 %v6150_v45  ;;  %v6151_v49 = vunpack.i.l.bf16 %v6150_v45  ;;  %v1961_v2 = vld [vmem:[%s7706_s6] sm:$0xff] }
 0xd0b   :  { %6291 = vpow2.f32 %v1626_v44  ;;  %v1962_v44 = vld [vmem:[%s7706_s6 + $0x8] sm:$0xff] }
 0xd0c   :  { %v5832_v50 = vpack.c.bf16 %v6152_v47, %v6151_v49  ;;  %v5846_v45 = vpack.c.bf16 %v1962_v44, %v1961_v2 }
 0xd0d   :  { %v1728_v5 = vpop.permute.xlu1 %1727 }
 0xd0e   :  { %5833 = vmatprep.subr.bf16.mxu1 %v5832_v50 }
 0xd0f   :  { %5835 = vmatpush3.bf16.msra.mxu1 %v5832_v50 }
 0xd14   :  { %v6290_v52 = vpop.eup %6289 }
 0xd15   :  { %v1633_v28 = vsel %vm276_vm1, %v6290_v52, 0.0  ;;  %v6292_v0 = vpop.eup %6291 }
 0xd16   :  { %1634 = vadd.xlane.f32.xlu0 %v1633_v28  ;;  %v1630_v27 = vsel %vm276_vm1, %v6292_v0, 0.0 }
 0xd1a   :  { %1631 = vadd.xlane.f32.xlu0 %v1630_v27 }
 0xd30   :  { %6154 = vrot.lane.b32.xlu0 %v6778_v62, %s6448_s25  ;;  %v1730_v62 = vpop.permute.xlu1 %1729 }
 0xda3   :  { %v1635_v53 = vpop.xlane.xlu0 %1634 }
 0xda4   :  { %6293 = vrcp.f32 %v1635_v53 }
 0xda7   :  { %v1632_v55 = vpop.xlane.xlu0 %1631 }
 0xda8   :  { %6295 = vrcp.f32 %v1632_v55 }
 0xdab   :  { %v6155_v56 = vpop.permute.xlu0 %6154 }
 0xdac   :  { %v6157_v58 = vunpack.i.h.bf16 %v6155_v56  ;;  %v6156_v61 = vunpack.i.l.bf16 %v6155_v56 }
 0xdae   :  { %v5836_v8 = vpack.c.bf16 %v6157_v58, %v6156_v61  ;;  %v6294_v63 = vpop.eup %6293  ;;  %v1966_v61 = vld [vmem:[%s7706_s6 + $0x28] sm:$0xff] }
 0xdaf   :  { %v1639_v4 = vmul.f32 %v6294_v63, %v6290_v52 }
 0xdb0   :  { %5838 = vmatprep.subr.msk.bf16.mxu1 %vm6663_vm2, %v5836_v8 }
 0xdb2   :  { %v6296_v1 = vpop.eup %6295 }
 0xdb3   :  { %v1638_v3 = vmul.f32 %v6296_v1, %v6292_v0  ;;  %v1967_v1 = vld [vmem:[%s7706_s6 + $0x30] sm:$0xff] }
 0xdb5   :  { %5438 = vmatprep.mubr.msk.f32.mxu1 %vm276_vm1, %v1638_v3  ;;  %v1968_v3 = vld [vmem:[%s7706_s6 + $0x38] sm:$0xff] }
 0xdb6   :  { %5439 = vmatmul.mubr.msk.f32.vlgmr.msra.gmra.mrb[18].mxu1 %vm276_vm1, %v1639_v4 }
 0xdb7   :  { %5841 = vmatpush3.bf16.xpose.msk.msra.mxu1 %vm6663_vm2, %v5836_v8  ;;  %5445 = vmatprep.mubr.msk.f32.mxu1 %vm276_vm1, %v1728_v5  ;;  %v5858_v5 = vpack.c.bf16 %v1968_v3, %v1967_v1  ;;  %v7016_v3 = vld [vmem:[%s7708_s8] ss:$0 sm:$0xff] }
 0xdbe   :  { %5446 = vmatmul.mubr.msk.f32.vlgmr.msra.gmra.mrb[20].mxu1 %vm276_vm1, %v1730_v62 }
 0xe89   :  { %v5440_v18 = vpop.f32.mrb[18].mxu1 }
 0xe8a   :  { %v1718_v21 = vpop.f32.mrb[19].mxu1 }
 0xe91   :  { %v5447_v22 = vpop.f32.mrb[20].mxu1 }
 0xe92   :  { %v1819_v23 = vmul.f32 0.25, %v5447_v22  ;;  %v1809_v37 = vpop.f32.mrb[21].mxu1 }
 0xe93   :  { %v1818_v24 = vmul.f32 0.25, %v1809_v37 }
 0xe94   :  { %v1821_v25 = vadd.f32 %v1819_v23, %v6814_v19 }
 0xe95   :  { %v1820_v29 = vadd.f32 %v1818_v24, %v6814_v19  ;;  %v6969_v24 = vld [vmem:[%s7707_s7] ss:$0 sm:$0xff] }
 0xe96   :  { %v1825_v31 = vsel %vm276_vm1, %v1821_v25, -inf }
 0xe97   :  { %1826 = vmax.xlane.f32.xlu1 %v1825_v31  ;;  %v1822_v32 = vsel %vm276_vm1, %v1820_v29, -inf }
 0xe98   :  { %1823 = vmax.xlane.f32.xlu0 %v1822_v32 }
 0xea8   :  { %6159 = vrot.lane.b32.xlu1 %v6743_v38, %s7720_s24 }
 0xeac   :  { %1089 = vrot.lane.b32.xlu1 %v6804_v7, %s6448_s25 }
 0xeb0   :  { %1095 = vrot.lane.b32.xlu1 %v6810_v13, %s6445_s2 }
 0xeb4   :  { %1103 = vrot.lane.b32.xlu1 %v6874_v14, %s6443_s29 }
 0xeb8   :  { %1933 = vrot.lane.b32.xlu1 %v6878_v26, %s6448_s25 }
 0xebc   :  { %1941 = vrot.lane.b32.xlu1 %v1718_v21, %s6445_s2 }
 0xf24   :  { %v1827_v34 = vpop.xlane.xlu1 %1826 }
 0xf25   :  { %v1829_v59 = vsub.f32 %v1821_v25, %v1827_v34  ;;  %v1824_v30 = vpop.xlane.xlu0 %1823 }
 0xf26   :  { %v1828_v35 = vsub.f32 %v1820_v29, %v1824_v30 }
 0xf27   :  { %v1832_v6 = vmul.f32 1.442695, %v1829_v59 }
 0xf28   :  { %v1830_v38 = vmul.f32 1.442695, %v1828_v35  ;;  %v6160_v36 = vpop.permute.xlu1 %6159 }
 0xf29   :  { %v6162_v41 = vunpack.i.h.bf16 %v6160_v36  ;;  %v6161_v7 = vunpack.i.l.bf16 %v6160_v36 }
 0xf2a   :  { %6297 = vpow2.f32 %v1830_v38 }
 0xf2b   :  { %v5842_v42 = vpack.c.bf16 %v6162_v41, %v6161_v7  ;;  %6299 = vpow2.f32 %v1832_v6 }
 0xf2c   :  { %v1090_v49 = vpop.permute.xlu1 %1089 }
 0xf2d   :  { %5843 = vmatprep.subr.bf16.mxu0 %v5842_v42 }
 0xf2e   :  { %5845 = vmatpush3.bf16.msra.mxu0 %v5842_v42 }
 0xf2f   :  { %5847 = vmatprep.subr.bf16.mxu0 %v5846_v45 }
 0xf30   :  { %v1096_v28 = vpop.permute.xlu1 %1095 }
 0xf34   :  { %v6298_v13 = vpop.eup %6297  ;;  %v1104_v58 = vpop.permute.xlu1 %1103 }
 0xf35   :  { %v1834_v14 = vsel %vm276_vm1, %v6298_v13, 0.0  ;;  %v6300_v26 = vpop.eup %6299 }
 0xf36   :  { %1835 = vadd.xlane.f32.xlu0 %v1834_v14  ;;  %v1837_v43 = vsel %vm276_vm1, %v6300_v26, 0.0 }
 0xf38   :  { %v1934_v35 = vpop.permute.xlu1 %1933 }
 0xf39   :  { %v1955_v36 = vsel %vm276_vm1, %v6842_v20, %v1934_v35 }
 0xf3a   :  { %1838 = vadd.xlane.f32.xlu0 %v1837_v43 }
 0xf3c   :  { %v1942_v38 = vpop.permute.xlu1 %1941 }
 0xf3d   :  { %v1957_v41 = vsel %vm1111_vm3, %v1955_v36, %v1942_v38  ;;  %v2285_v38 = vld [vmem:[%s7712_s12 + $0x10] sm:$0xff] }
 0xf50   :  { %1087 = vrot.lane.b32.xlu0 %v6806_v9, %s6448_s25 }
 0xf54   :  { %1097 = vrot.lane.b32.xlu0 %v6808_v10, %s6445_s2 }
 0xf58   :  { %1105 = vrot.lane.b32.xlu0 %v6872_v46, %s6443_s29  ;;  %v1963_v46 = vld [vmem:[%s7706_s6 + $0x10] sm:$0xff] }
 0xf5c   :  { %1935 = vrot.lane.b32.xlu0 %v6876_v48, %s6448_s25  ;;  %v1964_v48 = vld [vmem:[%s7706_s6 + $0x18] sm:$0xff] }
 0xf5d   :  { %v5850_v56 = vpack.c.bf16 %v1964_v48, %v1963_v46  ;;  %v2154_v46 = vld [vmem:[%s7710_s10 + $0x18] sm:$0xff] }
 0xf60   :  { %1943 = vrot.lane.b32.xlu0 %v5440_v18, %s6445_s2  ;;  %v1110_v18 = vsel %vm276_vm1, %v6745_v39, %v1090_v49 }
 0xfc3   :  { %v1836_v9 = vpop.xlane.xlu0 %1835 }
 0xfc4   :  { %6301 = vrcp.f32 %v1836_v9 }
 0xfc7   :  { %v1839_v47 = vpop.xlane.xlu0 %1838 }
 0xfc8   :  { %6303 = vrcp.f32 %v1839_v47 }
 0xfcb   :  { %v1088_v50 = vpop.permute.xlu0 %1087 }
 0xfcc   :  { %v1109_v10 = vsel %vm276_vm1, %v6747_v40, %v1088_v50  ;;  %v1965_v40 = vld [vmem:[%s7706_s6 + $0x20] sm:$0xff] }
 0xfcd   :  { %v1112_v53 = vsel %vm1111_vm3, %v1109_v10, %v1096_v28  ;;  %v5854_v63 = vpack.c.bf16 %v1966_v61, %v1965_v40  ;;  %v2152_v28 = vld [vmem:[%s7710_s10 + $0x8] sm:$0xff] }
 0xfce   :  { %v6302_v52 = vpop.eup %6301  ;;  %v1115_v8 = vsel %vm1114_vm4, %v1112_v53, %v1104_v58  ;;  %v2156_v53 = vld [vmem:[%s7710_s10 + $0x28] sm:$0xff]  ;;  %v2158_v58 = vld [vmem:[%s7710_s10 + $0x38] sm:$0xff] }
 0xfcf   :  { %v1842_v0 = vmul.f32 %v6302_v52, %v6298_v13  ;;  %v1098_v4 = vpop.permute.xlu0 %1097  ;;  %v2151_v52 = vld [vmem:[%s7710_s10] sm:$0xff] }
 0xfd0   :  { %v1113_v21 = vsel %vm1111_vm3, %v1110_v18, %v1098_v4  ;;  %v5862_v10 = vpack.c.bf16 %v2152_v28, %v2151_v52  ;;  %v2298_v52 = vld [vmem:[%s7712_s12 + $0x78] sm:$0xff] }
 0xfd1   :  { %5452 = vmatprep.mubr.msk.f32.mxu0 %vm276_vm1, %v1842_v0  ;;  %v2153_v0 = vld [vmem:[%s7710_s10 + $0x10] sm:$0xff] }
 0xfd2   :  { %v6304_v27 = vpop.eup %6303  ;;  %5863 = vmatprep.subr.bf16.mxu1 %v5862_v10  ;;  %v5866_v48 = vpack.c.bf16 %v2154_v46, %v2153_v0 }
 0xfd3   :  { %v1843_v55 = vmul.f32 %v6304_v27, %v6300_v26  ;;  %v1106_v62 = vpop.permute.xlu0 %1105  ;;  %5865 = vmatpush3.bf16.msra.mxu1 %v5862_v10  ;;  %v2155_v27 = vld [vmem:[%s7710_s10 + $0x20] sm:$0xff] }
 0xfd4   :  { %v1116_v22 = vsel %vm1114_vm4, %v1113_v21, %v1106_v62  ;;  %5867 = vmatprep.subr.bf16.mxu1 %v5866_v48 }
 0xfd5   :  { %5453 = vmatmul.mubr.msk.f32.vlgmr.msra.gmra.mrb[16].mxu0 %vm276_vm1, %v1843_v55  ;;  %v5870_v55 = vpack.c.bf16 %v2156_v53, %v2155_v27 }
 0xfd6   :  { %5849 = vmatpush3.bf16.msra.mxu0 %v5846_v45  ;;  %5471 = vmatprep.mubr.msk.f32.mxu0 %vm67_vm0, %v1115_v8 }
 0xfd7   :  { %5851 = vmatprep.subr.bf16.mxu0 %v5850_v56  ;;  %v1936_v6 = vpop.permute.xlu0 %1935  ;;  %5869 = vmatpush3.bf16.msra.mxu1 %v5866_v48 }
 0xfd8   :  { %5871 = vmatprep.subr.bf16.mxu1 %v5870_v55 }
 0xfda   :  { %5853 = vmatpush3.bf16.msra.mxu0 %v5850_v56  ;;  %v2157_v56 = vld [vmem:[%s7710_s10 + $0x30] sm:$0xff] }
 0xfdb   :  { %5855 = vmatprep.subr.bf16.mxu0 %v5854_v63  ;;  %5873 = vmatpush3.bf16.msra.mxu1 %v5870_v55  ;;  %v5874_v40 = vpack.c.bf16 %v2158_v58, %v2157_v56 }
 0xfdd   :  { %5875 = vmatprep.subr.bf16.mxu1 %v5874_v40 }
 0xfde   :  { %5857 = vmatpush3.bf16.msra.mxu0 %v5854_v63 }
 0xfdf   :  { %5859 = vmatprep.subr.bf16.mxu0 %v5858_v5  ;;  %5877 = vmatpush3.bf16.msra.mxu1 %v5874_v40 }
 0xfe2   :  { %5861 = vmatpush3.bf16.msra.mxu0 %v5858_v5  ;;  %v7021_v5 = vld [vmem:[%s7709_s9] ss:$0 sm:$0xff] }
 0xfe5   :  { %5472 = vmatmul.mubr.msk.f32.vlgmr.msra.gmra.mrb[18].mxu0 %vm67_vm0, %v1116_v22 }
0x10a8   :  { %v5454_v23 = vpop.f32.mrb[16].mxu0 }
0x10a9   :  { %v1922_v37 = vpop.f32.mrb[17].mxu0 }
0x10aa   :  { %1949 = vrot.lane.b32.xlu1 %v1922_v37, %s6443_s29 }
0x10ae   :  { %1951 = vrot.lane.b32.xlu1 %v5454_v23, %s6443_s29 }
0x10b8   :  { %v5473_v25 = vpop.f32.mrb[18].mxu0 }
0x10b9   :  { %v2054_v39 = vpop.f32.mrb[19].mxu0  ;;  %v2060_v34 = vadd.f32 %v5473_v25, %v6969_v24 }
0x10ba   :  { %v2055_v29 = vadd.f32 %v6969_v24, %v2054_v39 }
0x10bb   :  { %v2074_v59 = vadd.f32 %v2060_v34, %v6625_v54  ;;  %v1956_v54 = vsel %vm276_vm1, %v6840_v16, %v1936_v6 }
0x10bc   :  { %v2073_v31 = vadd.f32 %v2055_v29, %v6618_v51  ;;  %v1944_v51 = vpop.permute.xlu0 %1943 }
0x10bd   :  { %v2082_v30 = vsel %vm67_vm0, %v2074_v59, 0.0  ;;  %v1958_v13 = vsel %vm1111_vm3, %v1956_v54, %v1944_v51  ;;  %v2287_v51 = vld [vmem:[%s7712_s12 + $0x20] sm:$0xff] }
0x10be   :  { %v2079_v32 = vsel %vm67_vm0, %v2073_v31, 0.0 }
0x10bf   :  { %2080 = vadd.xlane.f32.xlu0 %v2079_v32 }
0x10d2   :  { %2083 = vadd.xlane.f32.xlu1 %v2082_v30 }
0x111c   :  { %v1950_v7 = vpop.permute.xlu1 %1949 }
0x111d   :  { %v1959_v42 = vsel %vm1114_vm4, %v1957_v41, %v1950_v7  ;;  %v2286_v41 = vld [vmem:[%s7712_s12 + $0x18] sm:$0xff] }
0x111e   :  { %5474 = vmatprep.mubr.msk.f32.mxu0 %vm67_vm0, %v1959_v42  ;;  %v5882_v7 = vpack.c.bf16 %v2286_v41, %v2285_v38  ;;  %v2288_v42 = vld [vmem:[%s7712_s12 + $0x28] sm:$0xff] }
0x111f   :  { %v5886_v54 = vpack.c.bf16 %v2288_v42, %v2287_v51 }
0x1120   :  { %v1952_v14 = vpop.permute.xlu1 %1951 }
0x1121   :  { %v1960_v26 = vsel %vm1114_vm4, %v1958_v13, %v1952_v14  ;;  %v2289_v13 = vld [vmem:[%s7712_s12 + $0x30] sm:$0xff]  ;;  %v2290_v14 = vld [vmem:[%s7712_s12 + $0x38] sm:$0xff] }
0x1122   :  { %5475 = vmatmul.mubr.msk.f32.gmra.mrb[20].mxu0 %vm67_vm0, %v1960_v26  ;;  %v5890_v26 = vpack.c.bf16 %v2290_v14, %v2289_v13  ;;  %v7110_v13 = vld [vmem:[%s7713_s13] ss:$0 sm:$0xff] }
0x114c   :  { %v2081_v43 = vpop.xlane.xlu0 %2080 }
0x114d   :  { %v2091_v20 = vmul.f32 0.015625, %v2081_v43  ;;  %v2291_v43 = vld [vmem:[%s7712_s12 + $0x40] sm:$0xff] }
0x114f   :  { %v2095_v2 = vsub.f32 %v2073_v31, %v2091_v20  ;;  %v2292_v20 = vld [vmem:[%s7712_s12 + $0x48] sm:$0xff] }
0x1151   :  { %v2099_v44 = vmul.f32 %v2095_v2, %v2095_v2 }
0x1153   :  { %v2103_v45 = vsel %vm67_vm0, %v2099_v44, 0.0  ;;  %v2293_v44 = vld [vmem:[%s7712_s12 + $0x50] sm:$0xff] }
0x1154   :  { %2104 = vadd.xlane.f32.xlu0 %v2103_v45  ;;  %v2294_v45 = vld [vmem:[%s7712_s12 + $0x58] sm:$0xff] }
0x115f   :  { %v2084_v9 = vpop.xlane.xlu1 %2083 }
0x1160   :  { %v2092_v47 = vmul.f32 0.015625, %v2084_v9  ;;  %v5898_v9 = vpack.c.bf16 %v2294_v45, %v2293_v44 }
0x1162   :  { %v2096_v49 = vsub.f32 %v2074_v59, %v2092_v47  ;;  %v2295_v47 = vld [vmem:[%s7712_s12 + $0x60] sm:$0xff] }
0x1164   :  { %v2100_v50 = vmul.f32 %v2096_v49, %v2096_v49 }
0x1166   :  { %v2106_v16 = vsel %vm67_vm0, %v2100_v50, 0.0 }
0x1167   :  { %2107 = vadd.xlane.f32.xlu0 %v2106_v16  ;;  %v2297_v16 = vld [vmem:[%s7712_s12 + $0x70] sm:$0xff] }
0x1168   :  { %v5906_v28 = vpack.c.bf16 %v2298_v52, %v2297_v16 }
0x11e1   :  { %v2105_v61 = vpop.xlane.xlu0 %2104 }
0x11e2   :  { %v2115_v8 = vmul.f32 0.015625, %v2105_v61  ;;  %v4985_v61 = vld [vmem:[%s7711_s11] ss:$0 sm:$0xff] }
0x11e4   :  { %v2119_v63 = vadd.f32 1e-05, %v2115_v8 }
0x11e6   :  { %6305 = vrsqrt.f32 %v2119_v63 }
0x11f0   :  { %v6306_v1 = vpop.eup %6305 }
0x11f1   :  { %v2127_v4 = vmul.f32 %v6306_v1, %v2095_v2  ;;  %v5894_v2 = vpack.c.bf16 %v2292_v20, %v2291_v43 }
0x11f3   :  { %v2137_v62 = vmul.f32 %v7016_v3, %v2127_v4 }
0x11f4   :  { %v2108_v18 = vpop.xlane.xlu0 %2107 }
0x11f5   :  { %v2116_v21 = vmul.f32 0.015625, %v2108_v18  ;;  %v5476_v22 = vpop.f32.mrb[20].mxu0  ;;  %v7025_v23 = vadd.f32 %v7021_v5, %v2137_v62 }
0x11f6   :  { %v2070_v37 = vadd.f32 %v5476_v22, %v6969_v24  ;;  %v2064_v25 = vpop.f32.mrb[21].mxu0 }
0x11f7   :  { %v2120_v39 = vadd.f32 1e-05, %v2116_v21  ;;  %v2065_v29 = vadd.f32 %v6969_v24, %v2064_v25  ;;  %5493 = vmatprep.mubr.msk.f32.mxu1 %vm67_vm0, %v7025_v23 }
0x11f8   :  { %v2076_v31 = vadd.f32 %v2070_v37, %v6721_v17  ;;  %v2284_v17 = vld [vmem:[%s7712_s12 + $0x8] sm:$0xff] }
0x11f9   :  { %6307 = vrsqrt.f32 %v2120_v39  ;;  %v2075_v32 = vadd.f32 %v2065_v29, %v6714_v11  ;;  %v2283_v11 = vld [vmem:[%s7712_s12] sm:$0xff] }
0x11fa   :  { %v2088_v34 = vsel %vm67_vm0, %v2076_v31, 0.0  ;;  %v5878_v36 = vpack.c.bf16 %v2284_v17, %v2283_v11 }
0x11fb   :  { %2089 = vadd.xlane.f32.xlu1 %v2088_v34  ;;  %v2085_v59 = vsel %vm67_vm0, %v2075_v32, 0.0 }
0x11fc   :  { %2086 = vadd.xlane.f32.xlu0 %v2085_v59  ;;  %5879 = vmatprep.subr.bf16.mxu0 %v5878_v36 }
0x11fd   :  { %5881 = vmatpush3.bf16.msra.mxu0 %v5878_v36 }
0x11fe   :  { %5883 = vmatprep.subr.bf16.mxu0 %v5882_v7 }
0x1201   :  { %5885 = vmatpush3.bf16.msra.mxu0 %v5882_v7 }
0x1202   :  { %5887 = vmatprep.subr.bf16.mxu0 %v5886_v54 }
0x1203   :  { %v6308_v30 = vpop.eup %6307 }
0x1204   :  { %v2128_v35 = vmul.f32 %v6308_v30, %v2096_v49  ;;  %v2296_v49 = vld [vmem:[%s7712_s12 + $0x68] sm:$0xff] }
0x1205   :  { %5889 = vmatpush3.bf16.msra.mxu0 %v5886_v54  ;;  %v5902_v50 = vpack.c.bf16 %v2296_v49, %v2295_v47 }
0x1206   :  { %v2138_v6 = vmul.f32 %v7016_v3, %v2128_v35  ;;  %5891 = vmatprep.subr.bf16.mxu0 %v5890_v26 }
0x1208   :  { %v7037_v24 = vadd.f32 %v7021_v5, %v2138_v6 }
0x1209   :  { %5893 = vmatpush3.bf16.msra.mxu0 %v5890_v26 }
0x120a   :  { %5494 = vmatmul.mubr.msk.f32.vlgmr.msra.gmra.mrb[22].mxu1 %vm67_vm0, %v7037_v24  ;;  %5895 = vmatprep.subr.bf16.mxu0 %v5894_v2 }
0x120d   :  { %5897 = vmatpush3.bf16.msra.mxu0 %v5894_v2 }
0x120e   :  { %5899 = vmatprep.subr.bf16.mxu0 %v5898_v9 }
0x1211   :  { %5901 = vmatpush3.bf16.msra.mxu0 %v5898_v9 }
0x1212   :  { %5903 = vmatprep.subr.bf16.mxu0 %v5902_v50 }
0x1215   :  { %5905 = vmatpush3.bf16.msra.mxu0 %v5902_v50 }
0x1216   :  { %5907 = vmatprep.subr.bf16.mxu0 %v5906_v28 }
0x1219   :  { %5909 = vmatpush3.bf16.msra.mxu0 %v5906_v28 }
0x1288   :  { %v2090_v10 = vpop.xlane.xlu1 %2089 }
0x1289   :  { %v2094_v0 = vmul.f32 0.015625, %v2090_v10  ;;  %v2087_v46 = vpop.xlane.xlu0 %2086 }
0x128a   :  { %v2093_v48 = vmul.f32 0.015625, %v2087_v46 }
0x128b   :  { %v2098_v27 = vsub.f32 %v2076_v31, %v2094_v0 }
0x128c   :  { %v2097_v53 = vsub.f32 %v2075_v32, %v2093_v48 }
0x128d   :  { %v2102_v55 = vmul.f32 %v2098_v27, %v2098_v27 }
0x128e   :  { %v2101_v56 = vmul.f32 %v2097_v53, %v2097_v53 }
0x128f   :  { %v2112_v58 = vsel %vm67_vm0, %v2102_v55, 0.0 }
0x1290   :  { %2113 = vadd.xlane.f32.xlu1 %v2112_v58  ;;  %v2109_v40 = vsel %vm67_vm0, %v2101_v56, 0.0 }
0x1291   :  { %2110 = vadd.xlane.f32.xlu0 %v2109_v40 }
0x12dd   :  { %v5495_v8 = vpop.f32.mrb[22].mxu1 }
0x12de   :  { %v2250_v63 = vadd.f32 %v5495_v8, %v4985_v61  ;;  %v2244_v1 = vpop.f32.mrb[23].mxu1 }
0x12df   :  { %v2245_v4 = vadd.f32 %v4985_v61, %v2244_v1 }
0x12e0   :  { %v2268_v62 = vmul.f32 0.70710677, %v2250_v63  ;;  %v2264_v29 = vmul.f32 0.5, %v2250_v63 }
0x12e1   :  { %v2267_v18 = vmul.f32 0.70710677, %v2245_v4  ;;  %v2263_v25 = vmul.f32 0.5, %v2245_v4  ;;  %v4994_v4 = vld [vmem:[%s7704_s4 + $0x88] sm:$0xff] }
0x12e2   :  { %6309 = verf.f32 %v2268_v62  ;;  %v4996_v62 = vld [vmem:[%s7704_s4 + $0x98] sm:$0xff] }
0x12e3   :  { %6311 = verf.f32 %v2267_v18  ;;  %v4993_v18 = vld [vmem:[%s7704_s4 + $0x80] sm:$0xff] }
0x12ec   :  { %v6310_v21 = vpop.eup %6309 }
0x12ed   :  { %v6312_v22 = vpop.eup %6311  ;;  %v2276_v37 = vadd.f32 1.0, %v6310_v21  ;;  %v4995_v21 = vld [vmem:[%s7704_s4 + $0x90] sm:$0xff] }
0x12ee   :  { %v2275_v39 = vadd.f32 1.0, %v6312_v22  ;;  %v5910_v22 = vpack.c.bf16 %v4996_v62, %v4994_v4  ;;  %v5009_v4 = vld [vmem:[%s7705_s5 + $0x2] sm:$0x3]  ;;  %s7730_s5 = smov 80  }
0x12ef   :  { %v2280_v32 = vmul.f32 %v2276_v37, %v2264_v29  ;;  %v5912_v37 = vpack.c.bf16 %v4995_v21, %v4993_v18  ;;  %v7196_v18 = vrot.slane %v5009_v4, %v6630_v57 }
0x12f0   :  { %v2279_v31 = vmul.f32 %v2275_v39, %v2263_v25  ;;  %5911 = vmatprep.subr.bf16.mxu1 %v5910_v22  ;;  %v4998_v25 = vld [vmem:[%s7704_s4 + $0xa8] sm:$0xff]  ;;  %v5000_v39 = vld [vmem:[%s7704_s4 + $0xb8] sm:$0xff]  ;;  %v7199_v22 = vrot.slane %v5009_v4, %v6638_v60 }
0x12f1   :  { %5913 = vmatpush1.bf16.msra.mxu1 %v5912_v37  ;;  %v5914_v29 = vpack.c.bf16 %v5000_v39, %v4998_v25 }
0x12f2   :  { %5531 = vmatprep.mubr.f32.mxu0 %v2279_v31  ;;  %v4997_v31 = vld [vmem:[%s7704_s4 + $0xa0] sm:$0xff] }
0x12f3   :  { %5532 = vmatmul.mubr.f32.vlgmr.msra.gmra.mrb[22].mxu0 %v2280_v32  ;;  %v4999_v32 = vld [vmem:[%s7704_s4 + $0xb0] sm:$0xff]  ;;  %5915 = vmatprep.subr.bf16.mxu1 %v5914_v29 }
0x131d   :  { %v2114_v34 = vpop.xlane.xlu1 %2113 }
0x131e   :  { %v2118_v59 = vmul.f32 0.015625, %v2114_v34  ;;  %v2111_v30 = vpop.xlane.xlu0 %2110  ;;  %v5916_v34 = vpack.c.bf16 %v4999_v32, %v4997_v31 }
0x131f   :  { %v2117_v35 = vmul.f32 0.015625, %v2111_v30  ;;  %v5004_v30 = vld [vmem:[%s7704_s4 + $0xd8] sm:$0xff] }
0x1320   :  { %v2122_v6 = vadd.f32 1e-05, %v2118_v59  ;;  %v5002_v59 = vld [vmem:[%s7704_s4 + $0xc8] sm:$0xff]  ;;  %5917 = vmatpush1.bf16.msra.mxu1 %v5916_v34 }
0x1321   :  { %v2121_v11 = vadd.f32 1e-05, %v2117_v35  ;;  %v5918_v35 = vpack.c.bf16 %v5004_v30, %v5002_v59 }
0x1322   :  { %6313 = vrsqrt.f32 %v2122_v6  ;;  %v5001_v6 = vld [vmem:[%s7704_s4 + $0xc0] sm:$0xff] }
0x1323   :  { %6315 = vrsqrt.f32 %v2121_v11  ;;  %v5003_v11 = vld [vmem:[%s7704_s4 + $0xd0] sm:$0xff]  ;;  %5919 = vmatprep.subr.bf16.mxu1 %v5918_v35 }
0x132c   :  { %v6314_v17 = vpop.eup %6313 }
0x132d   :  { %v6316_v38 = vpop.eup %6315  ;;  %v2130_v36 = vmul.f32 %v6314_v17, %v2098_v27  ;;  %v5920_v17 = vpack.c.bf16 %v5003_v11, %v5001_v6 }
0x132e   :  { %v2129_v41 = vmul.f32 %v6316_v38, %v2097_v53  ;;  %v5006_v38 = vld [vmem:[%s7704_s4 + $0xe8] sm:$0xff] }
0x132f   :  { %v2140_v7 = vmul.f32 %v7016_v3, %v2130_v36  ;;  %v5008_v36 = vld [vmem:[%s7704_s4 + $0xf8] sm:$0xff]  ;;  %5921 = vmatpush1.bf16.msra.mxu1 %v5920_v17 }
0x1330   :  { %v2139_v51 = vmul.f32 %v7016_v3, %v2129_v41  ;;  %v5922_v41 = vpack.c.bf16 %v5008_v36, %v5006_v38 }
0x1331   :  { %v7100_v54 = vadd.f32 %v7021_v5, %v2140_v7  ;;  %v5005_v7 = vld [vmem:[%s7704_s4 + $0xe0] sm:$0xff] }
0x1332   :  { %v7097_v42 = vadd.f32 %v7021_v5, %v2139_v51  ;;  %v5007_v51 = vld [vmem:[%s7704_s4 + $0xf0] sm:$0xff]  ;;  %5923 = vmatprep.subr.bf16.mxu1 %v5922_v41 }
0x1334   :  { %5496 = vmatprep.mubr.msk.f32.mxu1 %vm67_vm0, %v7097_v42 }
0x1335   :  { %5497 = vmatmul.mubr.msk.f32.gmra.mrb[24].mxu1 %vm67_vm0, %v7100_v54 }
0x1336   :  { %2575 = vmatprep.mubr.f32.mxu1 %v6441_v33 }
0x13c6   :  { %v5533_v3 = vpop.f32.mrb[22].mxu0 }
0x13c7   :  { %v2378_v14 = vadd.f32 %v5533_v3, %v7110_v13  ;;  %v2372_v26 = vpop.f32.mrb[23].mxu0  ;;  %v5924_v3 = vpack.c.bf16 %v5007_v51, %v5005_v7 }
0x13c8   :  { %v2373_v5 = vadd.f32 %v7110_v13, %v2372_v26 }
0x13c9   :  { %v2392_v43 = vadd.f32 %v2378_v14, %v7037_v24  ;;  %5925 = vmatpush1.bf16.msra.mxu1 %v5924_v3 }
0x13ca   :  { %v2391_v20 = vadd.f32 %v2373_v5, %v7025_v23 }
0x13cb   :  { %v2400_v2 = vsel %vm67_vm0, %v2392_v43, 0.0 }
0x13cc   :  { %2401 = vadd.xlane.f32.xlu1 %v2400_v2  ;;  %v2397_v44 = vsel %vm67_vm0, %v2391_v20, 0.0 }
0x13cd   :  { %2398 = vadd.xlane.f32.xlu0 %v2397_v44 }
0x1408   :  { %v5498_v45 = vpop.f32.mrb[24].mxu1 }
0x1409   :  { %v2260_v9 = vadd.f32 %v5498_v45, %v4985_v61  ;;  %v2254_v47 = vpop.f32.mrb[25].mxu1 }
0x140a   :  { %v2255_v49 = vadd.f32 %v4985_v61, %v2254_v47 }
0x140b   :  { %v2270_v50 = vmul.f32 0.70710677, %v2260_v9  ;;  %v2266_v23 = vmul.f32 0.5, %v2260_v9 }
0x140c   :  { %v2269_v16 = vmul.f32 0.70710677, %v2255_v49  ;;  %v2265_v24 = vmul.f32 0.5, %v2255_v49 }
0x140d   :  { %6317 = verf.f32 %v2270_v50 }
0x140e   :  { %6319 = verf.f32 %v2269_v16 }
0x1417   :  { %v6318_v52 = vpop.eup %6317 }
0x1418   :  { %v6320_v28 = vpop.eup %6319  ;;  %v2278_v10 = vadd.f32 1.0, %v6318_v52 }
0x1419   :  { %v2277_v0 = vadd.f32 1.0, %v6320_v28 }
0x141a   :  { %v2282_v48 = vmul.f32 %v2278_v10, %v2266_v23 }
0x141b   :  { %v2281_v46 = vmul.f32 %v2277_v0, %v2265_v24  ;;  %v4991_v24 = vld [vmem:[%s7714_s14] ss:$0 sm:$0xff] }
0x141d   :  { %5534 = vmatprep.mubr.f32.mxu0 %v2281_v46 }
0x141e   :  { %5535 = vmatmul.mubr.f32.gmra.mrb[24].mxu0 %v2282_v48 }
0x1459   :  { %v2402_v27 = vpop.xlane.xlu1 %2401 }
0x145a   :  { %v2410_v53 = vmul.f32 0.015625, %v2402_v27  ;;  %v2399_v55 = vpop.xlane.xlu0 %2398 }
0x145b   :  { %v2409_v56 = vmul.f32 0.015625, %v2399_v55 }
0x145c   :  { %v2414_v58 = vsub.f32 %v2392_v43, %v2410_v53 }
0x145d   :  { %v2413_v40 = vsub.f32 %v2391_v20, %v2409_v56 }
0x145e   :  { %v2418_v61 = vmul.f32 %v2414_v58, %v2414_v58 }
0x145f   :  { %v2417_v8 = vmul.f32 %v2413_v40, %v2413_v40 }
0x1460   :  { %v2424_v63 = vsel %vm67_vm0, %v2418_v61, 0.0 }
0x1461   :  { %2425 = vadd.xlane.f32.xlu1 %v2424_v63  ;;  %v2421_v1 = vsel %vm67_vm0, %v2417_v8, 0.0 }
0x1462   :  { %2422 = vadd.xlane.f32.xlu0 %v2421_v1 }
0x14ee   :  { %v2426_v14 = vpop.xlane.xlu1 %2425 }
0x14ef   :  { %v2434_v26 = vmul.f32 0.015625, %v2426_v14  ;;  %v2423_v5 = vpop.xlane.xlu0 %2422 }
0x14f0   :  { %v2433_v43 = vmul.f32 0.015625, %v2423_v5 }
0x14f1   :  { %v2438_v20 = vadd.f32 1e-05, %v2434_v26  ;;  %v5536_v2 = vpop.f32.mrb[24].mxu0 }
0x14f2   :  { %v2437_v44 = vadd.f32 1e-05, %v2433_v43  ;;  %v2388_v45 = vadd.f32 %v5536_v2, %v7110_v13  ;;  %v2382_v9 = vpop.f32.mrb[25].mxu0 }
0x14f3   :  { %6321 = vrsqrt.f32 %v2438_v20  ;;  %v2383_v47 = vadd.f32 %v7110_v13, %v2382_v9 }
0x14f4   :  { %6323 = vrsqrt.f32 %v2437_v44  ;;  %v2394_v49 = vadd.f32 %v2388_v45, %v7100_v54  ;;  %v4992_v54 = vld [vmem:[%s7715_s15] ss:$0 sm:$0xff] }
0x14f5   :  { %v2393_v50 = vadd.f32 %v2383_v47, %v7097_v42 }
0x14f6   :  { %v2406_v16 = vsel %vm67_vm0, %v2394_v49, 0.0 }
0x14f7   :  { %2407 = vadd.xlane.f32.xlu1 %v2406_v16  ;;  %v2403_v52 = vsel %vm67_vm0, %v2393_v50, 0.0 }
0x14f8   :  { %2404 = vadd.xlane.f32.xlu0 %v2403_v52 }
0x14fd   :  { %v6322_v28 = vpop.eup %6321 }
0x14fe   :  { %v6324_v10 = vpop.eup %6323  ;;  %v2446_v23 = vmul.f32 %v6322_v28, %v2414_v58 }
0x14ff   :  { %v2445_v0 = vmul.f32 %v6324_v10, %v2413_v40 }
0x1500   :  { %v2456_v46 = vmul.f32 %v4991_v24, %v2446_v23 }
0x1501   :  { %v2455_v13 = vmul.f32 %v4991_v24, %v2445_v0 }
0x1502   :  { %v7185_v48 = vadd.f32 %v4992_v54, %v2456_v46 }
0x1503   :  { %v7180_v42 = vadd.f32 %v4992_v54, %v2455_v13 }
0x1505   :  { %5010 = vmatmul.mubr.msk.f32.vlgmr.msra.gmra.mrb[26].mxu1 %vm67_vm0, %v7180_v42 }
0x1506   :  { %2581 = vmatprep.mubr.f32.mxu1 %v6441_v33 }
0x1509   :  { %5011 = vmatmul.mubr.msk.f32.gmra.mrb[28].mxu1 %vm67_vm0, %v7185_v48 }
0x150a   :  { %2587 = vmatprep.mubr.f32.mxu1 %v6441_v33 }
0x1584   :  { %v2408_v27 = vpop.xlane.xlu1 %2407 }
0x1585   :  { %v2412_v53 = vmul.f32 0.015625, %v2408_v27  ;;  %v2405_v55 = vpop.xlane.xlu0 %2404 }
0x1586   :  { %v2411_v56 = vmul.f32 0.015625, %v2405_v55 }
0x1587   :  { %v2416_v58 = vsub.f32 %v2394_v49, %v2412_v53 }
0x1588   :  { %v2415_v40 = vsub.f32 %v2393_v50, %v2411_v56 }
0x1589   :  { %v2420_v61 = vmul.f32 %v2416_v58, %v2416_v58 }
0x158a   :  { %v2419_v8 = vmul.f32 %v2415_v40, %v2415_v40 }
0x158b   :  { %v2430_v63 = vsel %vm67_vm0, %v2420_v61, 0.0 }
0x158c   :  { %2431 = vadd.xlane.f32.xlu1 %v2430_v63  ;;  %v2427_v1 = vsel %vm67_vm0, %v2419_v8, 0.0 }
0x158d   :  { %2428 = vadd.xlane.f32.xlu0 %v2427_v1 }
0x15d8   :  { %v2577_v62 = vpop.f32.mrb[26].mxu1 }
0x15d9   :  { %v2579_v21 = vpop.f32.mrb[27].mxu1  ;;  %v7202_v25 = vadd.f32 %v2577_v62, %v7196_v18 }
0x15da   :  { %v2580_v31 = vadd.f32 %v2579_v21, %v7199_v22 }
0x15dc   :  { %v2583_v37 = vpop.f32.mrb[28].mxu1 }
0x15dd   :  { %v7205_v39 = vadd.f32 %v2583_v37, %v7196_v18  ;;  %v2585_v29 = vpop.f32.mrb[29].mxu1 }
0x15de   :  { %v2586_v32 = vadd.f32 %v2585_v29, %v7199_v22 }
0x15df   :  { %v7211_v57 = vpack.i.bf16 %v7205_v39, %v7202_v25 }
0x15e0   :  { %v5932_v34 = vpack.c.bf16 %v2586_v32, %v2580_v31  ;;  %v7213_v59 = vpack.i.bf16 %v2586_v32, %v2580_v31 }
0x15e1   :  { %6169 = vrot.lane.b32.xlu1 %v7211_v57, %s6443_s29  ;;  %6164 = vrot.lane.b32.xlu0 %v7211_v57, %s6442_s27 }
0x15e5   :  { %2796 = vrot.lane.b32.xlu1 %v7202_v25, %s6444_s22  ;;  %6174 = vrot.lane.b32.xlu0 %v7211_v57, %s6445_s2 }
0x15e9   :  { %2798 = vrot.lane.b32.xlu1 %v7205_v39, %s6444_s22  ;;  %3002 = vrot.lane.b32.xlu0 %v7202_v25, %s6446_s23 }
0x15ed   :  { %3004 = vrot.lane.b32.xlu1 %v7205_v39, %s6446_s23 }
0x1619   :  { %v2432_v60 = vpop.xlane.xlu1 %2431 }
0x161a   :  { %v2436_v30 = vmul.f32 0.015625, %v2432_v60  ;;  %v2429_v35 = vpop.xlane.xlu0 %2428 }
0x161b   :  { %v2435_v6 = vmul.f32 0.015625, %v2429_v35 }
0x161c   :  { %v2440_v11 = vadd.f32 1e-05, %v2436_v30 }
0x161d   :  { %v2439_v17 = vadd.f32 1e-05, %v2435_v6 }
0x161e   :  { %6325 = vrsqrt.f32 %v2440_v11 }
0x161f   :  { %6327 = vrsqrt.f32 %v2439_v17 }
0x1628   :  { %v6326_v38 = vpop.eup %6325 }
0x1629   :  { %v6328_v36 = vpop.eup %6327  ;;  %v2448_v7 = vmul.f32 %v6326_v38, %v2416_v58 }
0x162a   :  { %v2447_v41 = vmul.f32 %v6328_v36, %v2415_v40 }
0x162b   :  { %v2458_v14 = vmul.f32 %v4991_v24, %v2448_v7 }
0x162c   :  { %v2457_v51 = vmul.f32 %v4991_v24, %v2447_v41 }
0x162d   :  { %v7234_v26 = vadd.f32 %v4992_v54, %v2458_v14 }
0x162e   :  { %v7229_v3 = vadd.f32 %v4992_v54, %v2457_v51 }
0x1630   :  { %5012 = vmatmul.mubr.msk.f32.gmra.mrb[30].mxu1 %vm67_vm0, %v7229_v3 }
0x1631   :  { %2593 = vmatprep.mubr.f32.mxu1 %v6441_v33 }
0x1634   :  { %5013 = vmatmul.mubr.msk.f32.gmra.mrb[32].mxu1 %vm67_vm0, %v7234_v26 }
0x1635   :  { %5541 = vmatprep.mubr.msk.f32.mxu1 %vm276_vm1, %v7202_v25 }
0x1653   :  { %v6170_v5 = vpop.permute.xlu1 %6169  ;;  %v6165_v43 = vpop.permute.xlu0 %6164 }
0x1654   :  { %v6172_v20 = vunpack.i.h.bf16 %v6170_v5  ;;  %v6171_v2 = vunpack.i.l.bf16 %v6170_v5  ;;  %v6167_v44 = vunpack.i.h.bf16 %v6165_v43  ;;  %v6166_v45 = vunpack.i.l.bf16 %v6165_v43 }
0x1656   :  { %v5936_v9 = vpack.c.bf16 %v6172_v20, %v6171_v2  ;;  %v5926_v47 = vpack.c.bf16 %v6167_v44, %v6166_v45 }
0x1657   :  { %v2797_v49 = vpop.permute.xlu1 %2796  ;;  %v6175_v50 = vpop.permute.xlu0 %6174 }
0x1658   :  { %v6177_v16 = vunpack.i.h.bf16 %v6175_v50  ;;  %v6176_v52 = vunpack.i.l.bf16 %v6175_v50  ;;  %5928 = vmatprep.subr.msk.bf16.mxu1 %vm6663_vm2, %v5926_v47  ;;  %5938 = vmatprep.subr.msk.bf16.mxu0 %vm6663_vm2, %v5936_v9 }
0x1659   :  { %5555 = vmatprep.mubr.msk.f32.mxu0 %vm276_vm1, %v2797_v49  ;;  %5931 = vmatpush3.bf16.xpose.msk.msra.mxu1 %vm6663_vm2, %v5926_v47 }
0x165a   :  { %v5946_v28 = vpack.c.bf16 %v6177_v16, %v6176_v52  ;;  %5941 = vmatpush3.bf16.xpose.msk.msra.mxu0 %vm6663_vm2, %v5936_v9  ;;  %5933 = vmatprep.subr.bf16.mxu1 %v5932_v34 }
0x165b   :  { %v2799_v10 = vpop.permute.xlu1 %2798  ;;  %v3003_v24 = vpop.permute.xlu0 %3002 }
0x165c   :  { %5948 = vmatprep.subr.msk.bf16.mxu0 %vm6663_vm2, %v5946_v28 }
0x165f   :  { %v3005_v0 = vpop.permute.xlu1 %3004 }
0x1660   :  { %5542 = vmatmul.mubr.msk.f32.vlgmr.msra.gmra.mrb[34].mxu1 %vm276_vm1, %v7205_v39 }
0x1661   :  { %5556 = vmatmul.mubr.msk.f32.vlgmr.msra.gmra.mrb[26].mxu0 %vm276_vm1, %v2799_v10  ;;  %5935 = vmatpush3.bf16.msra.mxu1 %v5932_v34 }
0x1662   :  { %5951 = vmatpush3.bf16.xpose.msk.msra.mxu0 %vm6663_vm2, %v5946_v28  ;;  %5569 = vmatprep.mubr.msk.f32.mxu0 %vm276_vm1, %v3003_v24 }
0x1669   :  { %5570 = vmatmul.mubr.msk.f32.vlgmr.msra.gmra.mrb[28].mxu0 %vm276_vm1, %v3005_v0 }
0x1703   :  { %v7258_v23 = vpop.f32.mrb[30].mxu1 }
0x1704   :  { %v2591_v54 = vpop.f32.mrb[31].mxu1 }
0x1705   :  { %v2592_v27 = vadd.f32 %v2591_v54, %v7199_v22 }
0x1707   :  { %v7260_v13 = vpop.f32.mrb[32].mxu1 }
0x1708   :  { %v2597_v46 = vpop.f32.mrb[33].mxu1 }
0x1709   :  { %v2598_v53 = vadd.f32 %v2597_v46, %v7199_v22 }
0x170b   :  { %v7264_v55 = vpack.c.bf16 %v2598_v53, %v2592_v27  ;;  %v7266_v56 = vpack.i.bf16 %v2598_v53, %v2592_v27 }
0x1733   :  { %v5543_v58 = vpop.f32.mrb[34].mxu1 }
0x1734   :  { %v2690_v40 = vmul.f32 0.25, %v5543_v58  ;;  %v5557_v61 = vpop.f32.mrb[26].mxu0  ;;  %v2680_v8 = vpop.f32.mrb[35].mxu1 }
0x1735   :  { %v2689_v63 = vmul.f32 0.25, %v2680_v8  ;;  %v2878_v1 = vpop.f32.mrb[27].mxu0  ;;  %v2888_v29 = vmul.f32 0.25, %v5557_v61 }
0x1736   :  { %v2692_v4 = vadd.f32 %v2690_v40, %v6680_v15  ;;  %v2887_v62 = vmul.f32 0.25, %v2878_v1 }
0x1737   :  { %v2691_v21 = vadd.f32 %v2689_v63, %v6680_v15  ;;  %v2890_v35 = vadd.f32 %v2888_v29, %v6680_v15 }
0x1738   :  { %v2696_v37 = vsel %vm276_vm1, %v2692_v4, -inf  ;;  %v2889_v31 = vadd.f32 %v2887_v62, %v6680_v15 }
0x1739   :  { %2697 = vmax.xlane.f32.xlu1 %v2696_v37  ;;  %v2693_v22 = vsel %vm276_vm1, %v2691_v21, -inf  ;;  %v2894_v17 = vsel %vm276_vm1, %v2890_v35, -inf }
0x173a   :  { %2694 = vmax.xlane.f32.xlu0 %v2693_v22  ;;  %v2891_v30 = vsel %vm276_vm1, %v2889_v31, -inf }
0x173c   :  { %v5571_v32 = vpop.f32.mrb[28].mxu0 }
0x173d   :  { %v3094_v34 = vmul.f32 0.25, %v5571_v32  ;;  %v3084_v60 = vpop.f32.mrb[29].mxu0 }
0x173e   :  { %v3093_v6 = vmul.f32 0.25, %v3084_v60  ;;  %2892 = vmax.xlane.f32.xlu0 %v2891_v30 }
0x173f   :  { %v3096_v38 = vadd.f32 %v3094_v34, %v6680_v15 }
0x1740   :  { %v3095_v11 = vadd.f32 %v3093_v6, %v6680_v15 }
0x1741   :  { %v3100_v41 = vsel %vm276_vm1, %v3096_v38, -inf }
0x1742   :  { %v3097_v36 = vsel %vm276_vm1, %v3095_v11, -inf  ;;  %2895 = vmax.xlane.f32.xlu0 %v2894_v17 }
0x1743   :  { %3098 = vmax.xlane.f32.xlu1 %v3097_v36 }
0x1746   :  { %3101 = vmax.xlane.f32.xlu0 %v3100_v41 }
0x1754   :  { %6179 = vrot.lane.b32.xlu1 %v7213_v59, %s6444_s22 }
0x17c6   :  { %v2698_v7 = vpop.xlane.xlu1 %2697 }
0x17c7   :  { %v2700_v51 = vsub.f32 %v2692_v4, %v2698_v7  ;;  %v2695_v14 = vpop.xlane.xlu0 %2694 }
0x17c8   :  { %v2699_v5 = vsub.f32 %v2691_v21, %v2695_v14 }
0x17c9   :  { %v2703_v43 = vmul.f32 1.442695, %v2700_v51 }
0x17ca   :  { %v2701_v20 = vmul.f32 1.442695, %v2699_v5 }
0x17cb   :  { %6329 = vpow2.f32 %v2703_v43  ;;  %v2893_v2 = vpop.xlane.xlu0 %2892 }
0x17cc   :  { %6331 = vpow2.f32 %v2701_v20  ;;  %v2897_v44 = vsub.f32 %v2889_v31, %v2893_v2 }
0x17ce   :  { %v2899_v45 = vmul.f32 1.442695, %v2897_v44 }
0x17cf   :  { %v2896_v9 = vpop.xlane.xlu0 %2895 }
0x17d0   :  { %6333 = vpow2.f32 %v2899_v45  ;;  %v3099_v47 = vpop.xlane.xlu1 %3098  ;;  %v2898_v49 = vsub.f32 %v2890_v35, %v2896_v9 }
0x17d1   :  { %v3103_v62 = vsub.f32 %v3095_v11, %v3099_v47 }
0x17d2   :  { %v2901_v50 = vmul.f32 1.442695, %v2898_v49 }
0x17d3   :  { %v3102_v16 = vpop.xlane.xlu0 %3101  ;;  %v3105_v21 = vmul.f32 1.442695, %v3103_v62 }
0x17d4   :  { %6335 = vpow2.f32 %v2901_v50  ;;  %v6180_v52 = vpop.permute.xlu1 %6179  ;;  %v3104_v28 = vsub.f32 %v3096_v38, %v3102_v16 }
0x17d5   :  { %v6330_v10 = vpop.eup %6329  ;;  %v6182_v24 = vunpack.i.h.bf16 %v6180_v52  ;;  %v6181_v0 = vunpack.i.l.bf16 %v6180_v52 }
0x17d6   :  { %v6332_v54 = vpop.eup %6331  ;;  %v3107_v46 = vmul.f32 1.442695, %v3104_v28  ;;  %v2708_v27 = vsel %vm276_vm1, %v6330_v10, 0.0 }
0x17d7   :  { %v5942_v53 = vpack.c.bf16 %v6182_v24, %v6181_v0  ;;  %2709 = vadd.xlane.f32.xlu0 %v2708_v27  ;;  %v2705_v58 = vsel %vm276_vm1, %v6332_v54, 0.0 }
0x17d8   :  { %6337 = vpow2.f32 %v3107_v46  ;;  %2706 = vadd.xlane.f32.xlu1 %v2705_v58 }
0x17d9   :  { %5943 = vmatprep.subr.bf16.mxu1 %v5942_v53  ;;  %6339 = vpow2.f32 %v3105_v21 }
0x17da   :  { %v6334_v40 = vpop.eup %6333 }
0x17db   :  { %v2903_v61 = vsel %vm276_vm1, %v6334_v40, 0.0 }
0x17dc   :  { %2904 = vadd.xlane.f32.xlu1 %v2903_v61 }
0x17de   :  { %v6336_v8 = vpop.eup %6335 }
0x17df   :  { %v2906_v63 = vsel %vm276_vm1, %v6336_v8, 0.0 }
0x17e0   :  { %2907 = vadd.xlane.f32.xlu0 %v2906_v63 }
0x17e2   :  { %v6338_v1 = vpop.eup %6337 }
0x17e3   :  { %v3112_v4 = vsel %vm276_vm1, %v6338_v1, 0.0  ;;  %v6340_v37 = vpop.eup %6339 }
0x17e4   :  { %3113 = vadd.xlane.f32.xlu0 %v3112_v4  ;;  %v3109_v29 = vsel %vm276_vm1, %v6340_v37, 0.0 }
0x17ed   :  { %6189 = vrot.lane.b32.xlu1 %v7211_v57, %s6448_s25 }
0x17fa   :  { %6184 = vrot.lane.b32.xlu0 %v7213_v59, %s6446_s23 }
0x17fe   :  { %3208 = vrot.lane.b32.xlu0 %v7205_v39, %s7730_s5 }
0x1811   :  { %3110 = vadd.xlane.f32.xlu1 %v3109_v29 }
0x1822   :  { %3206 = vrot.lane.b32.xlu1 %v7202_v25, %s7730_s5 }
0x1864   :  { %v2710_v22 = vpop.xlane.xlu0 %2709 }
0x1865   :  { %6341 = vrcp.f32 %v2710_v22  ;;  %v2707_v31 = vpop.xlane.xlu1 %2706  ;;  %v7330_v22 = vadd.f32 %v7260_v13, %v7196_v18 }
0x1866   :  { %6343 = vrcp.f32 %v2707_v31  ;;  %v7334_v31 = vadd.f32 %v7258_v23, %v7196_v18 }
0x1869   :  { %v2905_v57 = vpop.xlane.xlu1 %2904 }
0x186a   :  { %6345 = vrcp.f32 %v2905_v57  ;;  %v7338_v57 = vpack.i.bf16 %v7330_v22, %v7334_v31 }
0x186d   :  { %v2908_v32 = vpop.xlane.xlu0 %2907  ;;  %v6190_v11 = vpop.permute.xlu1 %6189 }
0x186e   :  { %6347 = vrcp.f32 %v2908_v32  ;;  %v6192_v41 = vunpack.i.h.bf16 %v6190_v11  ;;  %v6191_v7 = vunpack.i.l.bf16 %v6190_v11 }
0x186f   :  { %v6342_v34 = vpop.eup %6341 }
0x1870   :  { %v6344_v60 = vpop.eup %6343  ;;  %v2714_v35 = vmul.f32 %v6342_v34, %v6330_v10  ;;  %v5956_v43 = vpack.c.bf16 %v6192_v41, %v6191_v7 }
0x1871   :  { %v3114_v39 = vpop.xlane.xlu0 %3113  ;;  %v2713_v30 = vmul.f32 %v6344_v60, %v6332_v54 }
0x1872   :  { %6349 = vrcp.f32 %v3114_v39 }
0x1873   :  { %5548 = vmatprep.mubr.msk.f32.mxu1 %vm276_vm1, %v2713_v30 }
0x1874   :  { %v6346_v6 = vpop.eup %6345  ;;  %5549 = vmatmul.mubr.msk.f32.vlgmr.msra.gmra.mrb[36].mxu1 %vm276_vm1, %v2714_v35 }
0x1875   :  { %5945 = vmatpush3.bf16.msra.mxu1 %v5942_v53  ;;  %v6185_v25 = vpop.permute.xlu0 %6184  ;;  %v2911_v17 = vmul.f32 %v6346_v6, %v6334_v40 }
0x1876   :  { %v6187_v38 = vunpack.i.h.bf16 %v6185_v25  ;;  %v6186_v36 = vunpack.i.l.bf16 %v6185_v25 }
0x1877   :  { %5562 = vmatprep.mubr.msk.f32.mxu1 %vm276_vm1, %v2911_v17 }
0x1878   :  { %v6348_v51 = vpop.eup %6347  ;;  %v5952_v14 = vpack.c.bf16 %v6187_v38, %v6186_v36 }
0x1879   :  { %v2912_v5 = vmul.f32 %v6348_v51, %v6336_v8  ;;  %v3209_v49 = vpop.permute.xlu0 %3208 }
0x187a   :  { %5953 = vmatprep.subr.bf16.mxu1 %v5952_v14 }
0x187b   :  { %5563 = vmatmul.mubr.msk.f32.vlgmr.msra.gmra.mrb[38].mxu1 %vm276_vm1, %v2912_v5 }
0x187c   :  { %5955 = vmatpush3.bf16.msra.mxu1 %v5952_v14  ;;  %v6350_v2 = vpop.eup %6349 }
0x187d   :  { %5958 = vmatprep.subr.msk.bf16.mxu1 %vm6663_vm2, %v5956_v43  ;;  %v3118_v9 = vmul.f32 %v6350_v2, %v6338_v1 }
0x189e   :  { %v3111_v20 = vpop.xlane.xlu1 %3110 }
0x189f   :  { %6351 = vrcp.f32 %v3111_v20 }
0x18a2   :  { %v3207_v47 = vpop.permute.xlu1 %3206 }
0x18a9   :  { %v6352_v44 = vpop.eup %6351 }
0x18aa   :  { %v3117_v45 = vmul.f32 %v6352_v44, %v6340_v37 }
0x18ac   :  { %5576 = vmatprep.mubr.msk.f32.mxu1 %vm276_vm1, %v3117_v45 }
0x18ad   :  { %5577 = vmatmul.mubr.msk.f32.vlgmr.msra.gmra.mrb[40].mxu1 %vm276_vm1, %v3118_v9 }
0x18ae   :  { %5961 = vmatpush3.bf16.xpose.msk.msra.mxu1 %vm6663_vm2, %v5956_v43  ;;  %5583 = vmatprep.mubr.msk.f32.mxu1 %vm276_vm1, %v3207_v47 }
0x18af   :  { %5973 = vmatprep.subr.bf16.mxu1 %v7264_v55 }
0x18b5   :  { %5584 = vmatmul.mubr.msk.f32.vlgmr.msra.gmra.mrb[42].mxu1 %vm276_vm1, %v3209_v49 }
0x18b6   :  { %5975 = vmatpush3.bf16.msra.mxu1 %v7264_v55 }
0x1947   :  { %v7310_v50 = vpop.f32.mrb[36].mxu1 }
0x1948   :  { %v7312_v16 = vpop.f32.mrb[37].mxu1 }
0x194e   :  { %v7314_v52 = vpop.f32.mrb[38].mxu1 }
0x194f   :  { %v7316_v28 = vpop.f32.mrb[39].mxu1 }
0x1980   :  { %v7318_v10 = vpop.f32.mrb[40].mxu1 }
0x1981   :  { %v7320_v24 = vpop.f32.mrb[41].mxu1 }
0x1988   :  { %v5585_v0 = vpop.f32.mrb[42].mxu1 }
0x1989   :  { %v3298_v54 = vmul.f32 0.25, %v5585_v0  ;;  %v3288_v46 = vpop.f32.mrb[43].mxu1 }
0x198a   :  { %v3297_v27 = vmul.f32 0.25, %v3288_v46 }
0x198b   :  { %v3300_v53 = vadd.f32 %v3298_v54, %v6680_v15 }
0x198c   :  { %v3299_v55 = vadd.f32 %v3297_v27, %v6680_v15 }
0x198d   :  { %v3304_v58 = vsel %vm276_vm1, %v3300_v53, -inf }
0x198e   :  { %3305 = vmax.xlane.f32.xlu0 %v3304_v58  ;;  %v3301_v40 = vsel %vm276_vm1, %v3299_v55, -inf }
0x198f   :  { %3302 = vmax.xlane.f32.xlu1 %v3301_v40 }
0x1a1b   :  { %v3306_v61 = vpop.xlane.xlu0 %3305 }
0x1a1c   :  { %v3308_v8 = vsub.f32 %v3300_v53, %v3306_v61  ;;  %v3303_v63 = vpop.xlane.xlu1 %3302 }
0x1a1d   :  { %v3307_v1 = vsub.f32 %v3299_v55, %v3303_v63 }
0x1a1e   :  { %v3311_v4 = vmul.f32 1.442695, %v3308_v8 }
0x1a1f   :  { %v3309_v62 = vmul.f32 1.442695, %v3307_v1 }
0x1a20   :  { %6353 = vpow2.f32 %v3311_v4 }
0x1a21   :  { %6355 = vpow2.f32 %v3309_v62 }
0x1a2a   :  { %v6354_v21 = vpop.eup %6353 }
0x1a2b   :  { %v6356_v37 = vpop.eup %6355  ;;  %v3316_v29 = vsel %vm276_vm1, %v6354_v21, 0.0 }
0x1a2c   :  { %3317 = vadd.xlane.f32.xlu1 %v3316_v29  ;;  %v3313_v15 = vsel %vm276_vm1, %v6356_v37, 0.0 }
0x1a2d   :  { %3314 = vadd.xlane.f32.xlu0 %v3313_v15 }
0x1a3d   :  { %6199 = vrot.lane.b32.xlu1 %v7338_v57, %s6442_s27 }
0x1a43   :  { %6194 = vrot.lane.b32.xlu0 %v7213_v59, %s7730_s5 }
0x1ab9   :  { %v3318_v32 = vpop.xlane.xlu1 %3317 }
0x1aba   :  { %6357 = vrcp.f32 %v3318_v32  ;;  %v3315_v34 = vpop.xlane.xlu0 %3314 }
0x1abb   :  { %6359 = vrcp.f32 %v3315_v34 }
0x1abd   :  { %v6200_v13 = vpop.permute.xlu1 %6199 }
0x1abe   :  { %v6195_v60 = vpop.permute.xlu0 %6194  ;;  %v6202_v39 = vunpack.i.h.bf16 %v6200_v13  ;;  %v6201_v30 = vunpack.i.l.bf16 %v6200_v13 }
0x1abf   :  { %v6197_v18 = vunpack.i.h.bf16 %v6195_v60  ;;  %v6196_v23 = vunpack.i.l.bf16 %v6195_v60 }
0x1ac0   :  { %v5966_v6 = vpack.c.bf16 %v6202_v39, %v6201_v30 }
0x1ac1   :  { %v5962_v35 = vpack.c.bf16 %v6197_v18, %v6196_v23 }
0x1ac3   :  { %5963 = vmatprep.subr.bf16.mxu0 %v5962_v35 }
0x1ac4   :  { %v6358_v11 = vpop.eup %6357  ;;  %5965 = vmatpush3.bf16.msra.mxu0 %v5962_v35 }
0x1ac5   :  { %v6360_v25 = vpop.eup %6359  ;;  %5968 = vmatprep.subr.msk.bf16.mxu0 %vm6663_vm2, %v5966_v6  ;;  %v3322_v17 = vmul.f32 %v6358_v11, %v6354_v21 }
0x1ac6   :  { %v3321_v59 = vmul.f32 %v6360_v25, %v6356_v37 }
0x1ac8   :  { %5590 = vmatprep.mubr.msk.f32.mxu0 %vm276_vm1, %v3321_v59 }
0x1ac9   :  { %5591 = vmatmul.mubr.msk.f32.vlgmr.msra.gmra.mrb[30].mxu0 %vm276_vm1, %v3322_v17 }
0x1aca   :  { %5597 = vmatprep.mubr.msk.f32.mxu0 %vm276_vm1, %v7334_v31 }
0x1acd   :  { %5971 = vmatpush3.bf16.xpose.msk.msra.mxu0 %vm6663_vm2, %v5966_v6 }
0x1ad4   :  { %5598 = vmatmul.mubr.msk.f32.vlgmr.msra.gmra.mrb[32].mxu0 %vm276_vm1, %v7330_v22 }
0x1b9c   :  { %v7354_v38 = vpop.f32.mrb[30].mxu0 }
0x1b9d   :  { %v7356_v36 = vpop.f32.mrb[31].mxu0 }
0x1ba7   :  { %v5599_v41 = vpop.f32.mrb[32].mxu0 }
0x1ba8   :  { %v3530_v7 = vmul.f32 0.25, %v5599_v41  ;;  %v3520_v51 = vpop.f32.mrb[33].mxu0 }
0x1ba9   :  { %v3529_v14 = vmul.f32 0.25, %v3520_v51 }
0x1baa   :  { %v3532_v5 = vadd.f32 %v3530_v7, %v6814_v19 }
0x1bab   :  { %v3531_v43 = vadd.f32 %v3529_v14, %v6814_v19 }
0x1bac   :  { %v3536_v20 = vsel %vm276_vm1, %v3532_v5, -inf }
0x1bad   :  { %3537 = vmax.xlane.f32.xlu0 %v3536_v20  ;;  %v3533_v2 = vsel %vm276_vm1, %v3531_v43, -inf }
0x1bae   :  { %3534 = vmax.xlane.f32.xlu1 %v3533_v2 }
0x1c3a   :  { %v3538_v44 = vpop.xlane.xlu0 %3537 }
0x1c3b   :  { %v3540_v45 = vsub.f32 %v3532_v5, %v3538_v44  ;;  %v3535_v9 = vpop.xlane.xlu1 %3534 }
0x1c3c   :  { %v3539_v47 = vsub.f32 %v3531_v43, %v3535_v9 }
0x1c3d   :  { %v3543_v49 = vmul.f32 1.442695, %v3540_v45 }
0x1c3e   :  { %v3541_v0 = vmul.f32 1.442695, %v3539_v47 }
0x1c3f   :  { %6361 = vpow2.f32 %v3543_v49 }
0x1c40   :  { %6363 = vpow2.f32 %v3541_v0 }
0x1c49   :  { %v6362_v54 = vpop.eup %6361 }
0x1c4a   :  { %v6364_v46 = vpop.eup %6363  ;;  %v3548_v27 = vsel %vm276_vm1, %v6362_v54, 0.0 }
0x1c4b   :  { %3549 = vadd.xlane.f32.xlu1 %v3548_v27  ;;  %v3545_v53 = vsel %vm276_vm1, %v6364_v46, 0.0 }
0x1c4c   :  { %3546 = vadd.xlane.f32.xlu0 %v3545_v53 }
0x1c5c   :  { %3636 = vrot.lane.b32.xlu1 %v7334_v31, %s6444_s22 }
0x1c60   :  { %3638 = vrot.lane.b32.xlu1 %v7330_v22, %s6444_s22 }
0x1c62   :  { %6204 = vrot.lane.b32.xlu0 %v7338_v57, %s6443_s29 }
0x1cd8   :  { %v3550_v55 = vpop.xlane.xlu1 %3549 }
0x1cd9   :  { %6365 = vrcp.f32 %v3550_v55  ;;  %v3547_v58 = vpop.xlane.xlu0 %3546 }
0x1cda   :  { %6367 = vrcp.f32 %v3547_v58 }
0x1cdc   :  { %v3637_v37 = vpop.permute.xlu1 %3636 }
0x1cdd   :  { %v6205_v40 = vpop.permute.xlu0 %6204 }
0x1cde   :  { %v6207_v61 = vunpack.i.h.bf16 %v6205_v40  ;;  %v6206_v8 = vunpack.i.l.bf16 %v6205_v40 }
0x1ce0   :  { %v5976_v63 = vpack.c.bf16 %v6207_v61, %v6206_v8  ;;  %v3639_v29 = vpop.permute.xlu1 %3638 }
0x1ce2   :  { %5978 = vmatprep.subr.msk.bf16.mxu1 %vm6663_vm2, %v5976_v63 }
0x1ce3   :  { %v6366_v1 = vpop.eup %6365 }
0x1ce4   :  { %v6368_v4 = vpop.eup %6367  ;;  %v3554_v21 = vmul.f32 %v6366_v1, %v6362_v54 }
0x1ce5   :  { %v3553_v62 = vmul.f32 %v6368_v4, %v6364_v46 }
0x1ce7   :  { %5604 = vmatprep.mubr.msk.f32.mxu1 %vm276_vm1, %v3553_v62 }
0x1ce8   :  { %5605 = vmatmul.mubr.msk.f32.vlgmr.msra.gmra.mrb[44].mxu1 %vm276_vm1, %v3554_v21 }
0x1ce9   :  { %5981 = vmatpush3.bf16.xpose.msk.msra.mxu1 %vm6663_vm2, %v5976_v63  ;;  %5611 = vmatprep.mubr.msk.f32.mxu1 %vm276_vm1, %v3637_v37 }
0x1cf0   :  { %5612 = vmatmul.mubr.msk.f32.vlgmr.msra.gmra.mrb[46].mxu1 %vm276_vm1, %v3639_v29 }
0x1dbb   :  { %v7378_v15 = vpop.f32.mrb[44].mxu1 }
0x1dbc   :  { %v7380_v32 = vpop.f32.mrb[45].mxu1 }
0x1dc3   :  { %v5613_v34 = vpop.f32.mrb[46].mxu1 }
0x1dc4   :  { %v3728_v13 = vmul.f32 0.25, %v5613_v34  ;;  %v3718_v60 = vpop.f32.mrb[47].mxu1 }
0x1dc5   :  { %v3727_v39 = vmul.f32 0.25, %v3718_v60 }
0x1dc6   :  { %v3730_v30 = vadd.f32 %v3728_v13, %v6814_v19 }
0x1dc7   :  { %v3729_v18 = vadd.f32 %v3727_v39, %v6814_v19 }
0x1dc8   :  { %v3734_v23 = vsel %vm276_vm1, %v3730_v30, -inf }
0x1dc9   :  { %3735 = vmax.xlane.f32.xlu1 %v3734_v23  ;;  %v3731_v35 = vsel %vm276_vm1, %v3729_v18, -inf }
0x1dca   :  { %3732 = vmax.xlane.f32.xlu0 %v3731_v35 }
0x1dda   :  { %6209 = vrot.lane.b32.xlu1 %v7266_v56, %s6444_s22  ;;  %s6451_s22 = smov [#allocation2]  }
0x1dde   :  { %3842 = vrot.lane.b32.xlu1 %v7334_v31, %s6446_s23 }
0x1de2   :  { %3844 = vrot.lane.b32.xlu1 %v7330_v22, %s6446_s23 }
0x1e56   :  { %v3736_v6 = vpop.xlane.xlu1 %3735 }
0x1e57   :  { %v3738_v11 = vsub.f32 %v3730_v30, %v3736_v6  ;;  %v3733_v25 = vpop.xlane.xlu0 %3732 }
0x1e58   :  { %v3737_v59 = vsub.f32 %v3729_v18, %v3733_v25 }
0x1e59   :  { %v3741_v17 = vmul.f32 1.442695, %v3738_v11 }
0x1e5a   :  { %v3739_v41 = vmul.f32 1.442695, %v3737_v59  ;;  %v6210_v7 = vpop.permute.xlu1 %6209 }
0x1e5b   :  { %6369 = vpow2.f32 %v3741_v17  ;;  %v6212_v51 = vunpack.i.h.bf16 %v6210_v7  ;;  %v6211_v14 = vunpack.i.l.bf16 %v6210_v7 }
0x1e5c   :  { %6371 = vpow2.f32 %v3739_v41 }
0x1e5d   :  { %v5982_v5 = vpack.c.bf16 %v6212_v51, %v6211_v14 }
0x1e5e   :  { %v3843_v58 = vpop.permute.xlu1 %3842 }
0x1e5f   :  { %5983 = vmatprep.subr.bf16.mxu0 %v5982_v5 }
0x1e60   :  { %5985 = vmatpush3.bf16.msra.mxu0 %v5982_v5 }
0x1e62   :  { %v3845_v40 = vpop.permute.xlu1 %3844 }
0x1e65   :  { %v6370_v43 = vpop.eup %6369 }
0x1e66   :  { %v3746_v20 = vsel %vm276_vm1, %v6370_v43, 0.0  ;;  %v6372_v2 = vpop.eup %6371 }
0x1e67   :  { %3747 = vadd.xlane.f32.xlu0 %v3746_v20  ;;  %v3743_v44 = vsel %vm276_vm1, %v6372_v2, 0.0 }
0x1e6b   :  { %3744 = vadd.xlane.f32.xlu0 %v3743_v44 }
0x1e81   :  { %6214 = vrot.lane.b32.xlu0 %v7338_v57, %s6445_s2 }
0x1ef4   :  { %v3748_v45 = vpop.xlane.xlu0 %3747 }
0x1ef5   :  { %6373 = vrcp.f32 %v3748_v45 }
0x1ef8   :  { %v3745_v9 = vpop.xlane.xlu0 %3744 }
0x1ef9   :  { %6375 = vrcp.f32 %v3745_v9 }
0x1efc   :  { %v6215_v47 = vpop.permute.xlu0 %6214 }
0x1efd   :  { %v6217_v49 = vunpack.i.h.bf16 %v6215_v47  ;;  %v6216_v0 = vunpack.i.l.bf16 %v6215_v47 }
0x1eff   :  { %v5986_v54 = vpack.c.bf16 %v6217_v49, %v6216_v0  ;;  %v6374_v46 = vpop.eup %6373 }
0x1f00   :  { %v3752_v55 = vmul.f32 %v6374_v46, %v6370_v43 }
0x1f01   :  { %5988 = vmatprep.subr.msk.bf16.mxu0 %vm6663_vm2, %v5986_v54 }
0x1f03   :  { %v6376_v27 = vpop.eup %6375 }
0x1f04   :  { %v3751_v53 = vmul.f32 %v6376_v27, %v6372_v2 }
0x1f06   :  { %5618 = vmatprep.mubr.msk.f32.mxu0 %vm276_vm1, %v3751_v53 }
0x1f07   :  { %5619 = vmatmul.mubr.msk.f32.vlgmr.msra.gmra.mrb[34].mxu0 %vm276_vm1, %v3752_v55 }
0x1f08   :  { %5991 = vmatpush3.bf16.xpose.msk.msra.mxu0 %vm6663_vm2, %v5986_v54  ;;  %5625 = vmatprep.mubr.msk.f32.mxu0 %vm276_vm1, %v3843_v58 }
0x1f0f   :  { %5626 = vmatmul.mubr.msk.f32.vlgmr.msra.gmra.mrb[36].mxu0 %vm276_vm1, %v3845_v40 }
0x1fda   :  { %v7404_v61 = vpop.f32.mrb[34].mxu0 }
0x1fdb   :  { %v7406_v8 = vpop.f32.mrb[35].mxu0 }
0x1fe2   :  { %v5627_v63 = vpop.f32.mrb[36].mxu0 }
0x1fe3   :  { %v3934_v1 = vmul.f32 0.25, %v5627_v63  ;;  %v3924_v4 = vpop.f32.mrb[37].mxu0 }
0x1fe4   :  { %v3933_v62 = vmul.f32 0.25, %v3924_v4 }
0x1fe5   :  { %v3936_v21 = vadd.f32 %v3934_v1, %v6814_v19 }
0x1fe6   :  { %v3935_v37 = vadd.f32 %v3933_v62, %v6814_v19 }
0x1fe7   :  { %v3940_v29 = vsel %vm276_vm1, %v3936_v21, -inf }
0x1fe8   :  { %3941 = vmax.xlane.f32.xlu1 %v3940_v29  ;;  %v3937_v34 = vsel %vm276_vm1, %v3935_v37, -inf }
0x1fe9   :  { %3938 = vmax.xlane.f32.xlu0 %v3937_v34  ;;  %v5062_v34 = vld [vmem:[%s7706_s6 + $0x40] sm:$0xff] }
0x1ff9   :  { %6219 = vrot.lane.b32.xlu1 %v7266_v56, %s6446_s23  ;;  %s4916_s23 = sshll.u32 %s6451_s22, 4  ;;  %s4917_s23 = int_to_ptr.vmem [resolvable:$true] %s4916_s23 }
0x1ffa   :  { %s6417_s19 = scalar_lea.vmem %s4917_s23, 32  ;;  %p6422_p1 = scmp.lt.s32.totalorder %s4917_s23, %s4917_s23 }
0x1ffb   :  { %p6418_p0 = scmp.ne.s32.totalorder %s4917_s23, %s6417_s19  ;;  %p6423_p2 = scmp.lt.s32.totalorder %s6417_s19, %s6417_s19 }
0x1ffd   :  { %4046 = vrot.lane.b32.xlu1 %v7334_v31, %s7730_s5  ;;  %p6424_p3 = por %p6423_p2, %p6422_p1 }
0x1fff   :  { %p6425_p4 = pnand %p6424_p3, %p6418_p0 }
0x2001   :  { %4048 = vrot.lane.b32.xlu1 %v7330_v22, %s7730_s5 }
0x2075   :  { %v3942_v13 = vpop.xlane.xlu1 %3941 }
0x2076   :  { %v3944_v60 = vsub.f32 %v3936_v21, %v3942_v13  ;;  %v3939_v39 = vpop.xlane.xlu0 %3938  ;;  %v5063_v13 = vld [vmem:[%s7706_s6 + $0x48] sm:$0xff] }
0x2077   :  { %v3943_v30 = vsub.f32 %v3935_v37, %v3939_v39 }
0x2078   :  { %v3947_v18 = vmul.f32 1.442695, %v3944_v60  ;;  %v6006_v60 = vpack.c.bf16 %v5063_v13, %v5062_v34 }
0x2079   :  { %v3945_v23 = vmul.f32 1.442695, %v3943_v30  ;;  %v6220_v35 = vpop.permute.xlu1 %6219 }
0x207a   :  { %6377 = vpow2.f32 %v3947_v18  ;;  %v6222_v6 = vunpack.i.h.bf16 %v6220_v35  ;;  %v6221_v11 = vunpack.i.l.bf16 %v6220_v35 }
0x207b   :  { %6379 = vpow2.f32 %v3945_v23 }
0x207c   :  { %v5992_v25 = vpack.c.bf16 %v6222_v6, %v6221_v11 }
0x207d   :  { %v4047_v9 = vpop.permute.xlu1 %4046 }
0x207e   :  { %5993 = vmatprep.subr.bf16.mxu1 %v5992_v25 }
0x207f   :  { %5995 = vmatpush3.bf16.msra.mxu1 %v5992_v25 }
0x2084   :  { %v6378_v59 = vpop.eup %6377 }
0x2085   :  { %v3952_v31 = vsel %vm276_vm1, %v6378_v59, 0.0  ;;  %v6380_v17 = vpop.eup %6379 }
0x2086   :  { %3953 = vadd.xlane.f32.xlu0 %v3952_v31  ;;  %v3949_v22 = vsel %vm276_vm1, %v6380_v17, 0.0 }
0x208a   :  { %3950 = vadd.xlane.f32.xlu0 %v3949_v22  ;;  %v5067_v22 = vld [vmem:[%s7706_s6 + $0x68] sm:$0xff] }
0x20a0   :  { %6224 = vrot.lane.b32.xlu0 %v7338_v57, %s6448_s25  ;;  %v4049_v57 = vpop.permute.xlu1 %4048 }
0x2113   :  { %v3954_v41 = vpop.xlane.xlu0 %3953 }
0x2114   :  { %6381 = vrcp.f32 %v3954_v41 }
0x2117   :  { %v3951_v7 = vpop.xlane.xlu0 %3950 }
0x2118   :  { %6383 = vrcp.f32 %v3951_v7 }
0x211b   :  { %v6225_v51 = vpop.permute.xlu0 %6224 }
0x211c   :  { %v6227_v14 = vunpack.i.h.bf16 %v6225_v51  ;;  %v6226_v5 = vunpack.i.l.bf16 %v6225_v51  ;;  %v5068_v51 = vld [vmem:[%s7706_s6 + $0x70] sm:$0xff] }
0x211e   :  { %v5996_v43 = vpack.c.bf16 %v6227_v14, %v6226_v5  ;;  %v6382_v20 = vpop.eup %6381  ;;  %v5069_v14 = vld [vmem:[%s7706_s6 + $0x78] sm:$0xff] }
0x211f   :  { %v3958_v45 = vmul.f32 %v6382_v20, %v6378_v59 }
0x2120   :  { %5998 = vmatprep.subr.msk.bf16.mxu1 %vm6663_vm2, %v5996_v43 }
0x2122   :  { %v6384_v2 = vpop.eup %6383 }
0x2123   :  { %v3957_v44 = vmul.f32 %v6384_v2, %v6380_v17 }
0x2125   :  { %5632 = vmatprep.mubr.msk.f32.mxu1 %vm276_vm1, %v3957_v44 }
0x2126   :  { %5633 = vmatmul.mubr.msk.f32.vlgmr.msra.gmra.mrb[48].mxu1 %vm276_vm1, %v3958_v45 }
0x2127   :  { %6001 = vmatpush3.bf16.xpose.msk.msra.mxu1 %vm6663_vm2, %v5996_v43  ;;  %5639 = vmatprep.mubr.msk.f32.mxu1 %vm276_vm1, %v4047_v9  ;;  %v6018_v43 = vpack.c.bf16 %v5069_v14, %v5068_v51 }
0x212e   :  { %5640 = vmatmul.mubr.msk.f32.vlgmr.msra.gmra.mrb[50].mxu1 %vm276_vm1, %v4049_v57 }
0x21f9   :  { %v5634_v47 = vpop.f32.mrb[48].mxu1 }
0x21fa   :  { %v4037_v49 = vpop.f32.mrb[49].mxu1 }
0x2201   :  { %v5641_v0 = vpop.f32.mrb[50].mxu1 }
0x2202   :  { %v4138_v54 = vmul.f32 0.25, %v5641_v0  ;;  %v4128_v46 = vpop.f32.mrb[51].mxu1  ;;  %v5071_v0 = vld [vmem:[%s7707_s7 + $0x1] ss:$0 sm:$0xff] }
0x2203   :  { %v4137_v27 = vmul.f32 0.25, %v4128_v46 }
0x2204   :  { %v4140_v53 = vadd.f32 %v4138_v54, %v6814_v19 }
0x2205   :  { %v4139_v55 = vadd.f32 %v4137_v27, %v6814_v19 }
0x2206   :  { %v4144_v58 = vsel %vm276_vm1, %v4140_v53, -inf }
0x2207   :  { %4145 = vmax.xlane.f32.xlu1 %v4144_v58  ;;  %v4141_v12 = vsel %vm276_vm1, %v4139_v55, -inf }
0x2208   :  { %4142 = vmax.xlane.f32.xlu0 %v4141_v12 }
0x2218   :  { %6229 = vrot.lane.b32.xlu1 %v7266_v56, %s7730_s5 }
0x221c   :  { %3414 = vrot.lane.b32.xlu1 %v7314_v52, %s6448_s25 }
0x2220   :  { %3420 = vrot.lane.b32.xlu1 %v7320_v24, %s6445_s2 }
0x2224   :  { %3428 = vrot.lane.b32.xlu1 %v7356_v36, %s6443_s29 }
0x2228   :  { %4252 = vrot.lane.b32.xlu1 %v7406_v8, %s6448_s25 }
0x222c   :  { %4260 = vrot.lane.b32.xlu1 %v4037_v49, %s6445_s2 }
0x2294   :  { %v4146_v19 = vpop.xlane.xlu1 %4145 }
0x2295   :  { %v4148_v40 = vsub.f32 %v4140_v53, %v4146_v19  ;;  %v4143_v63 = vpop.xlane.xlu0 %4142 }
0x2296   :  { %v4147_v1 = vsub.f32 %v4139_v55, %v4143_v63 }
0x2297   :  { %v4151_v4 = vmul.f32 1.442695, %v4148_v40 }
0x2298   :  { %v4149_v56 = vmul.f32 1.442695, %v4147_v1  ;;  %v6230_v62 = vpop.permute.xlu1 %6229 }
0x2299   :  { %v6232_v21 = vunpack.i.h.bf16 %v6230_v62  ;;  %v6231_v52 = vunpack.i.l.bf16 %v6230_v62 }
0x229a   :  { %6385 = vpow2.f32 %v4149_v56 }
0x229b   :  { %v6002_v37 = vpack.c.bf16 %v6232_v21, %v6231_v52  ;;  %6387 = vpow2.f32 %v4151_v4 }
0x229c   :  { %v3415_v30 = vpop.permute.xlu1 %3414 }
0x229d   :  { %6003 = vmatprep.subr.bf16.mxu0 %v6002_v37  ;;  %v3435_v2 = vsel %vm276_vm1, %v7310_v50, %v3415_v30 }
0x229e   :  { %6005 = vmatpush3.bf16.msra.mxu0 %v6002_v37 }
0x229f   :  { %6007 = vmatprep.subr.bf16.mxu0 %v6006_v60 }
0x22a0   :  { %v3421_v35 = vpop.permute.xlu1 %3420 }
0x22a4   :  { %v6386_v24 = vpop.eup %6385  ;;  %v3429_v17 = vpop.permute.xlu1 %3428 }
0x22a5   :  { %v4153_v36 = vsel %vm276_vm1, %v6386_v24, 0.0  ;;  %v6388_v8 = vpop.eup %6387 }
0x22a6   :  { %4154 = vadd.xlane.f32.xlu0 %v4153_v36  ;;  %v4156_v29 = vsel %vm276_vm1, %v6388_v8, 0.0 }
0x22a8   :  { %v4253_v12 = vpop.permute.xlu1 %4252 }
0x22a9   :  { %v4274_v63 = vsel %vm276_vm1, %v7380_v32, %v4253_v12 }
0x22aa   :  { %4157 = vadd.xlane.f32.xlu0 %v4156_v29 }
0x22ac   :  { %v4261_v40 = vpop.permute.xlu1 %4260 }
0x22ad   :  { %v4276_v4 = vsel %vm1111_vm3, %v4274_v63, %v4261_v40 }
0x22c0   :  { %3412 = vrot.lane.b32.xlu0 %v7316_v28, %s6448_s25 }
0x22c4   :  { %3422 = vrot.lane.b32.xlu0 %v7318_v10, %s6445_s2 }
0x22c8   :  { %3430 = vrot.lane.b32.xlu0 %v7354_v38, %s6443_s29  ;;  %v5064_v38 = vld [vmem:[%s7706_s6 + $0x50] sm:$0xff] }
0x22cc   :  { %4254 = vrot.lane.b32.xlu0 %v7404_v61, %s6448_s25  ;;  %v5065_v61 = vld [vmem:[%s7706_s6 + $0x58] sm:$0xff] }
0x22cd   :  { %v6010_v31 = vpack.c.bf16 %v5065_v61, %v5064_v38  ;;  %v5082_v38 = vld [vmem:[%s7710_s10 + $0x50] sm:$0xff]  ;;  %v5083_v61 = vld [vmem:[%s7710_s10 + $0x58] sm:$0xff] }
0x22d0   :  { %4262 = vrot.lane.b32.xlu0 %v5634_v47, %s6445_s2 }
0x2333   :  { %v4155_v28 = vpop.xlane.xlu0 %4154 }
0x2334   :  { %6389 = vrcp.f32 %v4155_v28 }
0x2337   :  { %v4158_v39 = vpop.xlane.xlu0 %4157 }
0x2338   :  { %6391 = vrcp.f32 %v4158_v39 }
0x233b   :  { %v3413_v18 = vpop.permute.xlu0 %3412 }
0x233c   :  { %v3434_v10 = vsel %vm276_vm1, %v7312_v16, %v3413_v18  ;;  %v5066_v16 = vld [vmem:[%s7706_s6 + $0x60] sm:$0xff] }
0x233d   :  { %v3436_v25 = vsel %vm1111_vm3, %v3434_v10, %v3421_v35  ;;  %v6014_v7 = vpack.c.bf16 %v5067_v22, %v5066_v16  ;;  %v5087_v16 = vld [vmem:[%s7710_s10 + $0x78] sm:$0xff] }
0x233e   :  { %v6390_v23 = vpop.eup %6389  ;;  %v3438_v41 = vsel %vm1114_vm4, %v3436_v25, %v3429_v17  ;;  %v5084_v25 = vld [vmem:[%s7710_s10 + $0x60] sm:$0xff]  ;;  %v5086_v17 = vld [vmem:[%s7710_s10 + $0x70] sm:$0xff] }
0x233f   :  { %v4161_v6 = vmul.f32 %v6390_v23, %v6386_v24  ;;  %v3423_v5 = vpop.permute.xlu0 %3422  ;;  %v6034_v22 = vpack.c.bf16 %v5087_v16, %v5086_v17 }
0x2340   :  { %v3437_v44 = vsel %vm1111_vm3, %v3435_v2, %v3423_v5 }
0x2341   :  { %5646 = vmatprep.mubr.msk.f32.mxu0 %vm276_vm1, %v4161_v6 }
0x2342   :  { %v6392_v11 = vpop.eup %6391 }
0x2343   :  { %v4162_v59 = vmul.f32 %v6392_v11, %v6388_v8  ;;  %v3431_v20 = vpop.permute.xlu0 %3430  ;;  %v6026_v11 = vpack.c.bf16 %v5083_v61, %v5082_v38 }
0x2344   :  { %v3439_v45 = vsel %vm1114_vm4, %v3437_v44, %v3431_v20 }
0x2345   :  { %5647 = vmatmul.mubr.msk.f32.vlgmr.msra.gmra.mrb[38].mxu0 %vm276_vm1, %v4162_v59  ;;  %v5085_v59 = vld [vmem:[%s7710_s10 + $0x68] sm:$0xff] }
0x2346   :  { %6009 = vmatpush3.bf16.msra.mxu0 %v6006_v60  ;;  %5665 = vmatprep.mubr.msk.f32.mxu0 %vm67_vm0, %v3438_v41 }
0x2347   :  { %6011 = vmatprep.subr.bf16.mxu0 %v6010_v31  ;;  %v4255_v58 = vpop.permute.xlu0 %4254 }
0x234a   :  { %6013 = vmatpush3.bf16.msra.mxu0 %v6010_v31  ;;  %v6030_v31 = vpack.c.bf16 %v5085_v59, %v5084_v25 }
0x234b   :  { %6015 = vmatprep.subr.bf16.mxu0 %v6014_v7  ;;  %v4263_v19 = vpop.permute.xlu0 %4262 }
0x234e   :  { %6017 = vmatpush3.bf16.msra.mxu0 %v6014_v7 }
0x234f   :  { %6019 = vmatprep.subr.bf16.mxu0 %v6018_v43 }
0x2352   :  { %6021 = vmatpush3.bf16.msra.mxu0 %v6018_v43 }
0x2355   :  { %5666 = vmatmul.mubr.msk.f32.vlgmr.msra.gmra.mrb[40].mxu0 %vm67_vm0, %v3439_v45 }
0x2418   :  { %v5648_v9 = vpop.f32.mrb[38].mxu0 }
0x2419   :  { %4270 = vrot.lane.b32.xlu0 %v5648_v9, %s6443_s29  ;;  %v4241_v57 = vpop.f32.mrb[39].mxu0 }
0x241a   :  { %4268 = vrot.lane.b32.xlu1 %v4241_v57, %s6443_s29 }
0x2428   :  { %v5667_v47 = vpop.f32.mrb[40].mxu0 }
0x2429   :  { %v4375_v49 = vpop.f32.mrb[41].mxu0  ;;  %v4381_v50 = vadd.f32 %v5667_v47, %v5071_v0 }
0x242a   :  { %v4376_v46 = vadd.f32 %v5071_v0, %v4375_v49 }
0x242b   :  { %v4395_v54 = vadd.f32 %v4381_v50, %v7185_v48  ;;  %v4275_v48 = vsel %vm276_vm1, %v7378_v15, %v4255_v58  ;;  %v5079_v58 = vld [vmem:[%s7709_s9 + $0x1] ss:$0 sm:$0xff] }
0x242c   :  { %v4394_v53 = vadd.f32 %v4376_v46, %v7180_v42  ;;  %v4277_v62 = vsel %vm1111_vm3, %v4275_v48, %v4263_v19  ;;  %v7554_v46 = vld [vmem:[%s7708_s8 + $0x1] ss:$0 sm:$0xff]  ;;  %v5096_v48 = vld [vmem:[%s7712_s12 + $0x90] sm:$0xff] }
0x242d   :  { %v4405_v27 = vsel %vm67_vm0, %v4395_v54, 0.0 }
0x242e   :  { %v4402_v55 = vsel %vm67_vm0, %v4394_v53, 0.0 }
0x2438   :  { %4406 = vadd.xlane.f32.xlu0 %v4405_v27 }
0x243e   :  { %4403 = vadd.xlane.f32.xlu1 %v4402_v55 }
0x248b   :  { %v4271_v1 = vpop.permute.xlu0 %4270 }
0x248c   :  { %v4269_v56 = vpop.permute.xlu1 %4268  ;;  %v4279_v21 = vsel %vm1114_vm4, %v4277_v62, %v4271_v1  ;;  %v5094_v1 = vld [vmem:[%s7712_s12 + $0x80] sm:$0xff]  ;;  %v5097_v62 = vld [vmem:[%s7712_s12 + $0x98] sm:$0xff] }
0x248d   :  { %v4278_v42 = vsel %vm1114_vm4, %v4276_v4, %v4269_v56  ;;  %v5095_v4 = vld [vmem:[%s7712_s12 + $0x88] sm:$0xff] }
0x248e   :  { %5668 = vmatprep.mubr.msk.f32.mxu0 %vm67_vm0, %v4278_v42  ;;  %v6038_v56 = vpack.c.bf16 %v5095_v4, %v5094_v1  ;;  %v6042_v42 = vpack.c.bf16 %v5097_v62, %v5096_v48 }
0x248f   :  { %5669 = vmatmul.mubr.msk.f32.gmra.mrb[42].mxu0 %vm67_vm0, %v4279_v21  ;;  %v5098_v21 = vld [vmem:[%s7712_s12 + $0xa0] sm:$0xff] }
0x2490   :  { %6039 = vmatprep.subr.bf16.mxu0 %v6038_v56 }
0x2491   :  { %6041 = vmatpush3.bf16.msra.mxu0 %v6038_v56 }
0x2492   :  { %6043 = vmatprep.subr.bf16.mxu0 %v6042_v42 }
0x2495   :  { %6045 = vmatpush3.bf16.msra.mxu0 %v6042_v42 }
0x24c5   :  { %v4407_v52 = vpop.xlane.xlu0 %4406 }
0x24c6   :  { %v4415_v32 = vmul.f32 0.015625, %v4407_v52  ;;  %v5099_v52 = vld [vmem:[%s7712_s12 + $0xa8] sm:$0xff] }
0x24c8   :  { %v4419_v8 = vsub.f32 %v4395_v54, %v4415_v32  ;;  %v5100_v32 = vld [vmem:[%s7712_s12 + $0xb0] sm:$0xff] }
0x24ca   :  { %v4423_v30 = vmul.f32 %v4419_v8, %v4419_v8 }
0x24cb   :  { %v4404_v37 = vpop.xlane.xlu1 %4403 }
0x24cc   :  { %v4414_v24 = vmul.f32 0.015625, %v4404_v37  ;;  %v4429_v35 = vsel %vm67_vm0, %v4423_v30, 0.0  ;;  %v6046_v37 = vpack.c.bf16 %v5099_v52, %v5098_v21  ;;  %v5111_v21 = vld [vmem:[%s7713_s13 + $0x1] ss:$0 sm:$0xff] }
0x24ce   :  { %v4418_v15 = vsub.f32 %v4394_v53, %v4414_v24  ;;  %6047 = vmatprep.subr.bf16.mxu0 %v6046_v37  ;;  %v5101_v24 = vld [vmem:[%s7712_s12 + $0xb8] sm:$0xff] }
0x24cf   :  { %6049 = vmatpush3.bf16.msra.mxu0 %v6046_v37 }
0x24d0   :  { %v4422_v23 = vmul.f32 %v4418_v15, %v4418_v15 }
0x24d2   :  { %v4426_v10 = vsel %vm67_vm0, %v4422_v23, 0.0  ;;  %v5109_v23 = vld [vmem:[%s7712_s12 + $0xf8] sm:$0xff] }
0x2562   :  { %v5670_v36 = vpop.f32.mrb[42].mxu0 }
0x2563   :  { %v4391_v29 = vadd.f32 %v5670_v36, %v5071_v0  ;;  %v4385_v34 = vpop.f32.mrb[43].mxu0  ;;  %v6050_v36 = vpack.c.bf16 %v5101_v24, %v5100_v32 }
0x2564   :  { %v4386_v13 = vadd.f32 %v5071_v0, %v4385_v34 }
0x2565   :  { %v4397_v60 = vadd.f32 %v4391_v29, %v7234_v26  ;;  %v5080_v26 = vld [vmem:[%s7710_s10 + $0x40] sm:$0xff]  ;;  %6051 = vmatprep.subr.bf16.mxu0 %v6050_v36  ;;  %v5103_v29 = vld [vmem:[%s7712_s12 + $0xc8] sm:$0xff] }
0x2566   :  { %v4396_v28 = vadd.f32 %v4386_v13, %v7229_v3  ;;  %v5081_v3 = vld [vmem:[%s7710_s10 + $0x48] sm:$0xff]  ;;  %6053 = vmatpush3.bf16.msra.mxu0 %v6050_v36  ;;  %v5105_v13 = vld [vmem:[%s7712_s12 + $0xd8] sm:$0xff] }
0x2567   :  { %v4411_v39 = vsel %vm67_vm0, %v4397_v60, 0.0  ;;  %v6022_v6 = vpack.c.bf16 %v5081_v3, %v5080_v26 }
0x2568   :  { %4412 = vadd.xlane.f32.xlu1 %v4411_v39  ;;  %v4408_v18 = vsel %vm67_vm0, %v4396_v28, 0.0  ;;  %v5107_v39 = vld [vmem:[%s7712_s12 + $0xe8] sm:$0xff] }
0x2569   :  { %4409 = vadd.xlane.f32.xlu0 %v4408_v18  ;;  %6023 = vmatprep.subr.bf16.mxu1 %v6022_v6  ;;  %v5108_v18 = vld [vmem:[%s7712_s12 + $0xf0] sm:$0xff] }
0x256a   :  { %6025 = vmatpush3.bf16.msra.mxu1 %v6022_v6 }
0x256b   :  { %6027 = vmatprep.subr.bf16.mxu1 %v6026_v11 }
0x256c   :  { %4430 = vadd.xlane.f32.xlu1 %v4429_v35  ;;  %v6066_v35 = vpack.c.bf16 %v5109_v23, %v5108_v18 }
0x256d   :  { %4427 = vadd.xlane.f32.xlu0 %v4426_v10 }
0x256e   :  { %6029 = vmatpush3.bf16.msra.mxu1 %v6026_v11 }
0x256f   :  { %6031 = vmatprep.subr.bf16.mxu1 %v6030_v31 }
0x2572   :  { %6033 = vmatpush3.bf16.msra.mxu1 %v6030_v31 }
0x2573   :  { %6035 = vmatprep.subr.bf16.mxu1 %v6034_v22 }
0x2576   :  { %6037 = vmatpush3.bf16.msra.mxu1 %v6034_v22 }
0x25f5   :  { %v4413_v41 = vpop.xlane.xlu1 %4412 }
0x25f6   :  { %v4417_v7 = vmul.f32 0.015625, %v4413_v41  ;;  %v4410_v51 = vpop.xlane.xlu0 %4409 }
0x25f7   :  { %v4416_v14 = vmul.f32 0.015625, %v4410_v51 }
0x25f8   :  { %v7541_v5 = vsub.f32 %v4397_v60, %v4417_v7  ;;  %v5089_v7 = vld [vmem:[%s7711_s11 + $0x1] ss:$0 sm:$0xff] }
0x25f9   :  { %v7543_v43 = vsub.f32 %v4396_v28, %v4416_v14  ;;  %v4431_v20 = vpop.xlane.xlu1 %4430  ;;  %v5106_v28 = vld [vmem:[%s7712_s12 + $0xe0] sm:$0xff] }
0x25fa   :  { %v4439_v2 = vmul.f32 0.015625, %v4431_v20  ;;  %v4428_v44 = vpop.xlane.xlu0 %4427  ;;  %v4425_v45 = vmul.f32 %v7541_v5, %v7541_v5  ;;  %v6062_v30 = vpack.c.bf16 %v5107_v39, %v5106_v28 }
0x25fb   :  { %v4438_v9 = vmul.f32 0.015625, %v4428_v44  ;;  %v4424_v57 = vmul.f32 %v7543_v43, %v7543_v43 }
0x25fc   :  { %v4443_v47 = vadd.f32 1e-05, %v4439_v2  ;;  %v4435_v49 = vsel %vm67_vm0, %v4425_v45, 0.0 }
0x25fd   :  { %v4442_v0 = vadd.f32 1e-05, %v4438_v9  ;;  %4436 = vadd.xlane.f32.xlu1 %v4435_v49  ;;  %v4432_v50 = vsel %vm67_vm0, %v4424_v57, 0.0 }
0x25fe   :  { %6393 = vrsqrt.f32 %v4443_v47  ;;  %4433 = vadd.xlane.f32.xlu0 %v4432_v50 }
0x25ff   :  { %6395 = vrsqrt.f32 %v4442_v0 }
0x2608   :  { %v6394_v54 = vpop.eup %6393 }
0x2609   :  { %v6396_v27 = vpop.eup %6395  ;;  %v4451_v53 = vmul.f32 %v6394_v54, %v4419_v8  ;;  %v5102_v8 = vld [vmem:[%s7712_s12 + $0xc0] sm:$0xff] }
0x260a   :  { %v4450_v55 = vmul.f32 %v6396_v27, %v4418_v15  ;;  %v6054_v34 = vpack.c.bf16 %v5103_v29, %v5102_v8  ;;  %v5104_v15 = vld [vmem:[%s7712_s12 + $0xd0] sm:$0xff] }
0x260b   :  { %v4461_v12 = vmul.f32 %v7554_v46, %v4451_v53  ;;  %v6058_v60 = vpack.c.bf16 %v5105_v13, %v5104_v15 }
0x260c   :  { %v4460_v19 = vmul.f32 %v7554_v46, %v4450_v55  ;;  %6055 = vmatprep.subr.bf16.mxu0 %v6054_v34 }
0x260d   :  { %v7563_v63 = vadd.f32 %v5079_v58, %v4461_v12  ;;  %6057 = vmatpush3.bf16.msra.mxu0 %v6054_v34 }
0x260e   :  { %v7561_v40 = vadd.f32 %v5079_v58, %v4460_v19  ;;  %6059 = vmatprep.subr.bf16.mxu0 %v6058_v60 }
0x2610   :  { %5687 = vmatprep.mubr.msk.f32.mxu1 %vm67_vm0, %v7561_v40 }
0x2611   :  { %5688 = vmatmul.mubr.msk.f32.vlgmr.msra.gmra.mrb[52].mxu1 %vm67_vm0, %v7563_v63  ;;  %6061 = vmatpush3.bf16.msra.mxu0 %v6058_v60 }
0x2612   :  { %6063 = vmatprep.subr.bf16.mxu0 %v6062_v30 }
0x2615   :  { %6065 = vmatpush3.bf16.msra.mxu0 %v6062_v30 }
0x2616   :  { %6067 = vmatprep.subr.bf16.mxu0 %v6066_v35 }
0x2619   :  { %6069 = vmatpush3.bf16.msra.mxu0 %v6066_v35 }
0x268a   :  { %v4437_v10 = vpop.xlane.xlu1 %4436 }
0x268b   :  { %v4441_v26 = vmul.f32 0.015625, %v4437_v10  ;;  %v4434_v3 = vpop.xlane.xlu0 %4433 }
0x268c   :  { %v4440_v6 = vmul.f32 0.015625, %v4434_v3 }
0x268d   :  { %v4445_v38 = vadd.f32 1e-05, %v4441_v26 }
0x268e   :  { %v4444_v61 = vadd.f32 1e-05, %v4440_v6 }
0x268f   :  { %6397 = vrsqrt.f32 %v4445_v38 }
0x2690   :  { %6399 = vrsqrt.f32 %v4444_v61 }
0x2699   :  { %v6398_v11 = vpop.eup %6397 }
0x269a   :  { %v6400_v25 = vpop.eup %6399  ;;  %v4453_v59 = vmul.f32 %v6398_v11, %v7541_v5 }
0x269b   :  { %v4452_v31 = vmul.f32 %v6400_v25, %v7543_v43 }
0x269c   :  { %v4463_v17 = vmul.f32 %v7554_v46, %v4453_v59 }
0x269d   :  { %v4462_v16 = vmul.f32 %v7554_v46, %v4452_v31 }
0x269e   :  { %v4473_v41 = vadd.f32 %v5079_v58, %v4463_v17 }
0x269f   :  { %v4472_v22 = vadd.f32 %v5079_v58, %v4462_v16 }
0x26a1   :  { %5690 = vmatprep.mubr.msk.f32.mxu1 %vm67_vm0, %v4472_v22 }
0x26a2   :  { %5691 = vmatmul.mubr.msk.f32.gmra.mrb[54].mxu1 %vm67_vm0, %v4473_v41 }
0x26a3   :  { %5747 = vmatprep.mubr.msk.f32.mxu1 %vm6450_vm5, %v6441_v33  ;;  %v4828_v33 = vld [vmem:[%s7716_s16 + $0x38] sm:$0xff] }
0x26e4   :  { %v5689_v51 = vpop.f32.mrb[52].mxu1 }
0x26e5   :  { %v4575_v14 = vadd.f32 %v5689_v51, %v5089_v7  ;;  %v4569_v20 = vpop.f32.mrb[53].mxu1 }
0x26e6   :  { %v4570_v5 = vadd.f32 %v5089_v7, %v4569_v20  ;;  %v4821_v20 = vld [vmem:[%s7716_s16] sm:$0xff] }
0x26e7   :  { %v4593_v2 = vmul.f32 0.70710677, %v4575_v14  ;;  %v4589_v49 = vmul.f32 0.5, %v4575_v14 }
0x26e8   :  { %v4592_v43 = vmul.f32 0.70710677, %v4570_v5  ;;  %v4588_v57 = vmul.f32 0.5, %v4570_v5  ;;  %v4822_v5 = vld [vmem:[%s7716_s16 + $0x8] sm:$0xff] }
0x26e9   :  { %6401 = verf.f32 %v4593_v2  ;;  %v4823_v2 = vld [vmem:[%s7716_s16 + $0x10] sm:$0xff] }
0x26ea   :  { %6403 = verf.f32 %v4592_v43  ;;  %v6449_v43 = vmov 0.0|0.0  }
0x26eb   :  { %6070 = vmatprep.subr.bf16.mxu1 %v6449_v43 }
0x26f3   :  { %v6402_v44 = vpop.eup %6401 }
0x26f4   :  { %v6404_v45 = vpop.eup %6403  ;;  %v4601_v9 = vadd.f32 1.0, %v6402_v44  ;;  %v6071_v44 = vpack.c.bf16 %v4822_v5, %v4821_v20  ;;  %v5116_v20 = vld [vmem:[%s7717_s17] ss:$0 sm:$0xff] }
0x26f5   :  { %v4600_v47 = vadd.f32 1.0, %v6404_v45  ;;  %v4824_v45 = vld [vmem:[%s7716_s16 + $0x18] sm:$0xff] }
0x26f6   :  { %v4605_v50 = vmul.f32 %v4601_v9, %v4589_v49  ;;  %6072 = vmatpush3.bf16.msra.mxu1 %v6071_v44  ;;  %v6074_v9 = vpack.c.bf16 %v4824_v45, %v4823_v2 }
0x26f7   :  { %v4604_v0 = vmul.f32 %v4600_v47, %v4588_v57  ;;  %6073 = vmatprep.subr.bf16.mxu1 %v6449_v43  ;;  %v4825_v57 = vld [vmem:[%s7716_s16 + $0x20] sm:$0xff]  ;;  %v4826_v47 = vld [vmem:[%s7716_s16 + $0x28] sm:$0xff] }
0x26f8   :  { %v6077_v49 = vpack.c.bf16 %v4826_v47, %v4825_v57 }
0x26f9   :  { %5725 = vmatprep.mubr.f32.mxu0 %v4604_v0  ;;  %v4827_v0 = vld [vmem:[%s7716_s16 + $0x30] sm:$0xff] }
0x26fa   :  { %5726 = vmatmul.mubr.f32.vlgmr.msra.gmra.mrb[44].mxu0 %v4605_v50  ;;  %6075 = vmatpush3.bf16.msra.mxu1 %v6074_v9  ;;  %v6080_v50 = vpack.c.bf16 %v4828_v33, %v4827_v0 }
0x26fb   :  { %6076 = vmatprep.subr.bf16.mxu1 %v6449_v43 }
0x26fe   :  { %6078 = vmatpush3.bf16.msra.mxu1 %v6077_v49 }
0x26ff   :  { %6079 = vmatprep.subr.bf16.mxu1 %v6449_v43 }
0x2702   :  { %6081 = vmatpush3.bf16.msra.mxu1 %v6080_v50 }
0x2775   :  { %v5692_v54 = vpop.f32.mrb[54].mxu1 }
0x2776   :  { %v4585_v46 = vadd.f32 %v5692_v54, %v5089_v7  ;;  %v4579_v27 = vpop.f32.mrb[55].mxu1 }
0x2777   :  { %v4580_v53 = vadd.f32 %v5089_v7, %v4579_v27 }
0x2778   :  { %v4595_v55 = vmul.f32 0.70710677, %v4585_v46  ;;  %v4591_v56 = vmul.f32 0.5, %v4585_v46 }
0x2779   :  { %v4594_v58 = vmul.f32 0.70710677, %v4580_v53  ;;  %v4590_v4 = vmul.f32 0.5, %v4580_v53 }
0x277a   :  { %6405 = verf.f32 %v4595_v55 }
0x277b   :  { %6407 = verf.f32 %v4594_v58 }
0x2784   :  { %v6406_v12 = vpop.eup %6405 }
0x2785   :  { %v6408_v19 = vpop.eup %6407  ;;  %v4603_v1 = vadd.f32 1.0, %v6406_v12 }
0x2786   :  { %v4602_v48 = vadd.f32 1.0, %v6408_v19 }
0x2787   :  { %v4607_v42 = vmul.f32 %v4603_v1, %v4591_v56 }
0x2788   :  { %v4606_v62 = vmul.f32 %v4602_v48, %v4590_v4  ;;  %v5114_v48 = vld [vmem:[%s7714_s14 + $0x1] ss:$0 sm:$0xff] }
0x278a   :  { %5728 = vmatprep.mubr.f32.mxu0 %v4606_v62 }
0x278b   :  { %5729 = vmatmul.mubr.f32.gmra.mrb[46].mxu0 %v4607_v42  ;;  %v5115_v42 = vld [vmem:[%s7715_s15 + $0x1] ss:$0 sm:$0xff] }
0x27cd   :  { %v5727_v52 = vpop.f32.mrb[44].mxu0 }
0x27ce   :  { %v4705_v37 = vadd.f32 %v5727_v52, %v5111_v21  ;;  %v4699_v32 = vpop.f32.mrb[45].mxu0 }
0x27cf   :  { %v4700_v24 = vadd.f32 %v5111_v21, %v4699_v32 }
0x27d0   :  { %v4719_v36 = vadd.f32 %v4705_v37, %v7563_v63 }
0x27d1   :  { %v4718_v8 = vadd.f32 %v4700_v24, %v7561_v40 }
0x27d2   :  { %v4729_v29 = vsel %vm67_vm0, %v4719_v36, 0.0 }
0x27d3   :  { %4730 = vadd.xlane.f32.xlu1 %v4729_v29  ;;  %v4726_v34 = vsel %vm67_vm0, %v4718_v8, 0.0 }
0x27d4   :  { %4727 = vadd.xlane.f32.xlu0 %v4726_v34 }
0x285e   :  { %v5730_v15 = vpop.f32.mrb[46].mxu0 }
0x285f   :  { %v4715_v13 = vadd.f32 %v5730_v15, %v5111_v21  ;;  %v4709_v60 = vpop.f32.mrb[47].mxu0 }
0x2860   :  { %v4710_v28 = vadd.f32 %v5111_v21, %v4709_v60  ;;  %v4731_v39 = vpop.xlane.xlu1 %4730 }
0x2861   :  { %v4721_v30 = vadd.f32 %v4715_v13, %v4473_v41  ;;  %v4739_v18 = vmul.f32 0.015625, %v4731_v39  ;;  %v4728_v23 = vpop.xlane.xlu0 %4727 }
0x2862   :  { %v4720_v35 = vadd.f32 %v4710_v28, %v4472_v22  ;;  %v4738_v10 = vmul.f32 0.015625, %v4728_v23 }
0x2863   :  { %v4743_v26 = vsub.f32 %v4719_v36, %v4739_v18  ;;  %v4735_v63 = vsel %vm67_vm0, %v4721_v30, 0.0 }
0x2864   :  { %v4742_v40 = vsub.f32 %v4718_v8, %v4738_v10  ;;  %4736 = vadd.xlane.f32.xlu1 %v4735_v63  ;;  %v4732_v3 = vsel %vm67_vm0, %v4720_v35, 0.0 }
0x2865   :  { %4733 = vadd.xlane.f32.xlu0 %v4732_v3  ;;  %v4747_v6 = vmul.f32 %v4743_v26, %v4743_v26 }
0x2866   :  { %v4746_v38 = vmul.f32 %v4742_v40, %v4742_v40 }
0x2867   :  { %v4753_v61 = vsel %vm67_vm0, %v4747_v6, 0.0 }
0x2868   :  { %4754 = vadd.xlane.f32.xlu1 %v4753_v61  ;;  %v4750_v11 = vsel %vm67_vm0, %v4746_v38, 0.0 }
0x2869   :  { %4751 = vadd.xlane.f32.xlu0 %v4750_v11 }
0x28f1   :  { %v4737_v25 = vpop.xlane.xlu1 %4736 }
0x28f2   :  { %v4741_v59 = vmul.f32 0.015625, %v4737_v25  ;;  %v4734_v31 = vpop.xlane.xlu0 %4733 }
0x28f3   :  { %v4740_v17 = vmul.f32 0.015625, %v4734_v31 }
0x28f4   :  { %v7637_v16 = vsub.f32 %v4721_v30, %v4741_v59 }
0x28f5   :  { %v7639_v22 = vsub.f32 %v4720_v35, %v4740_v17  ;;  %v4755_v54 = vpop.xlane.xlu1 %4754 }
0x28f6   :  { %v4749_v41 = vmul.f32 %v7637_v16, %v7637_v16  ;;  %v4752_v46 = vpop.xlane.xlu0 %4751  ;;  %v4763_v27 = vmul.f32 0.015625, %v4755_v54 }
0x28f7   :  { %v4748_v7 = vmul.f32 %v7639_v22, %v7639_v22  ;;  %v4762_v53 = vmul.f32 0.015625, %v4752_v46 }
0x28f8   :  { %v4759_v51 = vsel %vm67_vm0, %v4749_v41, 0.0  ;;  %v4767_v55 = vadd.f32 1e-05, %v4763_v27 }
0x28f9   :  { %4760 = vadd.xlane.f32.xlu1 %v4759_v51  ;;  %v4756_v14 = vsel %vm67_vm0, %v4748_v7, 0.0  ;;  %v4766_v58 = vadd.f32 1e-05, %v4762_v53 }
0x28fa   :  { %4757 = vadd.xlane.f32.xlu0 %v4756_v14  ;;  %6409 = vrsqrt.f32 %v4767_v55 }
0x28fb   :  { %6411 = vrsqrt.f32 %v4766_v58 }
0x2904   :  { %v6410_v12 = vpop.eup %6409 }
0x2905   :  { %v6412_v19 = vpop.eup %6411  ;;  %v4775_v1 = vmul.f32 %v6410_v12, %v4743_v26 }
0x2906   :  { %v4774_v4 = vmul.f32 %v6412_v19, %v4742_v40 }
0x2907   :  { %v4785_v56 = vmul.f32 %v5114_v48, %v4775_v1 }
0x2908   :  { %v4784_v62 = vmul.f32 %v5114_v48, %v4774_v4 }
0x2909   :  { %v4795_v24 = vadd.f32 %v5115_v42, %v4785_v56 }
0x290a   :  { %v4794_v36 = vadd.f32 %v5115_v42, %v4784_v62 }
0x290b   :  { %v4799_v34 = vsel %vm67_vm0, %v4795_v24, 0.0 }
0x290c   :  { %v4798_v15 = vsel %vm67_vm0, %v4794_v36, 0.0 }
0x290d   :  { %v4800_v13 = vadd.f32 %v4799_v34, %v4798_v15 }
0x290f   :  { %v4801_v60 = vrot.slane %v4800_v13, 4 }
0x2911   :  { %v4802_v35 = vadd.f32 %v4801_v60, %v4800_v13 }
0x2913   :  { %v4803_v3 = vrot.slane %v4802_v35, 2 }
0x2915   :  { %v4804_v61 = vadd.f32 %v4803_v3, %v4802_v35 }
0x2917   :  { %v4805_v59 = vrot.slane %v4804_v61, 1 }
0x2986   :  { %v4761_v21 = vpop.xlane.xlu1 %4760 }
0x2987   :  { %v4765_v52 = vmul.f32 0.015625, %v4761_v21  ;;  %v4758_v37 = vpop.xlane.xlu0 %4757 }
0x2988   :  { %v4764_v32 = vmul.f32 0.015625, %v4758_v37 }
0x2989   :  { %v4769_v8 = vadd.f32 1e-05, %v4765_v52 }
0x298a   :  { %v4768_v29 = vadd.f32 1e-05, %v4764_v32 }
0x298b   :  { %6413 = vrsqrt.f32 %v4769_v8 }
0x298c   :  { %6415 = vrsqrt.f32 %v4768_v29 }
0x2995   :  { %v6414_v28 = vpop.eup %6413 }
0x2996   :  { %v6416_v39 = vpop.eup %6415  ;;  %v4777_v30 = vmul.f32 %v6414_v28, %v7637_v16  ;;  %v4806_v16 = vadd.f32 %v4805_v59, %v4804_v61 }
0x2997   :  { %v4776_v18 = vmul.f32 %v6416_v39, %v7639_v22 }
0x2998   :  { %v4787_v23 = vmul.f32 %v5114_v48, %v4777_v30  ;;  %v4808_v7 = vmul.f32 0.0625, %v4806_v16 }
0x2999   :  { %v4786_v10 = vmul.f32 %v5114_v48, %v4776_v18 }
0x299a   :  { %v4797_v26 = vadd.f32 %v5115_v42, %v4787_v23 }
0x299b   :  { %v4796_v63 = vadd.f32 %v5115_v42, %v4786_v10 }
0x299c   :  { %v4810_v40 = vsel %vm67_vm0, %v4797_v26, 0.0 }
0x299d   :  { %v4809_v6 = vsel %vm67_vm0, %v4796_v63, 0.0 }
0x299e   :  { %v4811_v38 = vadd.f32 %v4810_v40, %v4809_v6 }
0x29a0   :  { %v4812_v11 = vrot.slane %v4811_v38, 4 }
0x29a2   :  { %v4813_v25 = vadd.f32 %v4812_v11, %v4811_v38 }
0x29a4   :  { %v4814_v31 = vrot.slane %v4813_v25, 2 }
0x29a6   :  { %v4815_v17 = vadd.f32 %v4814_v31, %v4813_v25 }
0x29a8   :  { %v4816_v41 = vrot.slane %v4815_v17, 1 }
0x29aa   :  { %v4817_v22 = vadd.f32 %v4816_v41, %v4815_v17 }
0x29ac   :  { %v4818_v51 = vmul.f32 0.0625, %v4817_v22 }
0x29ae   :  { %v4820_v14 = vsel %vm4819_vm6, %v4808_v7, %v4818_v51 }
0x29af   :  { %5748 = vmatmul.mubr.msk.f32.vlgmr.msra.gmra.mrb[56].mxu1 %vm67_vm0, %v4820_v14 }
0x2a82   :  { %v4905_v5 = vpop.f32.mrb[56].mxu1 }
0x2a83   :  { %v4906_v2 = vadd.f32 %v5116_v20, %v4905_v5  ;;  %v5749_v43 = vpop.f32.mrb[57].mxu1 }
0x2a85   :  { %4909 = vst [vmem:[#allocation2] sm:$0x3] %v4906_v2 }
0x2a86   :  { %6428 = shalt.err (!%p6425_p4)
}
0x2a87   :  { %s6429_s11 = scalar_lea.hbm %s7718_s18, 32 }
0x2a88   :  { %p6430_p5 = scmp.ne.s32.totalorder %s7718_s18, %s6429_s11  ;;  %p6433_p6 = scmp.lt.u32.totalorder %s6429_s11, %s7718_s18 }
0x2a8a   :  { %p6435_p7 = pnand %p6433_p6, %p6430_p5 }
0x2a8c   :  { %6438 = shalt.err (!%p6435_p7)
}
0x2a8d   :  { %4919 = dma.vmem_to_hbm [thread:$0]  %s4917_s23, 32, %s7718_s18, [#allocation3]  }
0x2a8e   :  { %6439 = dma.done.wait [#allocation3], 32  }
0x2a8f   :  { %6440 = vsyncadd [#allocation3], 4294967264 }
0x2a90   :  { %4923 = vsyncpa [#allocation3], 1 }

</bundles_post_ra>
